<compile_context>
chip_gen: v7x
topology: tpu7x:2x2x1
jax: 0.10.0
libtpu: 0.0.40
codegen_flags: <defaults>
</compile_context>

<pallas_src>
import functools
import math

import jax
import jax.numpy as jnp
import numpy as np
from jax.experimental import pallas as pl
from jax.experimental.pallas import tpu as pltpu

# ----------------------------- configuration -------------------------------
BS, NS = 2, 8                       # batch, number of queries
FEATURE_DIM = 32                    # feature_dim
OUT_DIM = 32                        # out_dim (== feature_dim because of `out += feature`)
NUM_HEADS = 4
EMBED_DIM = FEATURE_DIM // NUM_HEADS
SP = 2                              # sample_point_per_axis
G = SP ** 3                         # sp^3 anchor points
GRID_SCALE = 80.0
SCALE = EMBED_DIM ** (-0.5)         # module divides q by this (i.e. * sqrt(embed_dim))
PLANE_HW = 16                       # tri-plane resolution (H == W)
OFF_PAD = 4                         # to_offset output padded 3 -> 4 lanes per head


def _token_block(bn, max_tb=256):
    """Single grid step for small token counts; only split when every tile
    still has >= 128 rows of real MXU M occupancy."""
    if bn <= max_tb:
        return bn
    for tb in range(max_tb, 127, -8):
        if bn % tb == 0:
            return tb
    return bn


def _point_block(n, max_tbn=128):
    """Point-axis tile for the sampler: <=128 points bounds the (N, 3*HW)
    weight intermediates; full extent when already small."""
    if n <= max_tbn:
        return n
    for tbn in range(max_tbn, 63, -8):
        if n % tbn == 0:
            return tbn
    return n


def _const_spec(shape, index_map):
    """BlockSpec for grid-invariant operands: single-buffered (no point double
    buffering a block whose index never changes)."""
    try:
        return pl.BlockSpec(shape, index_map, pipeline_mode=pl.Buffered(1))
    except Exception:  # older jax without pipeline_mode / Buffered
        return pl.BlockSpec(shape, index_map)


# ----------------------------- Pallas kernels ------------------------------
def _triplane_sampler_kernel(d_ref, pstack_ref, euv_ref, out_ref):
    """Gather-free bilinear tri-plane sampling (align_corners=True, clamped).

    d_ref   (1, TBN, 3*S) : (clamped pixel coord of axis a) - (tap index c); lane = a*S+c.
    pstack  (1, 3*H*W, C) : [xy; xz; yz] planes, row-major over (v, u).
    euv     (3*S, 2*3*HW) : constant 0/1 expansion [EU | EV]; U/V[n, p*HW+r*S+c]
                            pick tent_u / tent_v of plane p's axes.
    """
    # separable 1-D tents: max(1 - |coord - tap|, 0)  -- 3 VPU ops on (TBN, 48)
    tent = jnp.maximum(1.0 - jnp.abs(d_ref[0]), 0.0)
    # expand to per-plane (u, v) tent factors on the MXU (one push, shared LHS)
    uv = jnp.dot(tent, euv_ref[...], preferred_element_type=jnp.float32)  # (TBN, 2*3*HW)
    hw3 = pstack_ref.shape[1]
    w = uv[:, :hw3] * uv[:, hw3:]                       # bilinear weights, all 3 planes
    # single fused dot over the stacked planes
    out_ref[0] = jnp.dot(w, pstack_ref[0], preferred_element_type=jnp.float32)


def _ctx_offset_kernel(af_ref, wmc_ref, bctx_ref, wco_ref, woff_ref, off_ref):
    """anchor_feature slab (TB, G*NH*ED) -> padded offsets (TB, G*NH*4).

    w_mc folds the mean over anchors into offset_context; the (ctx + af) ->
    to_offset chain is split into two pre-folded matrices so no replicated
    intermediate is materialized."""
    af = af_ref[...]                                                     # (TB, 256)
    ctx = jnp.maximum(
        jnp.dot(af, wmc_ref[...], preferred_element_type=jnp.float32) + bctx_ref[...], 0.0)
    off_ref[...] = (jnp.dot(ctx, wco_ref[...], preferred_element_type=jnp.float32)
                    + jnp.dot(af, woff_ref[...], preferred_element_type=jnp.float32))


def _deform_attn_kernel(feat_ref, sf_ref, wqk_ref, bqk_ref, ssum_ref, dhead_ref,
                        pb_ref, wvo_ref, bout_ref, out_ref):
    """feature (TB, F) + sample_feature slab (TB, G*NH*F) -> out (TB, OUT)."""
    feat = feat_ref[...]                                                 # (TB, 32)
    sf = sf_ref[...]                                                     # (TB, 1024)

    # q is shared across heads & anchors, so to_k is folded into to_q
    # (W_qk = (w_q/scale) @ w_k^T) and replicated across the G*NH lane blocks.
    kq = jnp.dot(feat, wqk_ref[...], preferred_element_type=jnp.float32) + bqk_ref[...]
    # sim[t, h*G+g] = kq . sf[g,h,:]  (the q.b_k term is per-token constant and
    # cancels in the softmax).
    sim = jnp.dot(sf * kq, ssum_ref[...], preferred_element_type=jnp.float32)   # (TB, 32)
    # per-token row max == per-head constant shift -> softmax unchanged; den
    # floor guards the pathological cross-head underflow case.
    sim = sim - jnp.max(sim, axis=-1, keepdims=True)
    prob = jnp.exp(sim)
    den = jnp.dot(prob, dhead_ref[...], preferred_element_type=jnp.float32)     # per-head sum
    attn = prob * pl.reciprocal(jnp.maximum(den, 1e-20), approx=True)
    attn_b = jnp.dot(attn, pb_ref[...], preferred_element_type=jnp.float32)     # (TB, 1024)
    # to_v and to_out folded into one (G*NH*F, OUT) matrix; b_v/b_o folded into
    # b_out (sum(attn) == 1).
    out = jnp.dot(attn_b * sf, wvo_ref[...], preferred_element_type=jnp.float32) + bout_ref[...]
    out_ref[...] = out + feat                                            # `out += feature`


# ----------------------------- Pallas wrappers ------------------------------
def triplane_sample_pallas(points, pstack, kp):
    """points (bs, n, 3) in [-1, 1]; pstack (bs, 3*HW, C) -> (bs, n, C)."""
    bs, n, _ = points.shape
    hw3, cdim = pstack.shape[1], pstack.shape[2]
    tbn = _point_block(n)
    # clip/scale + tap offsets hoisted out of the kernel.
    pix = jnp.clip((points + 1.0) * (0.5 * (PLANE_HW - 1)), 0.0, PLANE_HW - 1.0)
    taps = jnp.tile(jnp.arange(PLANE_HW, dtype=jnp.float32), 3)          # (48,)
    d48 = jnp.repeat(pix, PLANE_HW, axis=-1) - taps                      # (bs, n, 48)
    euv = kp['euv']
    return pl.pallas_call(
        _triplane_sampler_kernel,
        out_shape=jax.ShapeDtypeStruct((bs, n, cdim), jnp.float32),
        grid=(bs, n // tbn),
        in_specs=[
            pl.BlockSpec((1, tbn, 3 * PLANE_HW), lambda b, i: (b, i, 0)),
            pl.BlockSpec((1, hw3, cdim), lambda b, i: (b, 0, 0)),
            _const_spec(euv.shape, lambda b, i: (0, 0)),
        ],
        out_specs=pl.BlockSpec((1, tbn, cdim), lambda b, i: (b, i, 0)),
        compiler_params=pltpu.CompilerParams(
            dimension_semantics=("parallel", "parallel")),
    )(d48, pstack, euv)


def context_offset_pallas(af_flat, kp):
    bn, width = af_flat.shape
    tb = _token_block(bn)
    out_width = G * NUM_HEADS * OFF_PAD                  # 128 lanes, unmasked stores
    return pl.pallas_call(
        _ctx_offset_kernel,
        out_shape=jax.ShapeDtypeStruct((bn, out_width), jnp.float32),
        grid=(bn // tb,),
        in_specs=[
            pl.BlockSpec((tb, width), lambda i: (i, 0)),
            _const_spec(kp['w_mc'].shape, lambda i: (0, 0)),
            _const_spec(kp['b_ctx32'].shape, lambda i: (0, 0)),
            _const_spec(kp['w_ctx_off'].shape, lambda i: (0, 0)),
            _const_spec(kp['w_off_big'].shape, lambda i: (0, 0)),
        ],
        out_specs=pl.BlockSpec((tb, out_width), lambda i: (i, 0)),
        compiler_params=pltpu.CompilerParams(dimension_semantics=("parallel",)),
    )(af_flat, kp['w_mc'], kp['b_ctx32'], kp['w_ctx_off'], kp['w_off_big'])


def deform_attn_pallas(feature_flat, sf_flat, kp):
    bn, fdim = feature_flat.shape
    sfw = sf_flat.shape[1]
    tb = _token_block(bn)
    return pl.pallas_call(
        _deform_attn_kernel,
        out_shape=jax.ShapeDtypeStruct((bn, OUT_DIM), jnp.float32),
        grid=(bn // tb,),
        in_specs=[
            pl.BlockSpec((tb, fdim), lambda i: (i, 0)),
            pl.BlockSpec((tb, sfw), lambda i: (i, 0)),
            _const_spec(kp['w_qk_rep'].shape, lambda i: (0, 0)),
            _const_spec(kp['b_qk_rep'].shape, lambda i: (0, 0)),
            _const_spec(kp['s_sum'].shape, lambda i: (0, 0)),
            _const_spec(kp['d_head'].shape, lambda i: (0, 0)),
            _const_spec(kp['p_bcast'].shape, lambda i: (0, 0)),
            _const_spec(kp['w_vo'].shape, lambda i: (0, 0)),
            _const_spec(kp['b_out'].shape, lambda i: (0, 0)),
        ],
        out_specs=pl.BlockSpec((tb, OUT_DIM), lambda i: (i, 0)),
        compiler_params=pltpu.CompilerParams(dimension_semantics=("parallel",)),
    )(feature_flat, sf_flat, kp['w_qk_rep'], kp['b_qk_rep'], kp['s_sum'],
      kp['d_head'], kp['p_bcast'], kp['w_vo'], kp['b_out'])


# --------------------- kernel parameter pre-expansion -----------------------
def build_kernel_params(p):
    nh, ed, g, f, s, hw = NUM_HEADS, EMBED_DIM, G, FEATURE_DIM, PLANE_HW, PLANE_HW * PLANE_HW
    eye = lambda n_: np.eye(n_, dtype=np.float32)

    # ---- sampler tent-expansion tables ----
    # tent lanes: a*S + c (a in {x,y,z}); plane lane: p*HW + r*S + c  (r=v, c=u)
    u_axis = (0, 0, 1)   # planes xy, xz, yz sample u from x, x, y
    v_axis = (1, 2, 2)   # and v from y, z, z
    EU = np.zeros((3 * s, 3 * hw), np.float32)
    EV = np.zeros((3 * s, 3 * hw), np.float32)
    for pidx in range(3):
        ua, va = u_axis[pidx], v_axis[pidx]
        for r in range(s):
            for c_ in range(s):
                lane = pidx * hw + r * s + c_
                EU[ua * s + c_, lane] = 1.0
                EV[va * s + r, lane] = 1.0
    euv = np.concatenate([EU, EV], axis=1)                               # (48, 1536)

    # ---- ctx / offset kernel ----
    w_ctx = np.asarray(p['w_ctx'], np.float32)
    b_ctx = np.asarray(p['b_ctx'], np.float32)
    w_off = np.asarray(p['w_off'], np.float32)
    w_mc = np.tile(np.kron(eye(nh), w_ctx), (g, 1)) / g                  # (256, 32)
    b_ctx32 = np.tile(b_ctx, (1, nh))                                    # (1, 32)
    w_off_pad = np.concatenate(
        [w_off, np.zeros((ed, OFF_PAD - 3), np.float32)], axis=1)        # (8, 4)
    w_off_big = np.kron(eye(g * nh), w_off_pad)                          # (256, 128)
    w_ctx_off = np.zeros((nh * ed, g * nh * OFF_PAD), np.float32)        # (32, 128)
    for gi in range(g):
        for h in range(nh):
            w_ctx_off[h * ed:(h + 1) * ed,
                      (gi * nh + h) * OFF_PAD:(gi * nh + h + 1) * OFF_PAD] = w_off_pad

    # ---- attention kernel ----
    w_q = np.asarray(p['w_q'], np.float32); b_q = np.asarray(p['b_q'], np.float32)
    w_k = np.asarray(p['w_k'], np.float32)
    w_v = np.asarray(p['w_v'], np.float32); b_v = np.asarray(p['b_v'], np.float32)
    w_o = np.asarray(p['w_o'], np.float32); b_o = np.asarray(p['b_o'], np.float32)

    w_qk = (w_q / SCALE) @ w_k.T                                         # (32, 32)
    b_qk = (b_q / SCALE) @ w_k.T                                         # (1, 32)
    w_qk_rep = np.tile(w_qk, (1, g * nh))                                # (32, 1024)
    b_qk_rep = np.tile(b_qk, (1, g * nh))                                # (1, 1024)

    s_sum = np.zeros((g * nh * f, nh * g), np.float32)                   # (1024, 32)
    p_bcast = np.zeros((nh * g, g * nh * f), np.float32)                 # (32, 1024)
    w_vo = np.zeros((g * nh * f, OUT_DIM), np.float32)                   # (1024, 32)
    for gi in range(g):
        for h in range(nh):
            blk = gi * nh + h
            s_sum[blk * f:(blk + 1) * f, h * g + gi] = 1.0
            p_bcast[h * g + gi, blk * f:(blk + 1) * f] = 1.0
            w_vo[blk * f:(blk + 1) * f, :] = w_v @ w_o[h * ed:(h + 1) * ed, :]
    d_head = np.kron(eye(nh), np.ones((g, g), np.float32))               # (32, 32)
    b_out = b_o.copy()
    for h in range(nh):
        b_out = b_out + b_v @ w_o[h * ed:(h + 1) * ed, :]                # (1, 32)

    to_jnp = lambda a: jnp.asarray(a, jnp.float32)
    return dict(
        euv=to_jnp(euv),
        w_mc=to_jnp(w_mc), b_ctx32=to_jnp(b_ctx32),
        w_ctx_off=to_jnp(w_ctx_off), w_off_big=to_jnp(w_off_big),
        w_qk_rep=to_jnp(w_qk_rep), b_qk_rep=to_jnp(b_qk_rep),
        s_sum=to_jnp(s_sum), d_head=to_jnp(d_head), p_bcast=to_jnp(p_bcast),
        w_vo=to_jnp(w_vo), b_out=to_jnp(b_out))


def prepare_plane_stack(c):
    """(bs, C, H, W) NCHW planes -> one stacked (bs, 3*H*W, C) lane-dense slab."""
    def to_hwc(plane):
        b_, ch, hh, ww = plane.shape
        return jnp.transpose(plane, (0, 2, 3, 1)).reshape(b_, hh * ww, ch)
    return jnp.concatenate([to_hwc(c['xy']), to_hwc(c['xz']), to_hwc(c['yz'])], axis=1)


# ----------------------------- plain-JAX glue -------------------------------
def quaternion_to_matrix(q):
    """q: (..., 4) in (w, x, y, z) order (pytorch3d convention)."""
    r, i, j, k = q[..., 0], q[..., 1], q[..., 2], q[..., 3]
    two_s = 2.0 / jnp.sum(q * q, axis=-1)
    m = jnp.stack([
        1 - two_s * (j * j + k * k), two_s * (i * j - k * r), two_s * (i * k + j * r),
        two_s * (i * j + k * r), 1 - two_s * (i * i + k * k), two_s * (j * k - i * r),
        two_s * (i * k - j * r), two_s * (j * k + i * r), 1 - two_s * (i * i + j * j),
    ], axis=-1)
    return m.reshape(q.shape[:-1] + (3, 3))


def _bilinear_sample_plane(plane, u, v):
    """Reference gather-based bilinear (NCHW, align_corners=True, clamp)."""
    bs, C, H, W = plane.shape
    uu = jnp.clip((u + 1.0) * 0.5 * (W - 1), 0.0, W - 1)
    vv = jnp.clip((v + 1.0) * 0.5 * (H - 1), 0.0, H - 1)
    u0 = jnp.clip(jnp.floor(uu).astype(jnp.int32), 0, W - 1)
    v0 = jnp.clip(jnp.floor(vv).astype(jnp.int32), 0, H - 1)
    u1 = jnp.minimum(u0 + 1, W - 1)
    v1 = jnp.minimum(v0 + 1, H - 1)
    du = (uu - u0.astype(uu.dtype))[..., None]
    dv = (vv - v0.astype(vv.dtype))[..., None]
    phwc = jnp.transpose(plane, (0, 2, 3, 1))          # (bs, H, W, C)

    def gather(vi, ui):
        return jax.vmap(lambda pb, a, b: pb[a, b])(phwc, vi, ui)  # (bs, N, C)

    f00 = gather(v0, u0); f01 = gather(v0, u1)
    f10 = gather(v1, u0); f11 = gather(v1, u1)
    top = f00 * (1 - du) + f01 * du
    bot = f10 * (1 - du) + f11 * du
    return top * (1 - dv) + bot * dv


def feature_sampler(points, c):
    """Injected dependency: tri-plane bilinear sampler (reference path)."""
    x, y, z = points[..., 0], points[..., 1], points[..., 2]
    return (_bilinear_sample_plane(c['xy'], x, y)
            + _bilinear_sample_plane(c['xz'], x, z)
            + _bilinear_sample_plane(c['yz'], y, z))


# ------------------------- pure-JAX reference paths -------------------------
def reference_ctx_offset(anchor_feature, p):
    m = jnp.mean(anchor_feature, axis=1, keepdims=True)                       # (BN,1,NH,ED)
    ctx = jax.nn.relu(jnp.einsum('bgne,ef->bgnf', m, p['w_ctx'],
                                 precision='highest') + p['b_ctx']) + anchor_feature
    return jnp.einsum('bgne,et->bgnt', ctx, p['w_off'], precision='highest')  # (BN,G,NH,3)


def reference_attention(feature_flat, sample_feature, p):
    q = (jnp.dot(feature_flat, p['w_q'], precision='highest') + p['b_q']) / SCALE
    k = jnp.einsum('bghf,fe->bghe', sample_feature, p['w_k'], precision='highest') + p['b_k']
    v = jnp.einsum('bghf,fe->bghe', sample_feature, p['w_v'], precision='highest') + p['b_v']
    k = jnp.transpose(k, (0, 2, 1, 3))                                        # (BN, NH, G, ED)
    v = jnp.transpose(v, (0, 2, 1, 3))
    sim = jnp.einsum('bd,bhjd->bhj', q, k, precision='highest')
    sim = sim - jnp.max(sim, axis=-1, keepdims=True)
    attn = jax.nn.softmax(sim, axis=-1)
    o = jnp.einsum('bhj,bhjd->bhd', attn, v, precision='highest')
    o = o.reshape(o.shape[0], NUM_HEADS * EMBED_DIM)
    return jnp.dot(o, p['w_o'], precision='highest') + p['b_o'] + feature_flat


# ------------------------------- full forward -------------------------------
def forward(query_pos_full, c, p, kp=None, use_pallas=True):
    """query_pos_full: (bs, ns, 7) = xyz (3) + quaternion (4)."""
    bs, ns, _ = query_pos_full.shape
    bn = bs * ns
    query_ori = query_pos_full[..., 3:]
    query_pos = query_pos_full[..., :3]

    grid_scaled = jnp.broadcast_to(p['grid_scaled'][None, None], (bs, ns, G, 3))
    rot = quaternion_to_matrix(query_ori.reshape(-1, 4)).reshape(bs, ns, 3, 3)
    grid_rot = jnp.einsum('bnpd,bngd->bngp', rot, grid_scaled)
    anchor_sample_point = query_pos[:, :, None, :] + grid_rot                 # (bs, ns, G, 3)

    if use_pallas:
        if kp is None:
            kp = build_kernel_params(p)
        pstack = prepare_plane_stack(c)

        # one merged sampler call for the query points and the anchor points
        pts_a = jnp.concatenate(
            [query_pos, anchor_sample_point.reshape(bs, ns * G, 3)], axis=1)  # (bs, ns*(1+G), 3)
        feat_a = triplane_sample_pallas(pts_a, pstack, kp)                    # (bs, ns*(1+G), F)
        feature = feat_a[:, :ns, :]                                           # (bs, ns, F)
        anchor_feature = feat_a[:, ns:, :]                                    # (bs, ns*G, F)

        af_flat = anchor_feature.reshape(bn, G * FEATURE_DIM)                 # lanes = [g, h, e]
        off_flat = context_offset_pallas(af_flat, kp)                         # (bn, G*NH*4)
        anchor_offset = off_flat.reshape(bn, G, NUM_HEADS, OFF_PAD)[..., :3]

        sample_point = (anchor_offset.reshape(bs, ns, G, NUM_HEADS, 3)
                        + anchor_sample_point[:, :, :, None, :])              # (bs,ns,G,NH,3)
        sample_feature = triplane_sample_pallas(
            sample_point.reshape(bs, -1, 3), pstack, kp)                      # (bs, ns*G*NH, F)

        feat_flat = feature.reshape(bn, FEATURE_DIM)
        sf_flat = sample_feature.reshape(bn, G * NUM_HEADS * FEATURE_DIM)     # lanes = [g, h, f]
        out = deform_attn_pallas(feat_flat, sf_flat, kp)
    else:
        feature = feature_sampler(query_pos, c).reshape(bs, ns, FEATURE_DIM)
        anchor_feature = feature_sampler(anchor_sample_point.reshape(bs, -1, 3), c)
        anchor_offset = reference_ctx_offset(
            anchor_feature.reshape(bn, G, NUM_HEADS, EMBED_DIM), p)
        sample_point = (anchor_offset.reshape(bs, ns, G, NUM_HEADS, 3)
                        + anchor_sample_point[:, :, :, None, :])
        sample_feature = feature_sampler(sample_point.reshape(bs, -1, 3), c)
        out = reference_attention(
            feature.reshape(bn, FEATURE_DIM),
            sample_feature.reshape(bn, G, NUM_HEADS, FEATURE_DIM), p)
    # dropout_layer: identity at inference time
    return out.reshape(bs, ns, OUT_DIM)


# ------------------------------- parameters ---------------------------------
def init_params(key):
    ks = jax.random.split(key, 10)

    def xavier_u(k, fi, fo):
        lim = math.sqrt(6.0 / (fi + fo))
        return jax.random.uniform(k, (fi, fo), jnp.float32, -lim, lim)

    def lin_bias(k, fi, fo):
        lim = 1.0 / math.sqrt(fi)
        return jax.random.uniform(k, (1, fo), jnp.float32, -lim, lim)

    # grid_scaled parameter exactly as in __init__ (normalized meshgrid / grid_scale)
    idx = jnp.arange(SP, dtype=jnp.float32)
    gf, gh, gw = jnp.meshgrid(idx, idx, idx, indexing='ij')
    norm = lambda t: 2.0 * t / max(SP - 1, 1) - 1.0
    grid_scaled = (jnp.stack([norm(gf), norm(gh), norm(gw)], axis=-1) / GRID_SCALE).reshape(G, 3)

    return dict(
        # offset_context: Linear(embed_dim, embed_dim)
        w_ctx=xavier_u(ks[0], EMBED_DIM, EMBED_DIM),
        b_ctx=lin_bias(ks[1], EMBED_DIM, EMBED_DIM),
        # to_offset: Linear(embed_dim, 3, bias=False), constant_init(0.)
        w_off=jnp.zeros((EMBED_DIM, 3), jnp.float32),
        # to_q / to_k / to_v: Linear(feature_dim, embed_dim), xavier uniform
        w_q=xavier_u(ks[2], FEATURE_DIM, EMBED_DIM), b_q=lin_bias(ks[3], FEATURE_DIM, EMBED_DIM),
        w_k=xavier_u(ks[4], FEATURE_DIM, EMBED_DIM), b_k=lin_bias(ks[5], FEATURE_DIM, EMBED_DIM),
        w_v=xavier_u(ks[6], FEATURE_DIM, EMBED_DIM), b_v=lin_bias(ks[7], FEATURE_DIM, EMBED_DIM),
        # to_out: Linear(feature_dim, out_dim)
        w_o=xavier_u(ks[8], FEATURE_DIM, OUT_DIM), b_o=lin_bias(ks[9], FEATURE_DIM, OUT_DIM),
        grid_scaled=grid_scaled,
    )


# ---------------------------------- main -------------------------------------
if __name__ == "__main__":
    key = jax.random.PRNGKey(0)
    k_param, k_pos, k_quat, k_xy, k_xz, k_yz, k_off = jax.random.split(key, 7)

    params = init_params(k_param)
    # The module zero-inits to_offset (fresh module => zero offsets); use small
    # nonzero values so the self-test exercises the deformed-sampling path.
    params['w_off'] = 0.01 * jax.random.normal(k_off, (EMBED_DIM, 3), jnp.float32)

    query_xyz = jax.random.uniform(k_pos, (BS, NS, 3), jnp.float32, -0.8, 0.8)
    query_quat = jax.random.normal(k_quat, (BS, NS, 4), jnp.float32)
    query_pos = jnp.concatenate([query_xyz, query_quat], axis=-1)             # (bs, ns, 7)

    c = {
        'xy': 0.5 * jax.random.normal(k_xy, (BS, FEATURE_DIM, PLANE_HW, PLANE_HW), jnp.float32),
        'xz': 0.5 * jax.random.normal(k_xz, (BS, FEATURE_DIM, PLANE_HW, PLANE_HW), jnp.float32),
        'yz': 0.5 * jax.random.normal(k_yz, (BS, FEATURE_DIM, PLANE_HW, PLANE_HW), jnp.float32),
    }

    kparams = build_kernel_params(params)

    fwd = jax.jit(functools.partial(forward, use_pallas=True))
    out = jax.block_until_ready(fwd(query_pos, c, params, kparams))

    ref = jax.block_until_ready(forward(query_pos, c, params, use_pallas=False))

    assert out.shape == (BS, NS, OUT_DIM)
    np.testing.assert_allclose(np.asarray(out), np.asarray(ref), rtol=1e-2, atol=1e-2)
    print("KERNEL_OK")
</pallas_src>

<mosaic_0001>
module attributes {stable_mosaic.version = 11 : i64} {
  func.func @_triplane_sampler_kernel(%arg0: i32, %arg1: i32, %arg2: memref<1x72x48xf32, #tpu.memory_space<vmem>>, %arg3: memref<1x768x32xf32, #tpu.memory_space<vmem>>, %arg4: memref<48x1536xf32, #tpu.memory_space<vmem>>, %arg5: memref<1x72x32xf32, #tpu.memory_space<vmem>>) attributes {dimension_semantics = [#tpu.dimension_semantics<parallel>, #tpu.dimension_semantics<parallel>], iteration_bounds = array<i64: 2, 1>, scalar_prefetch = 0 : i64, scratch_operands = 0 : i64, tpu.core_type = #tpu.core_type<tc>, window_params = [{transform_indices = @transform_0, window_bounds = array<i64: 1, 72, 48>}, {transform_indices = @transform_1, window_bounds = array<i64: 1, 768, 32>}, {pipeline_mode = #tpu.pipeline_mode<synchronous>, transform_indices = @transform_2, window_bounds = array<i64: 48, 1536>}, {transform_indices = @transform_3, window_bounds = array<i64: 1, 72, 32>}]} {
    %c0 = arith.constant 0 : index
    %c0_0 = arith.constant 0 : index
    %c0_1 = arith.constant 0 : index
    %0 = vector.load %arg2[%c0, %c0_0, %c0_1] : memref<1x72x48xf32, #tpu.memory_space<vmem>>, vector<1x72x48xf32>
    %1 = vector.shape_cast %0 : vector<1x72x48xf32> to vector<72x48xf32>
    %2 = math.absf %1 : vector<72x48xf32>
    %cst = arith.constant 1.000000e+00 : f32
    %3 = vector.broadcast %cst : f32 to vector<72x48xf32>
    %4 = arith.subf %3, %2 : vector<72x48xf32>
    %cst_2 = arith.constant 0.000000e+00 : f32
    %5 = vector.broadcast %cst_2 : f32 to vector<72x48xf32>
    %6 = arith.maximumf %4, %5 : vector<72x48xf32>
    %c0_3 = arith.constant 0 : index
    %c0_4 = arith.constant 0 : index
    %7 = vector.load %arg4[%c0_3, %c0_4] : memref<48x1536xf32, #tpu.memory_space<vmem>>, vector<48x1536xf32>
    %cst_5 = arith.constant dense<0.000000e+00> : vector<72x1536xf32>
    %8 = tpu.matmul %6, %7, %cst_5 {dimension_numbers = #tpu.dot_dimension_numbers<[1], [0], [0], [1], [0, 0, 1, 1], [], []>} : vector<72x48xf32>, vector<48x1536xf32>, vector<72x1536xf32> -> vector<72x1536xf32>
    %9 = vector.extract_strided_slice %8 {offsets = [0, 0], sizes = [72, 768], strides = [1, 1]} : vector<72x1536xf32> to vector<72x768xf32>
    %10 = vector.extract_strided_slice %8 {offsets = [0, 768], sizes = [72, 768], strides = [1, 1]} : vector<72x1536xf32> to vector<72x768xf32>
    %11 = arith.mulf %9, %10 : vector<72x768xf32>
    %c0_6 = arith.constant 0 : index
    %c0_7 = arith.constant 0 : index
    %c0_8 = arith.constant 0 : index
    %12 = vector.load %arg3[%c0_6, %c0_7, %c0_8] : memref<1x768x32xf32, #tpu.memory_space<vmem>>, vector<1x768x32xf32>
    %13 = vector.shape_cast %12 : vector<1x768x32xf32> to vector<768x32xf32>
    %cst_9 = arith.constant dense<0.000000e+00> : vector<72x32xf32>
    %14 = tpu.matmul %11, %13, %cst_9 {dimension_numbers = #tpu.dot_dimension_numbers<[1], [0], [0], [1], [0, 0, 1, 1], [], []>} : vector<72x768xf32>, vector<768x32xf32>, vector<72x32xf32> -> vector<72x32xf32>
    %c0_10 = arith.constant 0 : index
    %c0_11 = arith.constant 0 : index
    %c0_12 = arith.constant 0 : index
    %15 = vector.load %arg5[%c0_10, %c0_11, %c0_12] : memref<1x72x32xf32, #tpu.memory_space<vmem>>, vector<1x72x32xf32>
    %16 = vector.shape_cast %15 : vector<1x72x32xf32> to vector<72x32xf32>
    %17 = vector.shape_cast %14 : vector<72x32xf32> to vector<1x72x32xf32>
    tpu.vector_store %arg5[%c0_10, %c0_11, %c0_12], %17 {strides = array<i32>} : memref<1x72x32xf32, #tpu.memory_space<vmem>>, vector<1x72x32xf32>,
    return
  }
  func.func @transform_0(%arg0: i32, %arg1: i32) -> (i32, i32, i32) {
    %c0_i32 = arith.constant 0 : i32
    %c0_i32_0 = arith.constant 0 : i32
    return %arg0, %arg1, %c0_i32 : i32, i32, i32
  }
  func.func @transform_1(%arg0: i32, %arg1: i32) -> (i32, i32, i32) {
    %c0_i32 = arith.constant 0 : i32
    %c0_i32_0 = arith.constant 0 : i32
    %c0_i32_1 = arith.constant 0 : i32
    return %arg0, %c0_i32, %c0_i32_0 : i32, i32, i32
  }
  func.func @transform_2(%arg0: i32, %arg1: i32) -> (i32, i32) {
    %c0_i32 = arith.constant 0 : i32
    %c0_i32_0 = arith.constant 0 : i32
    %c0_i32_1 = arith.constant 0 : i32
    return %c0_i32, %c0_i32_0 : i32, i32
  }
  func.func @transform_3(%arg0: i32, %arg1: i32) -> (i32, i32, i32) {
    %c0_i32 = arith.constant 0 : i32
    %c0_i32_0 = arith.constant 0 : i32
    return %arg0, %arg1, %c0_i32 : i32, i32, i32
  }
}

module attributes {stable_mosaic.version = 11 : i64} {
  func.func @_ctx_offset_kernel(%arg0: i32, %arg1: memref<16x256xf32, #tpu.memory_space<vmem>>, %arg2: memref<256x32xf32, #tpu.memory_space<vmem>>, %arg3: memref<1x32xf32, #tpu.memory_space<vmem>>, %arg4: memref<32x128xf32, #tpu.memory_space<vmem>>, %arg5: memref<256x128xf32, #tpu.memory_space<vmem>>, %arg6: memref<16x128xf32, #tpu.memory_space<vmem>>) attributes {dimension_semantics = [#tpu.dimension_semantics<parallel>], iteration_bounds = array<i64: 1>, scalar_prefetch = 0 : i64, scratch_operands = 0 : i64, tpu.core_type = #tpu.core_type<tc>, window_params = [{transform_indices = @transform_0, window_bounds = array<i64: 16, 256>}, {pipeline_mode = #tpu.pipeline_mode<synchronous>, transform_indices = @transform_1, window_bounds = array<i64: 256, 32>}, {pipeline_mode = #tpu.pipeline_mode<synchronous>, transform_indices = @transform_2, window_bounds = array<i64: 1, 32>}, {pipeline_mode = #tpu.pipeline_mode<synchronous>, transform_indices = @transform_3, window_bounds = array<i64: 32, 128>}, {pipeline_mode = #tpu.pipeline_mode<synchronous>, transform_indices = @transform_4, window_bounds = array<i64: 256, 128>}, {transform_indices = @transform_5, window_bounds = array<i64: 16, 128>}]} {
    %c0 = arith.constant 0 : index
    %c0_0 = arith.constant 0 : index
    %0 = vector.load %arg1[%c0, %c0_0] : memref<16x256xf32, #tpu.memory_space<vmem>>, vector<16x256xf32>
    %c0_1 = arith.constant 0 : index
    %c0_2 = arith.constant 0 : index
    %1 = vector.load %arg2[%c0_1, %c0_2] : memref<256x32xf32, #tpu.memory_space<vmem>>, vector<256x32xf32>
    %cst = arith.constant dense<0.000000e+00> : vector<16x32xf32>
    %2 = tpu.matmul %0, %1, %cst {dimension_numbers = #tpu.dot_dimension_numbers<[1], [0], [0], [1], [0, 0, 1, 1], [], []>} : vector<16x256xf32>, vector<256x32xf32>, vector<16x32xf32> -> vector<16x32xf32>
    %c0_3 = arith.constant 0 : index
    %c0_4 = arith.constant 0 : index
    %3 = vector.load %arg3[%c0_3, %c0_4] : memref<1x32xf32, #tpu.memory_space<vmem>>, vector<1x32xf32>
    %4 = vector.broadcast %3 : vector<1x32xf32> to vector<16x32xf32>
    %5 = arith.addf %2, %4 : vector<16x32xf32>
    %cst_5 = arith.constant 0.000000e+00 : f32
    %6 = vector.broadcast %cst_5 : f32 to vector<16x32xf32>
    %7 = arith.maximumf %5, %6 : vector<16x32xf32>
    %c0_6 = arith.constant 0 : index
    %c0_7 = arith.constant 0 : index
    %8 = vector.load %arg4[%c0_6, %c0_7] : memref<32x128xf32, #tpu.memory_space<vmem>>, vector<32x128xf32>
    %cst_8 = arith.constant dense<0.000000e+00> : vector<16x128xf32>
    %9 = tpu.matmul %7, %8, %cst_8 {dimension_numbers = #tpu.dot_dimension_numbers<[1], [0], [0], [1], [0, 0, 1, 1], [], []>} : vector<16x32xf32>, vector<32x128xf32>, vector<16x128xf32> -> vector<16x128xf32>
    %c0_9 = arith.constant 0 : index
    %c0_10 = arith.constant 0 : index
    %10 = vector.load %arg5[%c0_9, %c0_10] : memref<256x128xf32, #tpu.memory_space<vmem>>, vector<256x128xf32>
    %cst_11 = arith.constant dense<0.000000e+00> : vector<16x128xf32>
    %11 = tpu.matmul %0, %10, %cst_11 {dimension_numbers = #tpu.dot_dimension_numbers<[1], [0], [0], [1], [0, 0, 1, 1], [], []>} : vector<16x256xf32>, vector<256x128xf32>, vector<16x128xf32> -> vector<16x128xf32>
    %12 = arith.addf %9, %11 : vector<16x128xf32>
    %c0_12 = arith.constant 0 : index
    %c0_13 = arith.constant 0 : index
    %13 = vector.load %arg6[%c0_12, %c0_13] : memref<16x128xf32, #tpu.memory_space<vmem>>, vector<16x128xf32>
    tpu.vector_store %arg6[%c0_12, %c0_13], %12 {strides = array<i32>} : memref<16x128xf32, #tpu.memory_space<vmem>>, vector<16x128xf32>,
    return
  }
  func.func @transform_0(%arg0: i32) -> (i32, i32) {
    %c0_i32 = arith.constant 0 : i32
    %c0_i32_0 = arith.constant 0 : i32
    return %arg0, %c0_i32 : i32, i32
  }
  func.func @transform_1(%arg0: i32) -> (i32, i32) {
    %c0_i32 = arith.constant 0 : i32
    %c0_i32_0 = arith.constant 0 : i32
    %c0_i32_1 = arith.constant 0 : i32
    return %c0_i32, %c0_i32_0 : i32, i32
  }
  func.func @transform_2(%arg0: i32) -> (i32, i32) {
    %c0_i32 = arith.constant 0 : i32
    %c0_i32_0 = arith.constant 0 : i32
    %c0_i32_1 = arith.constant 0 : i32
    return %c0_i32, %c0_i32_0 : i32, i32
  }
  func.func @transform_3(%arg0: i32) -> (i32, i32) {
    %c0_i32 = arith.constant 0 : i32
    %c0_i32_0 = arith.constant 0 : i32
    %c0_i32_1 = arith.constant 0 : i32
    return %c0_i32, %c0_i32_0 : i32, i32
  }
  func.func @transform_4(%arg0: i32) -> (i32, i32) {
    %c0_i32 = arith.constant 0 : i32
    %c0_i32_0 = arith.constant 0 : i32
    %c0_i32_1 = arith.constant 0 : i32
    return %c0_i32, %c0_i32_0 : i32, i32
  }
  func.func @transform_5(%arg0: i32) -> (i32, i32) {
    %c0_i32 = arith.constant 0 : i32
    %c0_i32_0 = arith.constant 0 : i32
    return %arg0, %c0_i32 : i32, i32
  }
}

module attributes {stable_mosaic.version = 11 : i64} {
  func.func @_triplane_sampler_kernel(%arg0: i32, %arg1: i32, %arg2: memref<1x128x48xf32, #tpu.memory_space<vmem>>, %arg3: memref<1x768x32xf32, #tpu.memory_space<vmem>>, %arg4: memref<48x1536xf32, #tpu.memory_space<vmem>>, %arg5: memref<1x128x32xf32, #tpu.memory_space<vmem>>) attributes {dimension_semantics = [#tpu.dimension_semantics<parallel>, #tpu.dimension_semantics<parallel>], iteration_bounds = array<i64: 2, 2>, scalar_prefetch = 0 : i64, scratch_operands = 0 : i64, tpu.core_type = #tpu.core_type<tc>, window_params = [{transform_indices = @transform_0, window_bounds = array<i64: 1, 128, 48>}, {transform_indices = @transform_1, window_bounds = array<i64: 1, 768, 32>}, {pipeline_mode = #tpu.pipeline_mode<synchronous>, transform_indices = @transform_2, window_bounds = array<i64: 48, 1536>}, {transform_indices = @transform_3, window_bounds = array<i64: 1, 128, 32>}]} {
    %c0 = arith.constant 0 : index
    %c0_0 = arith.constant 0 : index
    %c0_1 = arith.constant 0 : index
    %0 = vector.load %arg2[%c0, %c0_0, %c0_1] : memref<1x128x48xf32, #tpu.memory_space<vmem>>, vector<1x128x48xf32>
    %1 = vector.shape_cast %0 : vector<1x128x48xf32> to vector<128x48xf32>
    %2 = math.absf %1 : vector<128x48xf32>
    %cst = arith.constant 1.000000e+00 : f32
    %3 = vector.broadcast %cst : f32 to vector<128x48xf32>
    %4 = arith.subf %3, %2 : vector<128x48xf32>
    %cst_2 = arith.constant 0.000000e+00 : f32
    %5 = vector.broadcast %cst_2 : f32 to vector<128x48xf32>
    %6 = arith.maximumf %4, %5 : vector<128x48xf32>
    %c0_3 = arith.constant 0 : index
    %c0_4 = arith.constant 0 : index
    %7 = vector.load %arg4[%c0_3, %c0_4] : memref<48x1536xf32, #tpu.memory_space<vmem>>, vector<48x1536xf32>
    %cst_5 = arith.constant dense<0.000000e+00> : vector<128x1536xf32>
    %8 = tpu.matmul %6, %7, %cst_5 {dimension_numbers = #tpu.dot_dimension_numbers<[1], [0], [0], [1], [0, 0, 1, 1], [], []>} : vector<128x48xf32>, vector<48x1536xf32>, vector<128x1536xf32> -> vector<128x1536xf32>
    %9 = vector.extract_strided_slice %8 {offsets = [0, 0], sizes = [128, 768], strides = [1, 1]} : vector<128x1536xf32> to vector<128x768xf32>
    %10 = vector.extract_strided_slice %8 {offsets = [0, 768], sizes = [128, 768], strides = [1, 1]} : vector<128x1536xf32> to vector<128x768xf32>
    %11 = arith.mulf %9, %10 : vector<128x768xf32>
    %c0_6 = arith.constant 0 : index
    %c0_7 = arith.constant 0 : index
    %c0_8 = arith.constant 0 : index
    %12 = vector.load %arg3[%c0_6, %c0_7, %c0_8] : memref<1x768x32xf32, #tpu.memory_space<vmem>>, vector<1x768x32xf32>
    %13 = vector.shape_cast %12 : vector<1x768x32xf32> to vector<768x32xf32>
    %cst_9 = arith.constant dense<0.000000e+00> : vector<128x32xf32>
    %14 = tpu.matmul %11, %13, %cst_9 {dimension_numbers = #tpu.dot_dimension_numbers<[1], [0], [0], [1], [0, 0, 1, 1], [], []>} : vector<128x768xf32>, vector<768x32xf32>, vector<128x32xf32> -> vector<128x32xf32>
    %c0_10 = arith.constant 0 : index
    %c0_11 = arith.constant 0 : index
    %c0_12 = arith.constant 0 : index
    %15 = vector.load %arg5[%c0_10, %c0_11, %c0_12] : memref<1x128x32xf32, #tpu.memory_space<vmem>>, vector<1x128x32xf32>
    %16 = vector.shape_cast %15 : vector<1x128x32xf32> to vector<128x32xf32>
    %17 = vector.shape_cast %14 : vector<128x32xf32> to vector<1x128x32xf32>
    tpu.vector_store %arg5[%c0_10, %c0_11, %c0_12], %17 {strides = array<i32>} : memref<1x128x32xf32, #tpu.memory_space<vmem>>, vector<1x128x32xf32>,
    return
  }
  func.func @transform_0(%arg0: i32, %arg1: i32) -> (i32, i32, i32) {
    %c0_i32 = arith.constant 0 : i32
    %c0_i32_0 = arith.constant 0 : i32
    return %arg0, %arg1, %c0_i32 : i32, i32, i32
  }
  func.func @transform_1(%arg0: i32, %arg1: i32) -> (i32, i32, i32) {
    %c0_i32 = arith.constant 0 : i32
    %c0_i32_0 = arith.constant 0 : i32
    %c0_i32_1 = arith.constant 0 : i32
    return %arg0, %c0_i32, %c0_i32_0 : i32, i32, i32
  }
  func.func @transform_2(%arg0: i32, %arg1: i32) -> (i32, i32) {
    %c0_i32 = arith.constant 0 : i32
    %c0_i32_0 = arith.constant 0 : i32
    %c0_i32_1 = arith.constant 0 : i32
    return %c0_i32, %c0_i32_0 : i32, i32
  }
  func.func @transform_3(%arg0: i32, %arg1: i32) -> (i32, i32, i32) {
    %c0_i32 = arith.constant 0 : i32
    %c0_i32_0 = arith.constant 0 : i32
    return %arg0, %arg1, %c0_i32 : i32, i32, i32
  }
}

module attributes {stable_mosaic.version = 11 : i64} {
  func.func @_deform_attn_kernel(%arg0: i32, %arg1: memref<16x32xf32, #tpu.memory_space<vmem>>, %arg2: memref<16x1024xf32, #tpu.memory_space<vmem>>, %arg3: memref<32x1024xf32, #tpu.memory_space<vmem>>, %arg4: memref<1x1024xf32, #tpu.memory_space<vmem>>, %arg5: memref<1024x32xf32, #tpu.memory_space<vmem>>, %arg6: memref<32x32xf32, #tpu.memory_space<vmem>>, %arg7: memref<32x1024xf32, #tpu.memory_space<vmem>>, %arg8: memref<1024x32xf32, #tpu.memory_space<vmem>>, %arg9: memref<1x32xf32, #tpu.memory_space<vmem>>, %arg10: memref<16x32xf32, #tpu.memory_space<vmem>>) attributes {dimension_semantics = [#tpu.dimension_semantics<parallel>], iteration_bounds = array<i64: 1>, scalar_prefetch = 0 : i64, scratch_operands = 0 : i64, tpu.core_type = #tpu.core_type<tc>, window_params = [{transform_indices = @transform_0, window_bounds = array<i64: 16, 32>}, {transform_indices = @transform_1, window_bounds = array<i64: 16, 1024>}, {pipeline_mode = #tpu.pipeline_mode<synchronous>, transform_indices = @transform_2, window_bounds = array<i64: 32, 1024>}, {pipeline_mode = #tpu.pipeline_mode<synchronous>, transform_indices = @transform_3, window_bounds = array<i64: 1, 1024>}, {pipeline_mode = #tpu.pipeline_mode<synchronous>, transform_indices = @transform_4, window_bounds = array<i64: 1024, 32>}, {pipeline_mode = #tpu.pipeline_mode<synchronous>, transform_indices = @transform_5, window_bounds = array<i64: 32, 32>}, {pipeline_mode = #tpu.pipeline_mode<synchronous>, transform_indices = @transform_6, window_bounds = array<i64: 32, 1024>}, {pipeline_mode = #tpu.pipeline_mode<synchronous>, transform_indices = @transform_7, window_bounds = array<i64: 1024, 32>}, {pipeline_mode = #tpu.pipeline_mode<synchronous>, transform_indices = @transform_8, window_bounds = array<i64: 1, 32>}, {transform_indices = @transform_9, window_bounds = array<i64: 16, 32>}]} {
    %c0 = arith.constant 0 : index
    %c0_0 = arith.constant 0 : index
    %0 = vector.load %arg1[%c0, %c0_0] : memref<16x32xf32, #tpu.memory_space<vmem>>, vector<16x32xf32>
    %c0_1 = arith.constant 0 : index
    %c0_2 = arith.constant 0 : index
    %1 = vector.load %arg2[%c0_1, %c0_2] : memref<16x1024xf32, #tpu.memory_space<vmem>>, vector<16x1024xf32>
    %c0_3 = arith.constant 0 : index
    %c0_4 = arith.constant 0 : index
    %2 = vector.load %arg3[%c0_3, %c0_4] : memref<32x1024xf32, #tpu.memory_space<vmem>>, vector<32x1024xf32>
    %cst = arith.constant dense<0.000000e+00> : vector<16x1024xf32>
    %3 = tpu.matmul %0, %2, %cst {dimension_numbers = #tpu.dot_dimension_numbers<[1], [0], [0], [1], [0, 0, 1, 1], [], []>} : vector<16x32xf32>, vector<32x1024xf32>, vector<16x1024xf32> -> vector<16x1024xf32>
    %c0_5 = arith.constant 0 : index
    %c0_6 = arith.constant 0 : index
    %4 = vector.load %arg4[%c0_5, %c0_6] : memref<1x1024xf32, #tpu.memory_space<vmem>>, vector<1x1024xf32>
    %5 = vector.broadcast %4 : vector<1x1024xf32> to vector<16x1024xf32>
    %6 = arith.addf %3, %5 : vector<16x1024xf32>
    %7 = arith.mulf %1, %6 : vector<16x1024xf32>
    %c0_7 = arith.constant 0 : index
    %c0_8 = arith.constant 0 : index
    %8 = vector.load %arg5[%c0_7, %c0_8] : memref<1024x32xf32, #tpu.memory_space<vmem>>, vector<1024x32xf32>
    %cst_9 = arith.constant dense<0.000000e+00> : vector<16x32xf32>
    %9 = tpu.matmul %7, %8, %cst_9 {dimension_numbers = #tpu.dot_dimension_numbers<[1], [0], [0], [1], [0, 0, 1, 1], [], []>} : vector<16x1024xf32>, vector<1024x32xf32>, vector<16x32xf32> -> vector<16x32xf32>
    %cst_10 = arith.constant dense<0xFF800000> : vector<16xf32>
    %10 = vector.multi_reduction <maximumf>, %9, %cst_10 [1] : vector<16x32xf32> to vector<16xf32>
    %11 = vector.shape_cast %10 : vector<16xf32> to vector<16x1xf32>
    %12 = vector.broadcast %11 : vector<16x1xf32> to vector<16x32xf32>
    %13 = arith.subf %9, %12 : vector<16x32xf32>
    %14 = math.exp %13 : vector<16x32xf32>
    %c0_11 = arith.constant 0 : index
    %c0_12 = arith.constant 0 : index
    %15 = vector.load %arg6[%c0_11, %c0_12] : memref<32x32xf32, #tpu.memory_space<vmem>>, vector<32x32xf32>
    %cst_13 = arith.constant dense<0.000000e+00> : vector<16x32xf32>
    %16 = tpu.matmul %14, %15, %cst_13 {dimension_numbers = #tpu.dot_dimension_numbers<[1], [0], [0], [1], [0, 0, 1, 1], [], []>} : vector<16x32xf32>, vector<32x32xf32>, vector<16x32xf32> -> vector<16x32xf32>
    %cst_14 = arith.constant 9.99999968E-21 : f32
    %17 = vector.broadcast %cst_14 : f32 to vector<16x32xf32>
    %18 = arith.maximumf %16, %17 : vector<16x32xf32>
    %19 = tpu.reciprocal %18 {approx = true} : vector<16x32xf32> -> vector<16x32xf32>
    %20 = arith.mulf %14, %19 : vector<16x32xf32>
    %c0_15 = arith.constant 0 : index
    %c0_16 = arith.constant 0 : index
    %21 = vector.load %arg7[%c0_15, %c0_16] : memref<32x1024xf32, #tpu.memory_space<vmem>>, vector<32x1024xf32>
    %cst_17 = arith.constant dense<0.000000e+00> : vector<16x1024xf32>
    %22 = tpu.matmul %20, %21, %cst_17 {dimension_numbers = #tpu.dot_dimension_numbers<[1], [0], [0], [1], [0, 0, 1, 1], [], []>} : vector<16x32xf32>, vector<32x1024xf32>, vector<16x1024xf32> -> vector<16x1024xf32>
    %23 = arith.mulf %22, %1 : vector<16x1024xf32>
    %c0_18 = arith.constant 0 : index
    %c0_19 = arith.constant 0 : index
    %24 = vector.load %arg8[%c0_18, %c0_19] : memref<1024x32xf32, #tpu.memory_space<vmem>>, vector<1024x32xf32>
    %cst_20 = arith.constant dense<0.000000e+00> : vector<16x32xf32>
    %25 = tpu.matmul %23, %24, %cst_20 {dimension_numbers = #tpu.dot_dimension_numbers<[1], [0], [0], [1], [0, 0, 1, 1], [], []>} : vector<16x1024xf32>, vector<1024x32xf32>, vector<16x32xf32> -> vector<16x32xf32>
    %c0_21 = arith.constant 0 : index
    %c0_22 = arith.constant 0 : index
    %26 = vector.load %arg9[%c0_21, %c0_22] : memref<1x32xf32, #tpu.memory_space<vmem>>, vector<1x32xf32>
    %27 = vector.broadcast %26 : vector<1x32xf32> to vector<16x32xf32>
    %28 = arith.addf %25, %27 : vector<16x32xf32>
    %29 = arith.addf %28, %0 : vector<16x32xf32>
    %c0_23 = arith.constant 0 : index
    %c0_24 = arith.constant 0 : index
    %30 = vector.load %arg10[%c0_23, %c0_24] : memref<16x32xf32, #tpu.memory_space<vmem>>, vector<16x32xf32>
    tpu.vector_store %arg10[%c0_23, %c0_24], %29 {strides = array<i32>} : memref<16x32xf32, #tpu.memory_space<vmem>>, vector<16x32xf32>,
    return
  }
  func.func @transform_0(%arg0: i32) -> (i32, i32) {
    %c0_i32 = arith.constant 0 : i32
    %c0_i32_0 = arith.constant 0 : i32
    return %arg0, %c0_i32 : i32, i32
  }
  func.func @transform_1(%arg0: i32) -> (i32, i32) {
    %c0_i32 = arith.constant 0 : i32
    %c0_i32_0 = arith.constant 0 : i32
    return %arg0, %c0_i32 : i32, i32
  }
  func.func @transform_2(%arg0: i32) -> (i32, i32) {
    %c0_i32 = arith.constant 0 : i32
    %c0_i32_0 = arith.constant 0 : i32
    %c0_i32_1 = arith.constant 0 : i32
    return %c0_i32, %c0_i32_0 : i32, i32
  }
  func.func @transform_3(%arg0: i32) -> (i32, i32) {
    %c0_i32 = arith.constant 0 : i32
    %c0_i32_0 = arith.constant 0 : i32
    %c0_i32_1 = arith.constant 0 : i32
    return %c0_i32, %c0_i32_0 : i32, i32
  }
  func.func @transform_4(%arg0: i32) -> (i32, i32) {
    %c0_i32 = arith.constant 0 : i32
    %c0_i32_0 = arith.constant 0 : i32
    %c0_i32_1 = arith.constant 0 : i32
    return %c0_i32, %c0_i32_0 : i32, i32
  }
  func.func @transform_5(%arg0: i32) -> (i32, i32) {
    %c0_i32 = arith.constant 0 : i32
    %c0_i32_0 = arith.constant 0 : i32
    %c0_i32_1 = arith.constant 0 : i32
    return %c0_i32, %c0_i32_0 : i32, i32
  }
  func.func @transform_6(%arg0: i32) -> (i32, i32) {
    %c0_i32 = arith.constant 0 : i32
    %c0_i32_0 = arith.constant 0 : i32
    %c0_i32_1 = arith.constant 0 : i32
    return %c0_i32, %c0_i32_0 : i32, i32
  }
  func.func @transform_7(%arg0: i32) -> (i32, i32) {
    %c0_i32 = arith.constant 0 : i32
    %c0_i32_0 = arith.constant 0 : i32
    %c0_i32_1 = arith.constant 0 : i32
    return %c0_i32, %c0_i32_0 : i32, i32
  }
  func.func @transform_8(%arg0: i32) -> (i32, i32) {
    %c0_i32 = arith.constant 0 : i32
    %c0_i32_0 = arith.constant 0 : i32
    %c0_i32_1 = arith.constant 0 : i32
    return %c0_i32, %c0_i32_0 : i32, i32
  }
  func.func @transform_9(%arg0: i32) -> (i32, i32) {
    %c0_i32 = arith.constant 0 : i32
    %c0_i32_0 = arith.constant 0 : i32
    return %arg0, %c0_i32 : i32, i32
  }
}

</mosaic_0001>

<bundles_post_ra>
// kernel: sub.21
= control target key start
LH: loop header
LB: loop body
LE: loop exit
PB: predicated region body
PF: predicated region fallthrough
CT: control target
= control target key end

     0   :  { %vm7_vm0 = vcmask 130048   ;;  %s30_s8 = smov 16   ;;  %vm13_vm1 = vcmask 392448   ;;  %vm19_vm2 = vcmask 261248   ;;  %s47_s0 = inlined_call_operand.vmem [shape: f32[3,16], index: 0, kind: input, shape index: {}]   ;;  %s48_s1 = inlined_call_operand.vmem [shape: f32[48], index: 1, kind: output, shape index: {}]  }
   0x1   :  { %v4_v0 = vld [vmem:[%s47_s0] sm:$0xf]  ;;  %s29_s0 = smov 32  }
   0x2   :  { %5 = vst [vmem:[#allocation1] sm:$0xf] %v4_v0 }
   0x9   :  { %v10_v1 = vld [vmem:[#allocation1 + $0x2] sm:$0x1]   ;;  %v6_v2 = vld [vmem:[#allocation1] sm:$0x1]   ;;  %v16_v3 = vld [vmem:[#allocation1 + $0x1] sm:$0x1]  }
   0xa   :  { %11 = vrot.lane.b32.xlu0 %v10_v1, %s29_s0  ;;  %8 = vst.msk [vmem:[#allocation0] sm:$0x1] %vm7_vm0, %v6_v2  }
   0xe   :  { %17 = vrot.lane.b32.xlu0 %v16_v3, %s30_s8 }
  0x7c   :  { %v12_v4 = vpop.permute.xlu0 %11  }
  0x7d   :  { %14 = vst.msk [vmem:[#allocation0] sm:$0x1] %vm13_vm1, %v12_v4  }
  0x80   :  { %v18_v5 = vpop.permute.xlu0 %17  }
  0x81   :  { %20 = vst.msk [vmem:[#allocation0] sm:$0x1] %vm19_vm2, %v18_v5  }
  0x88   :  { %v24_v6 = vld [vmem:[#allocation0] sm:$0x1] }
  0x89   :  { %26 = vst [vmem:[%s48_s1] sm:$0x1] %v24_v6 }

// kernel: forward.5
= control target key start
LH: loop header
LB: loop body
LE: loop exit
PB: predicated region body
PF: predicated region fallthrough
CT: control target
= control target key end

     0   :  { %vm251_vm0 = vcmask 261120   ;;  %s762_s1 = inlined_call_operand.vmem [shape: f32[256,32], index: 1, kind: input, shape index: {}]   ;;  %s763_s0 = inlined_call_operand.vmem [shape: f32[16,256], index: 0, kind: input, shape index: {}]   ;;  %s764_s4 = inlined_call_operand.vmem [shape: f32[256,128], index: 4, kind: input, shape index: {}]   ;;  %s765_s3 = inlined_call_operand.vmem [shape: f32[32,128], index: 3, kind: input, shape index: {}]   ;;  %s766_s2 = inlined_call_operand.vmem [shape: f32[1,32], index: 2, kind: input, shape index: {}]   ;;  %s767_s5 = inlined_call_operand.vmem [shape: f32[16,128], index: 5, kind: output, shape index: {}]  }
   0x1   :  { %v40_v0 = vld [vmem:[%s762_s1 + $0x80] sm:$0xff]  ;;  %v41_v1 = vld [vmem:[%s762_s1 + $0x88] sm:$0xff]  ;;  %v42_v5 = vld [vmem:[%s762_s1 + $0x90] sm:$0xff] }
   0x2   :  { %v24_v2 = vld [vmem:[%s762_s1] sm:$0xff]  ;;  %v435_v3 = vpack.c.bf16 %v41_v1, %v40_v0  ;;  %v25_v4 = vld [vmem:[%s762_s1 + $0x8] sm:$0xff]  ;;  %v43_v6 = vld [vmem:[%s762_s1 + $0x98] sm:$0xff] }
   0x3   :  { %v437_v7 = vpack.c.bf16 %v25_v4, %v24_v2  ;;  %v439_v8 = vpack.c.bf16 %v43_v6, %v42_v5  ;;  %v26_v9 = vld [vmem:[%s762_s1 + $0x10] sm:$0xff]  ;;  %v27_v10 = vld [vmem:[%s762_s1 + $0x18] sm:$0xff]  ;;  %v44_v11 = vld [vmem:[%s762_s1 + $0xa0] sm:$0xff] }
   0x4   :  { %436 = vmatprep.subr.bf16.mxu0 %v435_v3  ;;  %v45_v12 = vld [vmem:[%s762_s1 + $0xa8] sm:$0xff]  ;;  %v441_v13 = vpack.c.bf16 %v27_v10, %v26_v9  ;;  %v28_v15 = vld [vmem:[%s762_s1 + $0x20] sm:$0xff]  ;;  %v46_v17 = vld [vmem:[%s762_s1 + $0xb0] sm:$0xff] }
   0x5   :  { %438 = vmatpush3.bf16.msra.mxu0 %v437_v7  ;;  %v443_v14 = vpack.c.bf16 %v45_v12, %v44_v11  ;;  %v29_v16 = vld [vmem:[%s762_s1 + $0x28] sm:$0xff]  ;;  %v47_v18 = vld [vmem:[%s762_s1 + $0xb8] sm:$0xff]  ;;  %v30_v21 = vld [vmem:[%s762_s1 + $0x30] sm:$0xff] }
   0x6   :  { %440 = vmatprep.subr.bf16.mxu0 %v439_v8  ;;  %v445_v19 = vpack.c.bf16 %v29_v16, %v28_v15  ;;  %v447_v20 = vpack.c.bf16 %v47_v18, %v46_v17  ;;  %v31_v22 = vld [vmem:[%s762_s1 + $0x38] sm:$0xff]  ;;  %v48_v23 = vld [vmem:[%s762_s1 + $0xc0] sm:$0xff]  ;;  %v49_v24 = vld [vmem:[%s762_s1 + $0xc8] sm:$0xff] }
   0x7   :  { %v21_v25 = vld [vmem:[%s763_s0 + $0x8] sm:$0xff]  ;;  %v32_v26 = vld [vmem:[%s762_s1 + $0x40] sm:$0xff]  ;;  %v449_v28 = vpack.c.bf16 %v31_v22, %v30_v21  ;;  %v50_v29 = vld [vmem:[%s762_s1 + $0xd0] sm:$0xff]  ;;  %v451_v34 = vpack.c.bf16 %v49_v24, %v48_v23 }
   0x8   :  { %v33_v27 = vld [vmem:[%s762_s1 + $0x48] sm:$0xff]  ;;  %127 = vmatprep.mubr.f32.mxu0 %v21_v25  ;;  %240 = vmatprep.mubr.f32.mxu1 %v21_v25  ;;  %v51_v30 = vld [vmem:[%s762_s1 + $0xd8] sm:$0xff]  ;;  %v160_v31 = vld [vmem:[%s764_s4 + $0x80] sm:$0xff] }
   0x9   :  { %442 = vmatpush3.bf16.msra.mxu0 %v441_v13  ;;  %v161_v32 = vld [vmem:[%s764_s4 + $0x88] sm:$0xff]  ;;  %v144_v33 = vld [vmem:[%s764_s4] sm:$0xff]  ;;  %v162_v37 = vld [vmem:[%s764_s4 + $0x90] sm:$0xff]  ;;  %v453_v45 = vpack.c.bf16 %v33_v27, %v32_v26  ;;  %v455_v49 = vpack.c.bf16 %v51_v30, %v50_v29 }
   0xa   :  { %444 = vmatprep.subr.bf16.mxu0 %v443_v14  ;;  %v467_v35 = vpack.c.bf16 %v161_v32, %v160_v31  ;;  %v145_v36 = vld [vmem:[%s764_s4 + $0x8] sm:$0xff]  ;;  %v163_v38 = vld [vmem:[%s764_s4 + $0x98] sm:$0xff]  ;;  %v146_v41 = vld [vmem:[%s764_s4 + $0x10] sm:$0xff] }
   0xb   :  { %v469_v39 = vpack.c.bf16 %v145_v36, %v144_v33  ;;  %v471_v40 = vpack.c.bf16 %v163_v38, %v162_v37  ;;  %v147_v42 = vld [vmem:[%s764_s4 + $0x18] sm:$0xff]  ;;  %v164_v43 = vld [vmem:[%s764_s4 + $0xa0] sm:$0xff]  ;;  %v165_v44 = vld [vmem:[%s764_s4 + $0xa8] sm:$0xff] }
   0xc   :  { %468 = vmatprep.subr.bf16.mxu1 %v467_v35  ;;  %v34_v46 = vld [vmem:[%s762_s1 + $0x50] sm:$0xff]  ;;  %v35_v47 = vld [vmem:[%s762_s1 + $0x58] sm:$0xff]  ;;  %v473_v48 = vpack.c.bf16 %v147_v42, %v146_v41  ;;  %v52_v50 = vld [vmem:[%s762_s1 + $0xe0] sm:$0xff]  ;;  %v475_v51 = vpack.c.bf16 %v165_v44, %v164_v43 }
   0xd   :  { %446 = vmatpush3.bf16.msra.mxu0 %v445_v19  ;;  %470 = vmatpush3.bf16.msra.mxu1 %v469_v39  ;;  %v148_v52 = vld [vmem:[%s764_s4 + $0x20] sm:$0xff]  ;;  %v149_v53 = vld [vmem:[%s764_s4 + $0x28] sm:$0xff]  ;;  %v166_v55 = vld [vmem:[%s764_s4 + $0xb0] sm:$0xff]  ;;  %v457_v57 = vpack.c.bf16 %v35_v47, %v34_v46 }
   0xe   :  { %448 = vmatprep.subr.bf16.mxu0 %v447_v20  ;;  %472 = vmatprep.subr.bf16.mxu1 %v471_v40  ;;  %v53_v54 = vld [vmem:[%s762_s1 + $0xe8] sm:$0xff]  ;;  %v167_v56 = vld [vmem:[%s764_s4 + $0xb8] sm:$0xff]  ;;  %v36_v58 = vld [vmem:[%s762_s1 + $0x60] sm:$0xff]  ;;  %v477_v60 = vpack.c.bf16 %v149_v53, %v148_v52 }
   0xf   :  { %v37_v59 = vld [vmem:[%s762_s1 + $0x68] sm:$0xff]  ;;  %v459_v61 = vpack.c.bf16 %v53_v54, %v52_v50  ;;  %v54_v62 = vld [vmem:[%s762_s1 + $0xf0] sm:$0xff]  ;;  %v479_v63 = vpack.c.bf16 %v167_v56, %v166_v55  ;;  %v151_v1 = vld [vmem:[%s764_s4 + $0x38] sm:$0xff] }
  0x10   :  { %v150_v0 = vld [vmem:[%s764_s4 + $0x30] sm:$0xff]  ;;  %v55_v2 = vld [vmem:[%s762_s1 + $0xf8] sm:$0xff]  ;;  %v168_v3 = vld [vmem:[%s764_s4 + $0xc0] sm:$0xff]  ;;  %v461_v5 = vpack.c.bf16 %v37_v59, %v36_v58 }
  0x11   :  { %450 = vmatpush3.bf16.msra.mxu0 %v449_v28  ;;  %474 = vmatpush3.bf16.msra.mxu1 %v473_v48  ;;  %v169_v4 = vld [vmem:[%s764_s4 + $0xc8] sm:$0xff]  ;;  %v38_v6 = vld [vmem:[%s762_s1 + $0x70] sm:$0xff]  ;;  %v481_v7 = vpack.c.bf16 %v151_v1, %v150_v0  ;;  %v463_v8 = vpack.c.bf16 %v55_v2, %v54_v62  ;;  %v39_v9 = vld [vmem:[%s762_s1 + $0x78] sm:$0xff] }
  0x12   :  { %452 = vmatprep.subr.bf16.mxu0 %v451_v34  ;;  %476 = vmatprep.subr.bf16.mxu1 %v475_v51  ;;  %v483_v10 = vpack.c.bf16 %v169_v4, %v168_v3  ;;  %v152_v11 = vld [vmem:[%s764_s4 + $0x40] sm:$0xff]  ;;  %v153_v12 = vld [vmem:[%s764_s4 + $0x48] sm:$0xff]  ;;  %v170_v13 = vld [vmem:[%s764_s4 + $0xd0] sm:$0xff]  ;;  %v465_v15 = vpack.c.bf16 %v39_v9, %v38_v6 }
  0x13   :  { %v171_v14 = vld [vmem:[%s764_s4 + $0xd8] sm:$0xff]  ;;  %v485_v16 = vpack.c.bf16 %v153_v12, %v152_v11  ;;  %v154_v18 = vld [vmem:[%s764_s4 + $0x50] sm:$0xff]  ;;  %v172_v20 = vld [vmem:[%s764_s4 + $0xe0] sm:$0xff] }
  0x14   :  { %v487_v17 = vpack.c.bf16 %v171_v14, %v170_v13  ;;  %v155_v19 = vld [vmem:[%s764_s4 + $0x58] sm:$0xff]  ;;  %v173_v21 = vld [vmem:[%s764_s4 + $0xe8] sm:$0xff]  ;;  %v20_v22 = vld [vmem:[%s763_s0] sm:$0xff] }
  0x15   :  { %454 = vmatpush3.bf16.msra.mxu0 %v453_v45  ;;  %478 = vmatpush3.bf16.msra.mxu1 %v477_v60  ;;  %v489_v23 = vpack.c.bf16 %v155_v19, %v154_v18  ;;  %v23_v24 = vld [vmem:[%s763_s0 + $0x18] sm:$0xff]  ;;  %v491_v25 = vpack.c.bf16 %v173_v21, %v172_v20  ;;  %v156_v26 = vld [vmem:[%s764_s4 + $0x60] sm:$0xff]  ;;  %v157_v27 = vld [vmem:[%s764_s4 + $0x68] sm:$0xff] }
  0x16   :  { %456 = vmatprep.subr.bf16.mxu0 %v455_v49  ;;  %480 = vmatprep.subr.bf16.mxu1 %v479_v63  ;;  %v22_v28 = vld [vmem:[%s763_s0 + $0x10] sm:$0xff]  ;;  %v493_v29 = vpack.c.bf16 %v157_v27, %v156_v26  ;;  %v175_v31 = vld [vmem:[%s764_s4 + $0xf8] sm:$0xff]  ;;  %v140_v36 = vld [vmem:[%s765_s3] sm:$0xff] }
  0x17   :  { %v174_v30 = vld [vmem:[%s764_s4 + $0xf0] sm:$0xff]  ;;  %v159_v34 = vld [vmem:[%s764_s4 + $0x78] sm:$0xff]  ;;  %v141_v37 = vld [vmem:[%s765_s3 + $0x8] sm:$0xff] }
  0x18   :  { %v495_v32 = vpack.c.bf16 %v175_v31, %v174_v30  ;;  %v158_v33 = vld [vmem:[%s764_s4 + $0x70] sm:$0xff]  ;;  %v499_v38 = vpack.c.bf16 %v141_v37, %v140_v36  ;;  %v143_v40 = vld [vmem:[%s765_s3 + $0x18] sm:$0xff]  ;;  %v339_v43 = vld [vmem:[%s766_s2] ss:$0 sm:$0xff] }
  0x19   :  { %458 = vmatpush3.bf16.msra.mxu0 %v457_v57  ;;  %482 = vmatpush3.bf16.msra.mxu1 %v481_v7  ;;  %v497_v35 = vpack.c.bf16 %v159_v34, %v158_v33  ;;  %v142_v39 = vld [vmem:[%s765_s3 + $0x10] sm:$0xff] }
  0x1a   :  { %460 = vmatprep.subr.bf16.mxu0 %v459_v61  ;;  %484 = vmatprep.subr.bf16.mxu1 %v483_v10  ;;  %v503_v41 = vpack.c.bf16 %v143_v40, %v142_v39 }
  0x1d   :  { %462 = vmatpush3.bf16.msra.mxu0 %v461_v5  ;;  %486 = vmatpush3.bf16.msra.mxu1 %v485_v16 }
  0x1e   :  { %464 = vmatprep.subr.bf16.mxu0 %v463_v8  ;;  %488 = vmatprep.subr.bf16.mxu1 %v487_v17 }
  0x21   :  { %466 = vmatpush3.bf16.msra.mxu0 %v465_v15  ;;  %490 = vmatpush3.bf16.msra.mxu1 %v489_v23 }
  0x22   :  { %492 = vmatprep.subr.bf16.mxu1 %v491_v25  ;;  %500 = vmatprep.subr.bf16.mxu0 %v499_v38 }
  0x24   :  { %128 = vmatmul.mubr.f32.vlgmr.msra.gmra.mrb[0].mxu0 %v20_v22 }
  0x25   :  { %132 = vmatprep.mubr.f32.mxu0 %v23_v24  ;;  %494 = vmatpush3.bf16.msra.mxu1 %v493_v29 }
  0x26   :  { %496 = vmatprep.subr.bf16.mxu1 %v495_v32  ;;  %502 = vmatpush3.bf16.msra.mxu0 %v499_v38 }
  0x27   :  { %504 = vmatprep.subr.bf16.mxu0 %v503_v41 }
  0x28   :  { %133 = vmatmul.mubr.f32.gmra.mrb[2].mxu0 %v22_v28 }
  0x29   :  { %498 = vmatpush3.bf16.msra.mxu1 %v497_v35 }
  0x2a   :  { %506 = vmatpush3.bf16.msra.mxu0 %v503_v41 }
  0x2c   :  { %241 = vmatmul.mubr.f32.vlgmr.msra.gmra.mrb[0].mxu1 %v20_v22 }
  0x2d   :  { %245 = vmatprep.mubr.f32.mxu1 %v23_v24 }
  0x30   :  { %246 = vmatmul.mubr.f32.gmra.mrb[2].mxu1 %v22_v28 }
  0xf7   :  { %v374_v42 = vpop.f32.mrb[0].mxu0 }
  0xf8   :  { %v375_v44 = vpop.f32.mrb[1].mxu0 }
  0xf9   :  { %v376_v45 = vadd.f32 %v375_v44, %v374_v42 }
  0xfb   :  { %v130_v46 = vadd.f32 %v376_v45, %v339_v43  ;;  %v377_v47 = vpop.f32.mrb[2].mxu0 }
  0xfc   :  { %v378_v48 = vpop.f32.mrb[3].mxu0 }
  0xfd   :  { %v138_v49 = vmax.f32 %v130_v46, 0.0  ;;  %v379_v50 = vadd.f32 %v378_v48, %v377_v47 }
  0xff   :  { %v135_v51 = vadd.f32 %v379_v50, %v339_v43  ;;  %432 = vmatprep.mubr.msk.f32.mxu0 %vm251_vm0, %v138_v49  ;;  %v412_v53 = vpop.f32.mrb[0].mxu1 }
 0x100   :  { %v413_v54 = vpop.f32.mrb[1].mxu1 }
 0x101   :  { %v139_v52 = vmax.f32 %v135_v51, 0.0  ;;  %v414_v55 = vadd.f32 %v413_v54, %v412_v53 }
 0x103   :  { %433 = vmatmul.mubr.msk.f32.vlgmr.msra.gmra.mrb[4].mxu0 %vm251_vm0, %v139_v52  ;;  %v415_v56 = vpop.f32.mrb[2].mxu1 }
 0x104   :  { %v416_v57 = vpop.f32.mrb[3].mxu1 }
 0x105   :  { %v417_v58 = vadd.f32 %v416_v57, %v415_v56 }
 0x1d6   :  { %v434_v59 = vpop.f32.mrb[4].mxu0 }
 0x1d7   :  { %v330_v60 = vadd.f32 %v434_v59, %v417_v58  ;;  %v324_v61 = vpop.f32.mrb[5].mxu0 }
 0x1d8   :  { %v325_v62 = vadd.f32 %v414_v55, %v324_v61 }
 0x1d9   :  { %334 = vst [vmem:[%s767_s5 + $0x8] sm:$0xff] %v330_v60 }
 0x1da   :  { %333 = vst [vmem:[%s767_s5] sm:$0xff] %v325_v62 }

// kernel: forward.4
= control target key start
LH: loop header
LB: loop body
LE: loop exit
PB: predicated region body
PF: predicated region fallthrough
CT: control target
= control target key end

     0   :  { %s2156_s12 = smov 0   ;;  %s2158_s13 = smov 0   ;;  %s2875_s0 = inlined_call_operand.vmem [shape: f32[2,72,48], index: 0, kind: input, shape index: {}]   ;;  %s2876_s1 = inlined_call_operand.vmem [shape: f32[2,768,32], index: 1, kind: input, shape index: {}]   ;;  %s2877_s2 = inlined_call_operand.vmem [shape: f32[48,1536], index: 2, kind: input, shape index: {}]   ;;  %s2878_s3 = inlined_call_operand.vmem [shape: f32[2,72,32], index: 3, kind: output, shape index: {}]  }
   0x1   :  { %s2160_s14 = smov 0  }
   0x2 LB: > { %s25_s15 = sadd.s32 1, %s2129_s13  ;;  %p1673_p0 = scmp.ge.s32.totalorder %s2133_s14, 1  ;;  %s2133_s14 = sphi %s2160_s14, %s13_s14   ;;  %s2129_s13 = sphi %s2158_s13, %s2898_s13   ;;  %s2125_s12 = sphi %s2156_s12, %s2897_s12  }
   0x3   : > { %p27_p1 = scmp.ge.s32.totalorder %s25_s15, 2  ;;  %p168_p2 = scmp.lt.s32.totalorder %s2133_s14, 3 }
   0x5   : > { %s2900_s15 = smov (%p27_p1, %s25_s15), 0  ;;  %p169_p3 = pnand %p1673_p0, %p168_p2 }
   0x7   : > { %172 = sbr.rel (%p169_p3) target bundleno = 584 (0x248), region = 32 }
   0xe   : > { %v267_v0 = vld [vmem:[%s2877_s2 + $0x8] sm:$0xff]  ;;  %v266_v2 = vld [vmem:[%s2877_s2] sm:$0xff]  ;;  %p206_p4 = scmp.lt.s32.totalorder %s2125_s12, 1  ;;  %v2135_v7 = vmov 0.0   ;;  %v269_v18 = vld [vmem:[%s2877_s2 + $0x18] sm:$0xff]  ;;  %vm338_vm0 = vcmask 392192  }
   0xf   : > { %v279_v1 = vld [vmem:[%s2877_s2 + $0x68] sm:$0xff]  ;;  %v278_v4 = vld [vmem:[%s2877_s2 + $0x60] sm:$0xff]  ;;  %430 = vmatprep.mubr.f32.mxu0 %v2135_v7  ;;  %460 = vmatprep.mubr.f32.mxu1 %v2135_v7  ;;  %v281_v19 = vld [vmem:[%s2877_s2 + $0x78] sm:$0xff]  ;;  %vm1560_vm1 = vcmask 261120  }
  0x10   : > { %v1910_v3 = vpack.c.bf16 %v279_v1, %v267_v0  ;;  %v291_v5 = vld [vmem:[%s2877_s2 + $0xc8] sm:$0xff]  ;;  %v1912_v8 = vpack.c.bf16 %v278_v4, %v266_v2  ;;  %v290_v10 = vld [vmem:[%s2877_s2 + $0xc0] sm:$0xff]  ;;  %s2902_s12 = smov (!%p206_p4, %s2125_s12), 1  ;;  %v268_v23 = vld [vmem:[%s2877_s2 + $0x10] sm:$0xff]  ;;  %v1922_v32 = vpack.c.bf16 %v281_v19, %v269_v18 }
  0x11   : > { %v303_v6 = vld [vmem:[%s2877_s2 + $0x128] sm:$0xff]  ;;  %v302_v11 = vld [vmem:[%s2877_s2 + $0x120] sm:$0xff]  ;;  %s2084_s9 = smul.u32 72, %s2902_s12  ;;  %v280_v24 = vld [vmem:[%s2877_s2 + $0x70] sm:$0xff] }
  0x12   : > { %v1914_v9 = vpack.c.bf16 %v303_v6, %v291_v5  ;;  %v315_v12 = vld [vmem:[%s2877_s2 + $0x188] sm:$0xff]  ;;  %1911 = vmatprep.subr.bf16.mxu0 %v1910_v3  ;;  %2078 = vmatprep.subr.bf16.mxu1 %v1910_v3  ;;  %v1916_v14 = vpack.c.bf16 %v302_v11, %v290_v10  ;;  %v314_v16 = vld [vmem:[%s2877_s2 + $0x180] sm:$0xff]  ;;  %v293_v30 = vld [vmem:[%s2877_s2 + $0xd8] sm:$0xff]  ;;  %v1924_v48 = vpack.c.bf16 %v280_v24, %v268_v23  ;;  %s2085_s5 = smul.u32 768, %s2902_s12 }
  0x13   : > { %v327_v13 = vld [vmem:[%s2877_s2 + $0x1e8] sm:$0xff]  ;;  %1913 = vmatpush1.bf16.msra.mxu0 %v1912_v8  ;;  %2081 = vmatpush1.bf16.msra.mxu1 %v1912_v8  ;;  %v326_v17 = vld [vmem:[%s2877_s2 + $0x1e0] sm:$0xff]  ;;  %s2220_s20 = scalar_lea.vmem %s2875_s0, %s2084_s9  ;;  %v305_v31 = vld [vmem:[%s2877_s2 + $0x138] sm:$0xff]  ;;  %s2846_s16 = scalar_lea.vmem %s2878_s3, %s2084_s9 }
  0x14   : > { %1915 = vmatprep.subr.bf16.mxu0 %v1914_v9  ;;  %2079 = vmatprep.subr.bf16.mxu1 %v1914_v9  ;;  %v1918_v15 = vpack.c.bf16 %v327_v13, %v315_v12  ;;  %v271_v20 = vld [vmem:[%s2877_s2 + $0x28] sm:$0xff]  ;;  %v230_v21 = vld [vmem:[%s2220_s20] sm:$0xff]  ;;  %v1920_v26 = vpack.c.bf16 %v326_v17, %v314_v16  ;;  %v236_v33 = vld [vmem:[%s2220_s20 + $0x30] sm:$0xff]  ;;  %v1926_v52 = vpack.c.bf16 %v305_v31, %v293_v30  ;;  %s2578_s8 = scalar_lea.vmem %s2876_s1, %s2085_s5 }
  0x15   : > { %v235_v22 = vld [vmem:[%s2220_s20 + $0x28] sm:$0xff]  ;;  %v239_v27 = vand.u32 2147483647, %v230_v21  ;;  %v232_v34 = vld [vmem:[%s2220_s20 + $0x10] sm:$0xff]  ;;  %v237_v35 = vld [vmem:[%s2220_s20 + $0x38] sm:$0xff] }
  0x16   : > { %v231_v25 = vld [vmem:[%s2220_s20 + $0x8] sm:$0xff]  ;;  %v244_v28 = vand.u32 2147483647, %v235_v22  ;;  %v245_v39 = vand.u32 2147483647, %v236_v33  ;;  %v270_v44 = vld [vmem:[%s2877_s2 + $0x20] sm:$0xff] }
  0x17   : > { %1917 = vmatpush1.bf16.msra.mxu0 %v1916_v14  ;;  %2082 = vmatpush1.bf16.msra.mxu1 %v1916_v14  ;;  %v240_v29 = vand.u32 2147483647, %v231_v25  ;;  %v248_v36 = vsub.f32 1.0, %v239_v27  ;;  %v283_v40 = vld [vmem:[%s2877_s2 + $0x88] sm:$0xff]  ;;  %v241_v41 = vand.u32 2147483647, %v232_v34 }
  0x18   : > { %1919 = vmatprep.subr.bf16.mxu0 %v1918_v15  ;;  %2080 = vmatprep.subr.bf16.mxu1 %v1918_v15  ;;  %v253_v37 = vsub.f32 1.0, %v244_v28  ;;  %v246_v42 = vand.u32 2147483647, %v237_v35  ;;  %v1934_v43 = vpack.c.bf16 %v283_v40, %v271_v20  ;;  %v282_v45 = vld [vmem:[%s2877_s2 + $0x80] sm:$0xff]  ;;  %v254_v49 = vsub.f32 1.0, %v245_v39  ;;  %v292_v50 = vld [vmem:[%s2877_s2 + $0xd0] sm:$0xff] }
  0x19   : > { %v249_v38 = vsub.f32 1.0, %v240_v29  ;;  %v2258_v46 = vmax.f32 %v248_v36, 0.0  ;;  %v304_v53 = vld [vmem:[%s2877_s2 + $0x130] sm:$0xff]  ;;  %v233_v54 = vld [vmem:[%s2220_s20 + $0x18] sm:$0xff]  ;;  %v238_v55 = vld [vmem:[%s2220_s20 + $0x40] sm:$0xff]  ;;  %v250_v56 = vsub.f32 1.0, %v241_v41  ;;  %v1936_v58 = vpack.c.bf16 %v282_v45, %v270_v44 }
  0x1a   : > { %v2260_v47 = vmax.f32 %v253_v37, 0.0  ;;  %v255_v57 = vsub.f32 1.0, %v246_v42  ;;  %v317_v59 = vld [vmem:[%s2877_s2 + $0x198] sm:$0xff]  ;;  %v242_v61 = vand.u32 2147483647, %v233_v54  ;;  %v2282_v62 = vmax.f32 %v254_v49, 0.0 }
  0x1b   : > { %1921 = vmatpush1.bf16.msra.mxu0 %v1920_v26  ;;  %2083 = vmatpush1.bf16.msra.mxu1 %v1920_v26  ;;  %v2265_v51 = vmax.f32 %v249_v38, 0.0  ;;  %v329_v60 = vld [vmem:[%s2877_s2 + $0x1f8] sm:$0xff]  ;;  %v247_v63 = vand.u32 2147483647, %v238_v55  ;;  %v295_v0 = vld [vmem:[%s2877_s2 + $0xe8] sm:$0xff]  ;;  %v294_v2 = vld [vmem:[%s2877_s2 + $0xe0] sm:$0xff]  ;;  %v1928_v5 = vpack.c.bf16 %v304_v53, %v292_v50 }
  0x1c   : > { %1923 = vmatprep.subr.bf16.mxu1 %v1922_v32  ;;  %1935 = vmatprep.subr.bf16.mxu0 %v1934_v43  ;;  %v307_v1 = vld [vmem:[%s2877_s2 + $0x148] sm:$0xff]  ;;  %v306_v3 = vld [vmem:[%s2877_s2 + $0x140] sm:$0xff]  ;;  %v1930_v6 = vpack.c.bf16 %v329_v60, %v317_v59  ;;  %v316_v8 = vld [vmem:[%s2877_s2 + $0x190] sm:$0xff]  ;;  %v2305_v11 = vmax.f32 %v250_v56, 0.0  ;;  %v2307_v12 = vmax.f32 %v255_v57, 0.0  ;;  %v251_v13 = vsub.f32 1.0, %v242_v61 }
  0x1d   : > { %v234_v4 = vld [vmem:[%s2220_s20 + $0x20] sm:$0xff]  ;;  %v328_v9 = vld [vmem:[%s2877_s2 + $0x1f0] sm:$0xff]  ;;  %v1938_v10 = vpack.c.bf16 %v307_v1, %v295_v0  ;;  %v1940_v14 = vpack.c.bf16 %v306_v3, %v294_v2  ;;  %v319_v15 = vld [vmem:[%s2877_s2 + $0x1a8] sm:$0xff]  ;;  %v256_v18 = vsub.f32 1.0, %v247_v63 }
  0x1e   : > { %1677 = vmatmul.mubr.msk.f32.vlgmr.msra.gmra.mrb[0].mxu0 %vm338_vm0, %v2258_v46  ;;  %1682 = vmatmul.mubr.msk.f32.vlgmr.msra.gmra.mrb[0].mxu1 %vm338_vm0, %v2260_v47  ;;  %v331_v16 = vld [vmem:[%s2877_s2 + $0x208] sm:$0xff]  ;;  %v273_v17 = vld [vmem:[%s2877_s2 + $0x38] sm:$0xff]  ;;  %v243_v19 = vand.u32 2147483647, %v234_v4  ;;  %v318_v21 = vld [vmem:[%s2877_s2 + $0x1a0] sm:$0xff]  ;;  %v1932_v23 = vpack.c.bf16 %v328_v9, %v316_v8  ;;  %v2343_v29 = vmax.f32 %v251_v13, 0.0 }
  0x1f   : > { %1925 = vmatpush1.bf16.msra.mxu1 %v1924_v48  ;;  %436 = vmatprep.mubr.f32.mxu0 %v2135_v7  ;;  %v285_v20 = vld [vmem:[%s2877_s2 + $0x98] sm:$0xff]  ;;  %v330_v22 = vld [vmem:[%s2877_s2 + $0x200] sm:$0xff]  ;;  %v1942_v24 = vpack.c.bf16 %v331_v16, %v319_v15  ;;  %v275_v27 = vld [vmem:[%s2877_s2 + $0x48] sm:$0xff]  ;;  %v2345_v30 = vmax.f32 %v256_v18, 0.0 }
  0x20   : > { %466 = vmatprep.mubr.f32.mxu1 %v2135_v7  ;;  %1927 = vmatprep.subr.bf16.mxu1 %v1926_v52  ;;  %v1946_v25 = vpack.c.bf16 %v285_v20, %v273_v17  ;;  %v1944_v26 = vpack.c.bf16 %v330_v22, %v318_v21  ;;  %v287_v28 = vld [vmem:[%s2877_s2 + $0xa8] sm:$0xff]  ;;  %v252_v31 = vsub.f32 1.0, %v243_v19  ;;  %v272_v32 = vld [vmem:[%s2877_s2 + $0x30] sm:$0xff]  ;;  %v297_v35 = vld [vmem:[%s2877_s2 + $0xf8] sm:$0xff] }
  0x21   : > { %1937 = vmatpush1.bf16.msra.mxu0 %v1936_v58  ;;  %v284_v33 = vld [vmem:[%s2877_s2 + $0x90] sm:$0xff]  ;;  %v1958_v34 = vpack.c.bf16 %v287_v28, %v275_v27  ;;  %v309_v36 = vld [vmem:[%s2877_s2 + $0x158] sm:$0xff]  ;;  %v274_v43 = vld [vmem:[%s2877_s2 + $0x40] sm:$0xff] }
  0x22   : > { %1678 = vmatmul.mubr.msk.f32.gmra.mrb[2].mxu0 %vm338_vm0, %v2265_v51  ;;  %1683 = vmatmul.mubr.msk.f32.gmra.mrb[2].mxu1 %vm338_vm0, %v2282_v62  ;;  %v2365_v37 = vmax.f32 %v252_v31, 0.0  ;;  %v1948_v38 = vpack.c.bf16 %v284_v33, %v272_v32  ;;  %v1950_v39 = vpack.c.bf16 %v309_v36, %v297_v35  ;;  %v296_v40 = vld [vmem:[%s2877_s2 + $0xf0] sm:$0xff]  ;;  %v321_v42 = vld [vmem:[%s2877_s2 + $0x1b8] sm:$0xff]  ;;  %v286_v44 = vld [vmem:[%s2877_s2 + $0xa0] sm:$0xff] }
  0x23   : > { %442 = vmatprep.mubr.f32.mxu0 %v2135_v7  ;;  %472 = vmatprep.mubr.f32.mxu1 %v2135_v7  ;;  %v308_v41 = vld [vmem:[%s2877_s2 + $0x150] sm:$0xff]  ;;  %v333_v45 = vld [vmem:[%s2877_s2 + $0x218] sm:$0xff]  ;;  %v299_v48 = vld [vmem:[%s2877_s2 + $0x108] sm:$0xff]  ;;  %v1960_v54 = vpack.c.bf16 %v286_v44, %v274_v43 }
  0x24   : > { %1929 = vmatpush1.bf16.msra.mxu1 %v1928_v5  ;;  %1939 = vmatprep.subr.bf16.mxu0 %v1938_v10  ;;  %v311_v49 = vld [vmem:[%s2877_s2 + $0x168] sm:$0xff]  ;;  %v1952_v50 = vpack.c.bf16 %v308_v41, %v296_v40  ;;  %v320_v52 = vld [vmem:[%s2877_s2 + $0x1b0] sm:$0xff]  ;;  %v1954_v55 = vpack.c.bf16 %v333_v45, %v321_v42  ;;  %v298_v57 = vld [vmem:[%s2877_s2 + $0x100] sm:$0xff] }
  0x25   : > { %1931 = vmatprep.subr.bf16.mxu1 %v1930_v6  ;;  %1941 = vmatpush1.bf16.msra.mxu0 %v1940_v14  ;;  %v332_v53 = vld [vmem:[%s2877_s2 + $0x210] sm:$0xff]  ;;  %v1962_v56 = vpack.c.bf16 %v311_v49, %v299_v48  ;;  %v310_v58 = vld [vmem:[%s2877_s2 + $0x160] sm:$0xff]  ;;  %v323_v59 = vld [vmem:[%s2877_s2 + $0x1c8] sm:$0xff] }
  0x26   : > { %1679 = vmatmul.mubr.msk.f32.gmra.mrb[4].mxu0 %vm338_vm0, %v2305_v11  ;;  %1684 = vmatmul.mubr.msk.f32.gmra.mrb[4].mxu1 %vm338_vm0, %v2307_v12  ;;  %v335_v60 = vld [vmem:[%s2877_s2 + $0x228] sm:$0xff]  ;;  %v277_v61 = vld [vmem:[%s2877_s2 + $0x58] sm:$0xff]  ;;  %v1956_v0 = vpack.c.bf16 %v332_v53, %v320_v52  ;;  %v1964_v1 = vpack.c.bf16 %v310_v58, %v298_v57  ;;  %v322_v4 = vld [vmem:[%s2877_s2 + $0x1c0] sm:$0xff] }
  0x27   : > { %448 = vmatprep.mubr.f32.mxu0 %v2135_v7  ;;  %478 = vmatprep.mubr.f32.mxu1 %v2135_v7  ;;  %v289_v63 = vld [vmem:[%s2877_s2 + $0xb8] sm:$0xff]  ;;  %v1966_v2 = vpack.c.bf16 %v335_v60, %v323_v59  ;;  %v334_v5 = vld [vmem:[%s2877_s2 + $0x220] sm:$0xff]  ;;  %v276_v8 = vld [vmem:[%s2877_s2 + $0x50] sm:$0xff] }
  0x28   : > { %1933 = vmatpush1.bf16.msra.mxu1 %v1932_v23  ;;  %1943 = vmatprep.subr.bf16.mxu0 %v1942_v24  ;;  %v1970_v3 = vpack.c.bf16 %v289_v63, %v277_v61  ;;  %v1968_v6 = vpack.c.bf16 %v334_v5, %v322_v4  ;;  %v288_v9 = vld [vmem:[%s2877_s2 + $0xb0] sm:$0xff]  ;;  %v301_v10 = vld [vmem:[%s2877_s2 + $0x118] sm:$0xff]  ;;  %v1183_v35 = vld [vmem:[%s2578_s8 + $0x188] sm:$0xff] }
  0x29   : > { %1947 = vmatprep.subr.bf16.mxu1 %v1946_v25  ;;  %1945 = vmatpush1.bf16.msra.mxu0 %v1944_v26  ;;  %v313_v13 = vld [vmem:[%s2877_s2 + $0x178] sm:$0xff]  ;;  %v1972_v14 = vpack.c.bf16 %v288_v9, %v276_v8  ;;  %v300_v16 = vld [vmem:[%s2877_s2 + $0x110] sm:$0xff]  ;;  %v1135_v26 = vld [vmem:[%s2578_s8 + $0x8] sm:$0xff] }
  0x2a   : > { %1680 = vmatmul.mubr.msk.f32.gmra.mrb[6].mxu0 %vm338_vm0, %v2343_v29  ;;  %1685 = vmatmul.mubr.msk.f32.gmra.mrb[6].mxu1 %vm338_vm0, %v2345_v30  ;;  %v1974_v15 = vpack.c.bf16 %v313_v13, %v301_v10  ;;  %v312_v17 = vld [vmem:[%s2877_s2 + $0x170] sm:$0xff]  ;;  %v325_v18 = vld [vmem:[%s2877_s2 + $0x1d8] sm:$0xff]  ;;  %v1154_v40 = vld [vmem:[%s2578_s8 + $0xa0] sm:$0xff] }
  0x2b   : > { %454 = vmatprep.mubr.f32.mxu0 %v2135_v7  ;;  %549 = vmatprep.mubr.f32.mxu1 %v2135_v7  ;;  %v337_v19 = vld [vmem:[%s2877_s2 + $0x238] sm:$0xff]  ;;  %v1976_v20 = vpack.c.bf16 %v312_v17, %v300_v16  ;;  %v324_v22 = vld [vmem:[%s2877_s2 + $0x1d0] sm:$0xff]  ;;  %v1155_v41 = vld [vmem:[%s2578_s8 + $0xa8] sm:$0xff] }
  0x2c   : > { %1959 = vmatprep.subr.bf16.mxu0 %v1958_v34  ;;  %v1978_v21 = vpack.c.bf16 %v337_v19, %v325_v18  ;;  %v336_v23 = vld [vmem:[%s2877_s2 + $0x230] sm:$0xff]  ;;  %v1137_v33 = vld [vmem:[%s2578_s8 + $0x18] sm:$0xff]  ;;  %v1182_v34 = vld [vmem:[%s2578_s8 + $0x180] sm:$0xff]  ;;  %v1990_v43 = vpack.c.bf16 %v1155_v41, %v1154_v40 }
  0x2d   : > { %v1980_v24 = vpack.c.bf16 %v336_v23, %v324_v22  ;;  %v1152_v28 = vld [vmem:[%s2578_s8 + $0x90] sm:$0xff]  ;;  %v1138_v42 = vld [vmem:[%s2578_s8 + $0x20] sm:$0xff]  ;;  %v1139_v44 = vld [vmem:[%s2578_s8 + $0x28] sm:$0xff] }
  0x2e   : > { %1681 = vmatmul.mubr.msk.f32.gmra.mrb[8].mxu0 %vm338_vm0, %v2365_v37  ;;  %1686 = vmatmul.mubr.msk.f32.vlgmr.msra.gmra.mrb[8].mxu1 %vm338_vm0, %v2258_v46  ;;  %v1136_v31 = vld [vmem:[%s2578_s8 + $0x10] sm:$0xff]  ;;  %v1185_v48 = vld [vmem:[%s2578_s8 + $0x198] sm:$0xff]  ;;  %v1992_v49 = vpack.c.bf16 %v1139_v44, %v1138_v42  ;;  %v1186_v57 = vld [vmem:[%s2578_s8 + $0x1a0] sm:$0xff] }
  0x2f   : > { %1949 = vmatpush1.bf16.msra.mxu1 %v1948_v38  ;;  %555 = vmatprep.mubr.f32.mxu1 %v2135_v7  ;;  %v1988_v36 = vpack.c.bf16 %v1137_v33, %v1136_v31  ;;  %v1166_v38 = vld [vmem:[%s2578_s8 + $0x100] sm:$0xff]  ;;  %v1184_v45 = vld [vmem:[%s2578_s8 + $0x190] sm:$0xff]  ;;  %v1169_v52 = vld [vmem:[%s2578_s8 + $0x118] sm:$0xff] }
  0x30   : > { %668 = vmatprep.mubr.f32.mxu0 %v2135_v7  ;;  %1951 = vmatprep.subr.bf16.mxu1 %v1950_v39  ;;  %v1187_v58 = vld [vmem:[%s2578_s8 + $0x1a8] sm:$0xff]  ;;  %v1140_v59 = vld [vmem:[%s2578_s8 + $0x30] sm:$0xff]  ;;  %v1141_v60 = vld [vmem:[%s2578_s8 + $0x38] sm:$0xff] }
  0x31   : > { %v2022_v61 = vpack.c.bf16 %v1187_v58, %v1186_v57  ;;  %v1996_v63 = vpack.c.bf16 %v1141_v60, %v1140_v59  ;;  %v1188_v4 = vld [vmem:[%s2578_s8 + $0x1b0] sm:$0xff]  ;;  %v1189_v5 = vld [vmem:[%s2578_s8 + $0x1b8] sm:$0xff]  ;;  %v1143_v8 = vld [vmem:[%s2578_s8 + $0x48] sm:$0xff] }
  0x32   : > { %1687 = vmatmul.mubr.msk.f32.gmra.mrb[10].mxu1 %vm338_vm0, %v2265_v51  ;;  %1695 = vmatmul.mubr.msk.f32.vlgmr.msra.gmra.mrb[10].mxu0 %vm338_vm0, %v2258_v46  ;;  %v2026_v9 = vpack.c.bf16 %v1189_v5, %v1188_v4  ;;  %v1173_v13 = vld [vmem:[%s2578_s8 + $0x138] sm:$0xff]  ;;  %v1190_v17 = vld [vmem:[%s2578_s8 + $0x1c0] sm:$0xff]  ;;  %v1144_v19 = vld [vmem:[%s2578_s8 + $0x50] sm:$0xff] }
  0x33   : > { %561 = vmatprep.mubr.f32.mxu1 %v2135_v7  ;;  %674 = vmatprep.mubr.f32.mxu0 %v2135_v7  ;;  %v1161_v16 = vld [vmem:[%s2578_s8 + $0xd8] sm:$0xff]  ;;  %v1195_v40 = vld [vmem:[%s2578_s8 + $0x1e8] sm:$0xff]  ;;  %v1148_v41 = vld [vmem:[%s2578_s8 + $0x70] sm:$0xff] }
  0x34   : > { %1953 = vmatpush1.bf16.msra.mxu1 %v1952_v50  ;;  %1961 = vmatpush1.bf16.msra.mxu0 %v1960_v54  ;;  %v2018_v50 = vpack.c.bf16 %v1185_v48, %v1184_v45  ;;  %v1156_v54 = vld [vmem:[%s2578_s8 + $0xb0] sm:$0xff]  ;;  %v1193_v31 = vld [vmem:[%s2578_s8 + $0x1d8] sm:$0xff]  ;;  %v1178_v45 = vld [vmem:[%s2578_s8 + $0x160] sm:$0xff] }
  0x35   : > { %1955 = vmatprep.subr.bf16.mxu1 %v1954_v55  ;;  %1963 = vmatprep.subr.bf16.mxu0 %v1962_v56  ;;  %v1157_v55 = vld [vmem:[%s2578_s8 + $0xb8] sm:$0xff]  ;;  %v1179_v48 = vld [vmem:[%s2578_s8 + $0x168] sm:$0xff] }
  0x36   : > { %1688 = vmatmul.mubr.msk.f32.gmra.mrb[12].mxu1 %vm338_vm0, %v2305_v11  ;;  %1696 = vmatmul.mubr.msk.f32.gmra.mrb[12].mxu0 %vm338_vm0, %v2265_v51  ;;  %v1994_v56 = vpack.c.bf16 %v1157_v55, %v1156_v54  ;;  %v1149_v42 = vld [vmem:[%s2578_s8 + $0x78] sm:$0xff]  ;;  %v1215_v57 = vld [vmem:[%s2578_s8 + $0x288] sm:$0xff] }
  0x37   : > { %567 = vmatprep.mubr.f32.mxu1 %v2135_v7  ;;  %680 = vmatprep.mubr.f32.mxu0 %v2135_v7  ;;  %v2012_v44 = vpack.c.bf16 %v1149_v42, %v1148_v41  ;;  %v1181_v54 = vld [vmem:[%s2578_s8 + $0x178] sm:$0xff] }
  0x38   : > { %1957 = vmatpush1.bf16.msra.mxu1 %v1956_v0  ;;  %1965 = vmatpush1.bf16.msra.mxu0 %v1964_v1  ;;  %v1171_v0 = vld [vmem:[%s2578_s8 + $0x128] sm:$0xff]  ;;  %v1158_v1 = vld [vmem:[%s2578_s8 + $0xc0] sm:$0xff] }
  0x39   : > { %1967 = vmatprep.subr.bf16.mxu0 %v1966_v2  ;;  %1971 = vmatprep.subr.bf16.mxu1 %v1970_v3  ;;  %v1159_v2 = vld [vmem:[%s2578_s8 + $0xc8] sm:$0xff] }
  0x3a   : > { %1689 = vmatmul.mubr.msk.f32.gmra.mrb[14].mxu1 %vm338_vm0, %v2343_v29  ;;  %1697 = vmatmul.mubr.msk.f32.gmra.mrb[14].mxu0 %vm338_vm0, %v2305_v11  ;;  %v1998_v3 = vpack.c.bf16 %v1159_v2, %v1158_v1 }
  0x3b   : > { %573 = vmatprep.mubr.f32.mxu1 %v2135_v7  ;;  %686 = vmatprep.mubr.f32.mxu0 %v2135_v7 }
  0x3c   : > { %1969 = vmatpush1.bf16.msra.mxu0 %v1968_v6  ;;  %v1142_v6 = vld [vmem:[%s2578_s8 + $0x40] sm:$0xff] }
  0x3d   : > { %v2000_v10 = vpack.c.bf16 %v1143_v8, %v1142_v6 }
  0x3e   : > { %1690 = vmatmul.mubr.msk.f32.gmra.mrb[16].mxu1 %vm338_vm0, %v2365_v37  ;;  %1698 = vmatmul.mubr.msk.f32.gmra.mrb[16].mxu0 %vm338_vm0, %v2343_v29 }
  0x3f   : > { %579 = vmatprep.mubr.f32.mxu1 %v2135_v7  ;;  %692 = vmatprep.mubr.f32.mxu0 %v2135_v7 }
  0x42   : > { %1691 = vmatmul.mubr.msk.f32.gmra.mrb[18].mxu1 %vm338_vm0, %v2260_v47  ;;  %1699 = vmatmul.mubr.msk.f32.gmra.mrb[18].mxu0 %vm338_vm0, %v2365_v37 }
  0x43   : > { %585 = vmatprep.mubr.f32.mxu1 %v2135_v7  ;;  %698 = vmatprep.mubr.f32.mxu0 %v2135_v7 }
  0x46   : > { %1692 = vmatmul.mubr.msk.f32.gmra.mrb[20].mxu1 %vm338_vm0, %v2282_v62  ;;  %1700 = vmatmul.mubr.msk.f32.gmra.mrb[20].mxu0 %vm338_vm0, %v2260_v47 }
  0x47   : > { %591 = vmatprep.mubr.f32.mxu1 %v2135_v7  ;;  %704 = vmatprep.mubr.f32.mxu0 %v2135_v7 }
  0x4a   : > { %1693 = vmatmul.mubr.msk.f32.gmra.mrb[22].mxu1 %vm338_vm0, %v2307_v12  ;;  %1701 = vmatmul.mubr.msk.f32.gmra.mrb[22].mxu0 %vm338_vm0, %v2282_v62 }
  0x4b   : > { %597 = vmatprep.mubr.f32.mxu1 %v2135_v7  ;;  %710 = vmatprep.mubr.f32.mxu0 %v2135_v7 }
  0x4e   : > { %1694 = vmatmul.mubr.msk.f32.gmra.mrb[24].mxu1 %vm338_vm0, %v2345_v30  ;;  %1702 = vmatmul.mubr.msk.f32.gmra.mrb[24].mxu0 %vm338_vm0, %v2307_v12 }
  0x4f   : > { %716 = vmatprep.mubr.f32.mxu0 %v2135_v7  ;;  %787 = vmatprep.mubr.f32.mxu1 %v2135_v7 }
  0x52   : > { %1703 = vmatmul.mubr.msk.f32.gmra.mrb[26].mxu0 %vm338_vm0, %v2345_v30  ;;  %1704 = vmatmul.mubr.msk.f32.vlgmr.msra.gmra.mrb[26].mxu1 %vm338_vm0, %v2258_v46 }
  0x53   : > { %1973 = vmatpush1.bf16.msra.mxu1 %v1972_v14  ;;  %793 = vmatprep.mubr.f32.mxu1 %v2135_v7 }
  0x54   : > { %906 = vmatprep.mubr.f32.mxu0 %v2135_v7  ;;  %1975 = vmatprep.subr.bf16.mxu1 %v1974_v15  ;;  %v1160_v15 = vld [vmem:[%s2578_s8 + $0xd0] sm:$0xff] }
  0x55   : > { %v2002_v18 = vpack.c.bf16 %v1161_v16, %v1160_v15 }
  0x56   : > { %1705 = vmatmul.mubr.msk.f32.gmra.mrb[28].mxu1 %vm338_vm0, %v2265_v51  ;;  %1713 = vmatmul.mubr.msk.f32.vlgmr.msra.gmra.mrb[28].mxu0 %vm338_vm0, %v2258_v46 }
  0x57   : > { %799 = vmatprep.mubr.f32.mxu1 %v2135_v7  ;;  %912 = vmatprep.mubr.f32.mxu0 %v2135_v7 }
  0x58   : > { %1977 = vmatpush1.bf16.msra.mxu1 %v1976_v20  ;;  %v1145_v20 = vld [vmem:[%s2578_s8 + $0x58] sm:$0xff] }
  0x59   : > { %1979 = vmatprep.subr.bf16.mxu1 %v1978_v21  ;;  %v1191_v21 = vld [vmem:[%s2578_s8 + $0x1c8] sm:$0xff]  ;;  %v2004_v22 = vpack.c.bf16 %v1145_v20, %v1144_v19 }
  0x5a   : > { %1706 = vmatmul.mubr.msk.f32.gmra.mrb[30].mxu1 %vm338_vm0, %v2305_v11  ;;  %1714 = vmatmul.mubr.msk.f32.gmra.mrb[30].mxu0 %vm338_vm0, %v2265_v51  ;;  %v2030_v23 = vpack.c.bf16 %v1191_v21, %v1190_v17 }
  0x5b   : > { %805 = vmatprep.mubr.f32.mxu1 %v2135_v7  ;;  %918 = vmatprep.mubr.f32.mxu0 %v2135_v7 }
  0x5c   : > { %1981 = vmatpush1.bf16.msra.mxu1 %v1980_v24  ;;  %v1174_v24 = vld [vmem:[%s2578_s8 + $0x140] sm:$0xff] }
  0x5e   : > { %1707 = vmatmul.mubr.msk.f32.gmra.mrb[32].mxu1 %vm338_vm0, %v2343_v29  ;;  %1715 = vmatmul.mubr.msk.f32.gmra.mrb[32].mxu0 %vm338_vm0, %v2305_v11 }
  0x5f   : > { %811 = vmatprep.mubr.f32.mxu1 %v2135_v7  ;;  %924 = vmatprep.mubr.f32.mxu0 %v2135_v7 }
  0x62   : > { %1708 = vmatmul.mubr.msk.f32.gmra.mrb[34].mxu1 %vm338_vm0, %v2365_v37  ;;  %1716 = vmatmul.mubr.msk.f32.gmra.mrb[34].mxu0 %vm338_vm0, %v2343_v29 }
  0x63   : > { %817 = vmatprep.mubr.f32.mxu1 %v2135_v7  ;;  %930 = vmatprep.mubr.f32.mxu0 %v2135_v7 }
  0x66   : > { %1709 = vmatmul.mubr.msk.f32.gmra.mrb[36].mxu1 %vm338_vm0, %v2260_v47  ;;  %1717 = vmatmul.mubr.msk.f32.gmra.mrb[36].mxu0 %vm338_vm0, %v2365_v37 }
  0x67   : > { %823 = vmatprep.mubr.f32.mxu1 %v2135_v7  ;;  %936 = vmatprep.mubr.f32.mxu0 %v2135_v7 }
  0x6a   : > { %1710 = vmatmul.mubr.msk.f32.gmra.mrb[38].mxu1 %vm338_vm0, %v2282_v62  ;;  %1718 = vmatmul.mubr.msk.f32.gmra.mrb[38].mxu0 %vm338_vm0, %v2260_v47 }
  0x6b   : > { %829 = vmatprep.mubr.f32.mxu1 %v2135_v7  ;;  %942 = vmatprep.mubr.f32.mxu0 %v2135_v7 }
  0x6e   : > { %1711 = vmatmul.mubr.msk.f32.gmra.mrb[40].mxu1 %vm338_vm0, %v2307_v12  ;;  %1719 = vmatmul.mubr.msk.f32.gmra.mrb[40].mxu0 %vm338_vm0, %v2282_v62 }
  0x6f   : > { %835 = vmatprep.mubr.f32.mxu1 %v2135_v7  ;;  %948 = vmatprep.mubr.f32.mxu0 %v2135_v7 }
  0x72   : > { %1712 = vmatmul.mubr.msk.f32.gmra.mrb[42].mxu1 %vm338_vm0, %v2345_v30  ;;  %1720 = vmatmul.mubr.msk.f32.gmra.mrb[42].mxu0 %vm338_vm0, %v2307_v12 }
  0x73   : > { %954 = vmatprep.mubr.f32.mxu0 %v2135_v7  ;;  %1025 = vmatprep.mubr.f32.mxu1 %v2135_v7 }
  0x76   : > { %1721 = vmatmul.mubr.msk.f32.gmra.mrb[44].mxu0 %vm338_vm0, %v2345_v30  ;;  %1722 = vmatmul.mubr.msk.f32.vlgmr.msra.gmra.mrb[44].mxu1 %vm338_vm0, %v2258_v46  ;;  %v1150_v46 = vld [vmem:[%s2578_s8 + $0x80] sm:$0xff] }
  0x77   : > { %1031 = vmatprep.mubr.f32.mxu1 %v2135_v7 }
  0x7a   : > { %1723 = vmatmul.mubr.msk.f32.gmra.mrb[46].mxu1 %vm338_vm0, %v2265_v51  ;;  %v1151_v51 = vld [vmem:[%s2578_s8 + $0x88] sm:$0xff] }
  0x7b   : > { %1037 = vmatprep.mubr.f32.mxu1 %v2135_v7  ;;  %v1982_v25 = vpack.c.bf16 %v1151_v51, %v1150_v46  ;;  %v1175_v46 = vld [vmem:[%s2578_s8 + $0x148] sm:$0xff] }
  0x7c   : > { %v2032_v51 = vpack.c.bf16 %v1175_v46, %v1174_v24 }
  0x7d   : > { %1983 = vmatprep.subr.bf16.mxu0 %v1982_v25  ;;  %v1163_v25 = vld [vmem:[%s2578_s8 + $0xe8] sm:$0xff] }
  0x7e   : > { %1724 = vmatmul.mubr.msk.f32.gmra.mrb[48].mxu1 %vm338_vm0, %v2305_v11  ;;  %v1134_v11 = vld [vmem:[%s2578_s8] sm:$0xff] }
  0x7f   : > { %1043 = vmatprep.mubr.f32.mxu1 %v2135_v7  ;;  %v1984_v27 = vpack.c.bf16 %v1135_v26, %v1134_v11  ;;  %v1162_v11 = vld [vmem:[%s2578_s8 + $0xe0] sm:$0xff]  ;;  %v1192_v26 = vld [vmem:[%s2578_s8 + $0x1d0] sm:$0xff] }
  0x80   : > { %v2034_v33 = vpack.c.bf16 %v1193_v31, %v1192_v26 }
  0x81   : > { %1985 = vmatpush3.bf16.msra.mxu0 %v1984_v27  ;;  %v2006_v27 = vpack.c.bf16 %v1163_v25, %v1162_v11 }
  0x82   : > { %1725 = vmatmul.mubr.msk.f32.gmra.mrb[50].mxu1 %vm338_vm0, %v2343_v29  ;;  %v1153_v29 = vld [vmem:[%s2578_s8 + $0x98] sm:$0xff] }
  0x83   : > { %1049 = vmatprep.mubr.f32.mxu1 %v2135_v7  ;;  %v1986_v32 = vpack.c.bf16 %v1153_v29, %v1152_v28  ;;  %v1146_v28 = vld [vmem:[%s2578_s8 + $0x60] sm:$0xff]  ;;  %v1147_v29 = vld [vmem:[%s2578_s8 + $0x68] sm:$0xff] }
  0x85   : > { %1987 = vmatprep.subr.bf16.mxu0 %v1986_v32  ;;  %v2008_v32 = vpack.c.bf16 %v1147_v29, %v1146_v28 }
  0x86   : > { %1726 = vmatmul.mubr.msk.f32.gmra.mrb[52].mxu1 %vm338_vm0, %v2365_v37  ;;  %v2014_v37 = vpack.c.bf16 %v1183_v35, %v1182_v34  ;;  %1989 = vmatpush3.bf16.msra.mxu0 %v1988_v36  ;;  %v1176_v34 = vld [vmem:[%s2578_s8 + $0x150] sm:$0xff]  ;;  %v1177_v35 = vld [vmem:[%s2578_s8 + $0x158] sm:$0xff] }
  0x87   : > { %1055 = vmatprep.mubr.f32.mxu1 %v2135_v7  ;;  %1991 = vmatprep.subr.bf16.mxu0 %v1990_v43  ;;  %v2036_v36 = vpack.c.bf16 %v1177_v35, %v1176_v34 }
  0x88   : > { %2015 = vmatprep.subr.bf16.mxu1 %v2014_v37  ;;  %v1164_v37 = vld [vmem:[%s2578_s8 + $0xf0] sm:$0xff] }
  0x8a   : > { %1727 = vmatmul.mubr.msk.f32.gmra.mrb[54].mxu1 %vm338_vm0, %v2260_v47  ;;  %v1167_v47 = vld [vmem:[%s2578_s8 + $0x108] sm:$0xff]  ;;  %1993 = vmatpush3.bf16.msra.mxu0 %v1992_v49  ;;  %v2040_v49 = vpack.c.bf16 %v1179_v48, %v1178_v45  ;;  %v1198_v45 = vld [vmem:[%s2578_s8 + $0x200] sm:$0xff] }
  0x8b   : > { %1061 = vmatprep.mubr.f32.mxu1 %v2135_v7  ;;  %v2016_v39 = vpack.c.bf16 %v1167_v47, %v1166_v38  ;;  %1995 = vmatprep.subr.bf16.mxu0 %v1994_v56  ;;  %v1165_v38 = vld [vmem:[%s2578_s8 + $0xf8] sm:$0xff]  ;;  %v1194_v47 = vld [vmem:[%s2578_s8 + $0x1e0] sm:$0xff]  ;;  %v1199_v48 = vld [vmem:[%s2578_s8 + $0x208] sm:$0xff] }
  0x8c   : > { %v2038_v43 = vpack.c.bf16 %v1195_v40, %v1194_v47  ;;  %v1214_v56 = vld [vmem:[%s2578_s8 + $0x280] sm:$0xff] }
  0x8d   : > { %2017 = vmatpush3.bf16.msra.mxu1 %v2016_v39  ;;  %v2010_v39 = vpack.c.bf16 %v1165_v38, %v1164_v37  ;;  %v2046_v58 = vpack.c.bf16 %v1215_v57, %v1214_v56  ;;  %v2048_v57 = vpack.c.bf16 %v1199_v48, %v1198_v45 }
  0x8e   : > { %1728 = vmatmul.mubr.msk.f32.gmra.mrb[56].mxu1 %vm338_vm0, %v2282_v62  ;;  %v1168_v62 = vld [vmem:[%s2578_s8 + $0x110] sm:$0xff]  ;;  %2019 = vmatprep.subr.bf16.mxu1 %v2018_v50 }
  0x8f   : > { %1067 = vmatprep.mubr.f32.mxu1 %v2135_v7  ;;  %v2020_v53 = vpack.c.bf16 %v1169_v52, %v1168_v62  ;;  %1997 = vmatpush3.bf16.msra.mxu0 %v1996_v63  ;;  %v1196_v50 = vld [vmem:[%s2578_s8 + $0x1f0] sm:$0xff]  ;;  %v1197_v62 = vld [vmem:[%s2578_s8 + $0x1f8] sm:$0xff] }
  0x90   : > { %1999 = vmatprep.subr.bf16.mxu0 %v1998_v3  ;;  %v2042_v52 = vpack.c.bf16 %v1197_v62, %v1196_v50  ;;  %v1216_v62 = vld [vmem:[%s2578_s8 + $0x290] sm:$0xff] }
  0x91   : > { %2021 = vmatpush3.bf16.msra.mxu1 %v2020_v53  ;;  %v1180_v53 = vld [vmem:[%s2578_s8 + $0x170] sm:$0xff] }
  0x92   : > { %1729 = vmatmul.mubr.msk.f32.gmra.mrb[58].mxu1 %vm338_vm0, %v2307_v12  ;;  %v1170_v12 = vld [vmem:[%s2578_s8 + $0x120] sm:$0xff]  ;;  %2023 = vmatprep.subr.bf16.mxu1 %v2022_v61  ;;  %v2044_v55 = vpack.c.bf16 %v1181_v54, %v1180_v53 }
  0x93   : > { %1073 = vmatprep.mubr.f32.mxu1 %v2135_v7  ;;  %v2024_v7 = vpack.c.bf16 %v1171_v0, %v1170_v12  ;;  %2001 = vmatpush3.bf16.msra.mxu0 %v2000_v10 }
  0x94   : > { %2003 = vmatprep.subr.bf16.mxu0 %v2002_v18 }
  0x95   : > { %2025 = vmatpush3.bf16.msra.mxu1 %v2024_v7 }
  0x96   : > { %1730 = vmatmul.mubr.msk.f32.gmra.mrb[60].mxu1 %vm338_vm0, %v2345_v30  ;;  %v1172_v30 = vld [vmem:[%s2578_s8 + $0x130] sm:$0xff]  ;;  %2027 = vmatprep.subr.bf16.mxu1 %v2026_v9 }
  0x97   : > { %v2028_v14 = vpack.c.bf16 %v1173_v13, %v1172_v30  ;;  %2005 = vmatpush3.bf16.msra.mxu0 %v2004_v22 }
  0x98   : > { %2007 = vmatprep.subr.bf16.mxu0 %v2006_v27 }
  0x99   : > { %2029 = vmatpush3.bf16.msra.mxu1 %v2028_v14 }
  0x9a   : > { %2031 = vmatprep.subr.bf16.mxu1 %v2030_v23 }
  0x9b   : > { %2009 = vmatpush3.bf16.msra.mxu0 %v2008_v32 }
  0x9c   : > { %2011 = vmatprep.subr.bf16.mxu0 %v2010_v39 }
  0x9d   : > { %2033 = vmatpush3.bf16.msra.mxu1 %v2032_v51 }
  0x9e   : > { %2035 = vmatprep.subr.bf16.mxu1 %v2034_v33 }
  0x9f   : > { %2013 = vmatpush3.bf16.msra.mxu0 %v2012_v44 }
  0xa0   : > { %2047 = vmatprep.subr.bf16.mxu0 %v2046_v58 }
  0xa1   : > { %2037 = vmatpush3.bf16.msra.mxu1 %v2036_v36 }
  0xa2   : > { %2039 = vmatprep.subr.bf16.mxu1 %v2038_v43 }
  0xa5   : > { %2041 = vmatpush3.bf16.msra.mxu1 %v2040_v49 }
  0xa6   : > { %2043 = vmatprep.subr.bf16.mxu1 %v2042_v52  ;;  %v1217_v52 = vld [vmem:[%s2578_s8 + $0x298] sm:$0xff] }
  0xa7   : > { %v2050_v58 = vpack.c.bf16 %v1217_v52, %v1216_v62  ;;  %v1202_v52 = vld [vmem:[%s2578_s8 + $0x220] sm:$0xff] }
  0xa9   : > { %2045 = vmatpush3.bf16.msra.mxu1 %v2044_v55 }
  0xf1   : > { %v2661_v59 = vpop.f32.mrb[0].mxu1  ;;  %v432_v60 = vpop.f32.mrb[0].mxu0 }
  0xf2   : > { %v2663_v61 = vpop.f32.mrb[1].mxu1  ;;  %v434_v12 = vpop.f32.mrb[1].mxu0 }
  0xf5   : > { %v2665_v63 = vpop.f32.mrb[2].mxu1  ;;  %v2667_v0 = vpop.f32.mrb[2].mxu0 }
  0xf6   : > { %v2669_v7 = vpop.f32.mrb[3].mxu1  ;;  %v2671_v1 = vpop.f32.mrb[3].mxu0 }
  0xf9   : > { %v2673_v2 = vpop.f32.mrb[4].mxu1  ;;  %v2675_v3 = vpop.f32.mrb[4].mxu0 }
  0xfa   : > { %v2677_v4 = vpop.f32.mrb[5].mxu1  ;;  %v2679_v5 = vpop.f32.mrb[5].mxu0 }
  0xfd   : > { %v2681_v6 = vpop.f32.mrb[6].mxu1  ;;  %v2683_v8 = vpop.f32.mrb[6].mxu0 }
  0xfe   : > { %v2685_v9 = vpop.f32.mrb[7].mxu1  ;;  %v2687_v30 = vpop.f32.mrb[7].mxu0 }
 0x101   : > { %v551_v10 = vpop.f32.mrb[8].mxu1  ;;  %v2689_v13 = vpop.f32.mrb[8].mxu0 }
 0x102   : > { %v553_v14 = vpop.f32.mrb[9].mxu1  ;;  %v2691_v15 = vpop.f32.mrb[9].mxu0 }
 0x105   : > { %v2693_v16 = vpop.f32.mrb[10].mxu1  ;;  %v2695_v17 = vpop.f32.mrb[10].mxu0 }
 0x106   : > { %v2697_v18 = vpop.f32.mrb[11].mxu1  ;;  %v2699_v19 = vpop.f32.mrb[11].mxu0 }
 0x109   : > { %v2701_v20 = vpop.f32.mrb[12].mxu1  ;;  %v2703_v21 = vpop.f32.mrb[12].mxu0 }
 0x10a   : > { %v2705_v22 = vpop.f32.mrb[13].mxu1  ;;  %v2707_v23 = vpop.f32.mrb[13].mxu0 }
 0x10d   : > { %v2709_v24 = vpop.f32.mrb[14].mxu1  ;;  %v2711_v46 = vpop.f32.mrb[14].mxu0 }
 0x10e   : > { %v2713_v51 = vpop.f32.mrb[15].mxu1  ;;  %v2715_v11 = vpop.f32.mrb[15].mxu0 }
 0x111   : > { %v2717_v25 = vpop.f32.mrb[16].mxu1  ;;  %v2719_v26 = vpop.f32.mrb[16].mxu0 }
 0x112   : > { %v2721_v27 = vpop.f32.mrb[17].mxu1  ;;  %v2723_v28 = vpop.f32.mrb[17].mxu0 }
 0x115   : > { %v2725_v29 = vpop.f32.mrb[18].mxu1  ;;  %v2727_v31 = vpop.f32.mrb[18].mxu0 }
 0x116   : > { %v2729_v32 = vpop.f32.mrb[19].mxu1  ;;  %v2731_v33 = vpop.f32.mrb[19].mxu0 }
 0x117   : > { %2879 = vst [vmem:[#allocation2_spill] sm:$0xff] %v2731_v33 }
 0x119   : > { %v2733_v34 = vpop.f32.mrb[20].mxu1  ;;  %v2735_v35 = vpop.f32.mrb[20].mxu0 }
 0x11a   : > { %2880 = vst [vmem:[#allocation3_spill] sm:$0xff] %v2735_v35  ;;  %v2737_v36 = vpop.f32.mrb[21].mxu1  ;;  %v2739_v37 = vpop.f32.mrb[21].mxu0  ;;  %v1219_v35 = vld [vmem:[%s2578_s8 + $0x2a8] sm:$0xff] }
 0x11b   : > { %2881 = vst [vmem:[#allocation4_spill] sm:$0xff] %v2739_v37  ;;  %v1218_v37 = vld [vmem:[%s2578_s8 + $0x2a0] sm:$0xff] }
 0x11c   : > { %v2054_v62 = vpack.c.bf16 %v1219_v35, %v1218_v37 }
 0x11d   : > { %v2741_v38 = vpop.f32.mrb[22].mxu1  ;;  %v2743_v47 = vpop.f32.mrb[22].mxu0 }
 0x11e   : > { %2882 = vst [vmem:[#allocation5_spill] sm:$0xff] %v2743_v47  ;;  %v2745_v39 = vpop.f32.mrb[23].mxu1  ;;  %v2747_v40 = vpop.f32.mrb[23].mxu0 }
 0x11f   : > { %2883 = vst [vmem:[#allocation6_spill] sm:$0xff] %v2747_v40  ;;  %v1201_v40 = vld [vmem:[%s2578_s8 + $0x218] sm:$0xff] }
 0x121   : > { %v2749_v41 = vpop.f32.mrb[24].mxu1  ;;  %v2751_v42 = vpop.f32.mrb[24].mxu0 }
 0x122   : > { %2884 = vst [vmem:[#allocation7_spill] sm:$0xff] %v2751_v42  ;;  %v2753_v43 = vpop.f32.mrb[25].mxu1  ;;  %v2755_v44 = vpop.f32.mrb[25].mxu0  ;;  %v1200_v42 = vld [vmem:[%s2578_s8 + $0x210] sm:$0xff] }
 0x123   : > { %2885 = vst [vmem:[#allocation8_spill] sm:$0xff] %v2755_v44  ;;  %v2052_v48 = vpack.c.bf16 %v1201_v40, %v1200_v42 }
 0x125   : > { %v789_v49 = vpop.f32.mrb[26].mxu1  ;;  %v2759_v50 = vpop.f32.mrb[26].mxu0 }
 0x126   : > { %2886 = vst [vmem:[#allocation9_spill] sm:$0xff] %v2759_v50  ;;  %v1080_v53 = vmul.f32 %v789_v49, %v432_v60  ;;  %v791_v54 = vpop.f32.mrb[27].mxu1  ;;  %v2763_v55 = vpop.f32.mrb[27].mxu0 }
 0x127   : > { %2887 = vst [vmem:[#allocation10_spill] sm:$0xff] %v2763_v55  ;;  %v1081_v56 = vmul.f32 %v791_v54, %v434_v12  ;;  %v1203_v54 = vld [vmem:[%s2578_s8 + $0x228] sm:$0xff] }
 0x128   : > { %v2056_v40 = vpack.c.bf16 %v1203_v54, %v1202_v52  ;;  %v1225_v54 = vld [vmem:[%s2578_s8 + $0x2d8] sm:$0xff] }
 0x129   : > { %v795_v47 = vpop.f32.mrb[28].mxu1  ;;  %v908_v44 = vpop.f32.mrb[28].mxu0  ;;  %1294 = vmatprep.mubr.f32.mxu0 %v1081_v56 }
 0x12a   : > { %v1086_v50 = vmul.f32 %v795_v47, %v2667_v0  ;;  %v1082_v33 = vmul.f32 %v908_v44, %v551_v10  ;;  %v797_v60 = vpop.f32.mrb[29].mxu1  ;;  %v910_v49 = vpop.f32.mrb[29].mxu0  ;;  %1295 = vmatmul.mubr.f32.vlgmr.msra.gmra.mrb[46].mxu0 %v1080_v53  ;;  %v1220_v0 = vld [vmem:[%s2578_s8 + $0x2b0] sm:$0xff]  ;;  %v1221_v10 = vld [vmem:[%s2578_s8 + $0x2b8] sm:$0xff] }
 0x12b   : > { %v1087_v12 = vmul.f32 %v797_v60, %v2671_v1  ;;  %v1083_v45 = vmul.f32 %v910_v49, %v553_v14  ;;  %2049 = vmatpush3.bf16.msra.mxu0 %v2048_v57  ;;  %v2058_v42 = vpack.c.bf16 %v1221_v10, %v1220_v0  ;;  %v1204_v53 = vld [vmem:[%s2578_s8 + $0x230] sm:$0xff]  ;;  %v1205_v57 = vld [vmem:[%s2578_s8 + $0x238] sm:$0xff] }
 0x12c   : > { %2051 = vmatprep.subr.bf16.mxu0 %v2050_v58 }
 0x12d   : > { %v801_v56 = vpop.f32.mrb[30].mxu1  ;;  %v914_v55 = vpop.f32.mrb[30].mxu0  ;;  %1299 = vmatprep.mubr.f32.mxu0 %v1087_v12  ;;  %1404 = vmatprep.mubr.f32.mxu1 %v1083_v45  ;;  %v2060_v12 = vpack.c.bf16 %v1205_v57, %v1204_v53 }
 0x12e   : > { %v1092_v47 = vmul.f32 %v801_v56, %v2675_v3  ;;  %v1088_v44 = vmul.f32 %v914_v55, %v2693_v16  ;;  %v803_v1 = vpop.f32.mrb[31].mxu1  ;;  %v916_v14 = vpop.f32.mrb[31].mxu0  ;;  %1300 = vmatmul.mubr.f32.gmra.mrb[48].mxu0 %v1086_v50  ;;  %1405 = vmatmul.mubr.f32.vlgmr.msra.gmra.mrb[62].mxu1 %v1082_v33  ;;  %v1222_v16 = vld [vmem:[%s2578_s8 + $0x2c0] sm:$0xff]  ;;  %v1223_v55 = vld [vmem:[%s2578_s8 + $0x2c8] sm:$0xff] }
 0x12f   : > { %v1093_v35 = vmul.f32 %v803_v1, %v2679_v5  ;;  %v1089_v37 = vmul.f32 %v916_v14, %v2697_v18  ;;  %2053 = vmatpush3.bf16.msra.mxu0 %v2052_v48  ;;  %v2062_v45 = vpack.c.bf16 %v1223_v55, %v1222_v16  ;;  %v1206_v48 = vld [vmem:[%s2578_s8 + $0x240] sm:$0xff]  ;;  %v1208_v14 = vld [vmem:[%s2578_s8 + $0x250] sm:$0xff] }
 0x130   : > { %2055 = vmatprep.subr.bf16.mxu0 %v2054_v62  ;;  %v1207_v62 = vld [vmem:[%s2578_s8 + $0x248] sm:$0xff]  ;;  %v1210_v55 = vld [vmem:[%s2578_s8 + $0x260] sm:$0xff] }
 0x131   : > { %v807_v58 = vpop.f32.mrb[32].mxu1  ;;  %v920_v3 = vpop.f32.mrb[32].mxu0  ;;  %1304 = vmatprep.mubr.f32.mxu0 %v1093_v35  ;;  %1409 = vmatprep.mubr.f32.mxu1 %v1089_v37  ;;  %v1209_v35 = vld [vmem:[%s2578_s8 + $0x258] sm:$0xff] }
 0x132   : > { %v1098_v33 = vmul.f32 %v807_v58, %v2683_v8  ;;  %v1094_v5 = vmul.f32 %v920_v3, %v2701_v20  ;;  %v809_v50 = vpop.f32.mrb[33].mxu1  ;;  %v922_v18 = vpop.f32.mrb[33].mxu0  ;;  %1305 = vmatmul.mubr.f32.gmra.mrb[50].mxu0 %v1092_v47  ;;  %1410 = vmatmul.mubr.f32.gmra.mrb[64].mxu1 %v1088_v44  ;;  %v1224_v20 = vld [vmem:[%s2578_s8 + $0x2d0] sm:$0xff]  ;;  %v2064_v44 = vpack.c.bf16 %v1207_v62, %v1206_v48 }
 0x133   : > { %v1099_v60 = vmul.f32 %v809_v50, %v2687_v30  ;;  %v1095_v49 = vmul.f32 %v922_v18, %v2705_v22  ;;  %2057 = vmatpush3.bf16.msra.mxu0 %v2056_v40  ;;  %v2066_v1 = vpack.c.bf16 %v1225_v54, %v1224_v20  ;;  %v1227_v40 = vld [vmem:[%s2578_s8 + $0x2e8] sm:$0xff]  ;;  %v2068_v3 = vpack.c.bf16 %v1209_v35, %v1208_v14  ;;  %v1229_v50 = vld [vmem:[%s2578_s8 + $0x2f8] sm:$0xff]  ;;  %v1212_v62 = vld [vmem:[%s2578_s8 + $0x270] sm:$0xff] }
 0x134   : > { %2059 = vmatprep.subr.bf16.mxu0 %v2058_v42 }
 0x135   : > { %v813_v52 = vpop.f32.mrb[34].mxu1  ;;  %v926_v8 = vpop.f32.mrb[34].mxu0  ;;  %1309 = vmatprep.mubr.f32.mxu0 %v1099_v60  ;;  %1414 = vmatprep.mubr.f32.mxu1 %v1095_v49 }
 0x136   : > { %v1104_v56 = vmul.f32 %v813_v52, %v2689_v13  ;;  %v1100_v30 = vmul.f32 %v926_v8, %v2709_v24  ;;  %v815_v0 = vpop.f32.mrb[35].mxu1  ;;  %v928_v22 = vpop.f32.mrb[35].mxu0  ;;  %1310 = vmatmul.mubr.f32.gmra.mrb[52].mxu0 %v1098_v33  ;;  %1415 = vmatmul.mubr.f32.gmra.mrb[66].mxu1 %v1094_v5  ;;  %v1226_v24 = vld [vmem:[%s2578_s8 + $0x2e0] sm:$0xff]  ;;  %v1211_v33 = vld [vmem:[%s2578_s8 + $0x268] sm:$0xff]  ;;  %v1213_v52 = vld [vmem:[%s2578_s8 + $0x278] sm:$0xff] }
 0x137   : > { %v1105_v10 = vmul.f32 %v815_v0, %v2691_v15  ;;  %v1101_v47 = vmul.f32 %v928_v22, %v2713_v51  ;;  %2061 = vmatpush3.bf16.msra.mxu0 %v2060_v12  ;;  %v2070_v16 = vpack.c.bf16 %v1227_v40, %v1226_v24 }
 0x138   : > { %2063 = vmatprep.subr.bf16.mxu0 %v2062_v45  ;;  %v2072_v45 = vpack.c.bf16 %v1211_v33, %v1210_v55  ;;  %v2890_v33 = vld [vmem:[#allocation4_spill] sm:$0xff] }
 0x139   : > { %v819_v37 = vpop.f32.mrb[36].mxu1  ;;  %v932_v13 = vpop.f32.mrb[36].mxu0  ;;  %1314 = vmatprep.mubr.f32.mxu0 %v1105_v10  ;;  %1419 = vmatprep.mubr.f32.mxu1 %v1101_v47 }
 0x13a   : > { %v1110_v42 = vmul.f32 %v819_v37, %v2661_v59  ;;  %v1106_v15 = vmul.f32 %v932_v13, %v2717_v25  ;;  %v821_v53 = vpop.f32.mrb[37].mxu1  ;;  %v934_v51 = vpop.f32.mrb[37].mxu0  ;;  %1315 = vmatmul.mubr.f32.gmra.mrb[54].mxu0 %v1104_v56  ;;  %1420 = vmatmul.mubr.f32.gmra.mrb[68].mxu1 %v1100_v30  ;;  %v1228_v25 = vld [vmem:[%s2578_s8 + $0x2f0] sm:$0xff]  ;;  %v2076_v30 = vpack.c.bf16 %v1213_v52, %v1212_v62 }
 0x13b   : > { %v1111_v57 = vmul.f32 %v821_v53, %v2663_v61  ;;  %v1107_v58 = vmul.f32 %v934_v51, %v2721_v27  ;;  %2065 = vmatpush3.bf16.msra.mxu0 %v2064_v44  ;;  %v2074_v48 = vpack.c.bf16 %v1229_v50, %v1228_v25  ;;  %v2892_v50 = vld [vmem:[#allocation6_spill] sm:$0xff] }
 0x13c   : > { %2067 = vmatprep.subr.bf16.mxu0 %v2066_v1 }
 0x13d   : > { %v825_v5 = vpop.f32.mrb[38].mxu1  ;;  %v938_v59 = vpop.f32.mrb[38].mxu0  ;;  %1319 = vmatprep.mubr.f32.mxu0 %v1111_v57  ;;  %1424 = vmatprep.mubr.f32.mxu1 %v1107_v58  ;;  %v2888_v58 = vld [vmem:[#allocation2_spill] sm:$0xff] }
 0x13e   : > { %v1116_v18 = vmul.f32 %v825_v5, %v2665_v63  ;;  %v1112_v61 = vmul.f32 %v938_v59, %v2725_v29  ;;  %v827_v60 = vpop.f32.mrb[39].mxu1  ;;  %v940_v27 = vpop.f32.mrb[39].mxu0  ;;  %1320 = vmatmul.mubr.f32.gmra.mrb[56].mxu0 %v1110_v42  ;;  %1425 = vmatmul.mubr.f32.gmra.mrb[70].mxu1 %v1106_v15  ;;  %v2891_v59 = vld [vmem:[#allocation5_spill] sm:$0xff] }
 0x13f   : > { %v1117_v49 = vmul.f32 %v827_v60, %v2669_v7  ;;  %v1113_v12 = vmul.f32 %v940_v27, %v2729_v32  ;;  %2069 = vmatpush3.bf16.msra.mxu0 %v2068_v3 }
 0x140   : > { %2071 = vmatprep.subr.bf16.mxu0 %v2070_v16  ;;  %v2889_v16 = vld [vmem:[#allocation3_spill] sm:$0xff] }
 0x141   : > { %v831_v8 = vpop.f32.mrb[40].mxu1  ;;  %v944_v20 = vpop.f32.mrb[40].mxu0  ;;  %1324 = vmatprep.mubr.f32.mxu0 %v1117_v49  ;;  %1429 = vmatprep.mubr.f32.mxu1 %v1113_v12  ;;  %v2894_v49 = vld [vmem:[#allocation8_spill] sm:$0xff] }
 0x142   : > { %v1122_v63 = vmul.f32 %v831_v8, %v2673_v2  ;;  %v1118_v29 = vmul.f32 %v944_v20, %v2733_v34  ;;  %v833_v54 = vpop.f32.mrb[41].mxu1  ;;  %v946_v56 = vpop.f32.mrb[41].mxu0  ;;  %1325 = vmatmul.mubr.f32.gmra.mrb[58].mxu0 %v1116_v18  ;;  %1430 = vmatmul.mubr.f32.gmra.mrb[72].mxu1 %v1112_v61  ;;  %v2893_v61 = vld [vmem:[#allocation7_spill] sm:$0xff]  ;;  %v2896_v8 = vld [vmem:[#allocation10_spill] sm:$0xff] }
 0x143   : > { %v1123_v7 = vmul.f32 %v833_v54, %v2677_v4  ;;  %v1119_v32 = vmul.f32 %v946_v56, %v2737_v36  ;;  %2073 = vmatpush3.bf16.msra.mxu0 %v2072_v45 }
 0x144   : > { %2075 = vmatprep.subr.bf16.mxu0 %v2074_v48  ;;  %v2895_v48 = vld [vmem:[#allocation9_spill] sm:$0xff] }
 0x145   : > { %v837_v0 = vpop.f32.mrb[42].mxu1  ;;  %v950_v22 = vpop.f32.mrb[42].mxu0  ;;  %1329 = vmatprep.mubr.f32.mxu0 %v1123_v7  ;;  %1434 = vmatprep.mubr.f32.mxu1 %v1119_v32 }
 0x146   : > { %v1128_v10 = vmul.f32 %v837_v0, %v2681_v6  ;;  %v1124_v2 = vmul.f32 %v950_v22, %v2741_v38  ;;  %v839_v34 = vpop.f32.mrb[43].mxu1  ;;  %v952_v47 = vpop.f32.mrb[43].mxu0  ;;  %1330 = vmatmul.mubr.f32.gmra.mrb[60].mxu0 %v1122_v63  ;;  %1435 = vmatmul.mubr.f32.gmra.mrb[74].mxu1 %v1118_v29 }
 0x147   : > { %v1129_v44 = vmul.f32 %v839_v34, %v2685_v9  ;;  %v1125_v4 = vmul.f32 %v952_v47, %v2745_v39  ;;  %2077 = vmatpush3.bf16.msra.mxu0 %v2076_v30 }
 0x149   : > { %v956_v36 = vpop.f32.mrb[44].mxu0  ;;  %v1027_v1 = vpop.f32.mrb[44].mxu1  ;;  %1334 = vmatprep.mubr.f32.mxu0 %v1129_v44  ;;  %1439 = vmatprep.mubr.f32.mxu1 %v1125_v4 }
 0x14a   : > { %v1130_v14 = vmul.f32 %v956_v36, %v2749_v41  ;;  %v1084_v35 = vmul.f32 %v1027_v1, %v2695_v17  ;;  %v958_v6 = vpop.f32.mrb[45].mxu0  ;;  %v1029_v37 = vpop.f32.mrb[45].mxu1  ;;  %1335 = vmatmul.mubr.f32.gmra.mrb[62].mxu0 %v1128_v10  ;;  %1440 = vmatmul.mubr.f32.gmra.mrb[76].mxu1 %v1124_v2 }
 0x14b   : > { %v1131_v38 = vmul.f32 %v958_v6, %v2753_v43  ;;  %v1085_v13 = vmul.f32 %v1029_v37, %v2699_v19 }
 0x14d   : > { %v1033_v9 = vpop.f32.mrb[46].mxu1  ;;  %1444 = vmatprep.mubr.f32.mxu1 %v1131_v38  ;;  %1514 = vmatprep.mubr.f32.mxu0 %v1085_v13 }
 0x14e   : > { %v1090_v39 = vmul.f32 %v1033_v9, %v2703_v21  ;;  %v1035_v24 = vpop.f32.mrb[47].mxu1  ;;  %1445 = vmatmul.mubr.f32.gmra.mrb[78].mxu1 %v1130_v14  ;;  %1515 = vmatmul.mubr.f32.vlgmr.msra.gmra.mrb[64].mxu0 %v1084_v35 }
 0x14f   : > { %v1091_v41 = vmul.f32 %v1035_v24, %v2707_v23 }
 0x151   : > { %v1039_v40 = vpop.f32.mrb[48].mxu1  ;;  %1519 = vmatprep.mubr.f32.mxu0 %v1091_v41 }
 0x152   : > { %v1096_v17 = vmul.f32 %v1039_v40, %v2711_v46  ;;  %v1041_v42 = vpop.f32.mrb[49].mxu1  ;;  %1520 = vmatmul.mubr.f32.gmra.mrb[66].mxu0 %v1090_v39 }
 0x153   : > { %v1097_v43 = vmul.f32 %v1041_v42, %v2715_v11 }
 0x155   : > { %v1045_v15 = vpop.f32.mrb[50].mxu1  ;;  %1524 = vmatprep.mubr.f32.mxu0 %v1097_v43 }
 0x156   : > { %v1102_v19 = vmul.f32 %v1045_v15, %v2719_v26  ;;  %v1047_v53 = vpop.f32.mrb[51].mxu1  ;;  %1525 = vmatmul.mubr.f32.gmra.mrb[68].mxu0 %v1096_v17 }
 0x157   : > { %v1103_v21 = vmul.f32 %v1047_v53, %v2723_v28 }
 0x159   : > { %v1051_v51 = vpop.f32.mrb[52].mxu1  ;;  %1529 = vmatprep.mubr.f32.mxu0 %v1103_v21 }
 0x15a   : > { %v1108_v23 = vmul.f32 %v1051_v51, %v2727_v31  ;;  %v1053_v57 = vpop.f32.mrb[53].mxu1  ;;  %1530 = vmatmul.mubr.f32.gmra.mrb[70].mxu0 %v1102_v19 }
 0x15b   : > { %v1109_v46 = vmul.f32 %v1053_v57, %v2888_v58 }
 0x15d   : > { %v1057_v3 = vpop.f32.mrb[54].mxu1  ;;  %1534 = vmatprep.mubr.f32.mxu0 %v1109_v46 }
 0x15e   : > { %v1114_v11 = vmul.f32 %v1057_v3, %v2889_v16  ;;  %v1059_v55 = vpop.f32.mrb[55].mxu1  ;;  %1535 = vmatmul.mubr.f32.gmra.mrb[72].mxu0 %v1108_v23 }
 0x15f   : > { %v1115_v26 = vmul.f32 %v1059_v55, %v2890_v33 }
 0x161   : > { %v1063_v5 = vpop.f32.mrb[56].mxu1  ;;  %1539 = vmatprep.mubr.f32.mxu0 %v1115_v26 }
 0x162   : > { %v1120_v28 = vmul.f32 %v1063_v5, %v2891_v59  ;;  %v1065_v25 = vpop.f32.mrb[57].mxu1  ;;  %1540 = vmatmul.mubr.f32.gmra.mrb[74].mxu0 %v1114_v11 }
 0x163   : > { %v1121_v31 = vmul.f32 %v1065_v25, %v2892_v50 }
 0x165   : > { %v1069_v18 = vpop.f32.mrb[58].mxu1  ;;  %1544 = vmatprep.mubr.f32.mxu0 %v1121_v31 }
 0x166   : > { %v1126_v60 = vmul.f32 %v1069_v18, %v2893_v61  ;;  %v1071_v27 = vpop.f32.mrb[59].mxu1  ;;  %1545 = vmatmul.mubr.f32.gmra.mrb[76].mxu0 %v1120_v28 }
 0x167   : > { %v1127_v12 = vmul.f32 %v1071_v27, %v2894_v49 }
 0x169   : > { %v1075_v45 = vpop.f32.mrb[60].mxu1  ;;  %1549 = vmatprep.mubr.f32.mxu0 %v1127_v12 }
 0x16a   : > { %v1132_v62 = vmul.f32 %v1075_v45, %v2895_v48  ;;  %v1077_v52 = vpop.f32.mrb[61].mxu1  ;;  %1550 = vmatmul.mubr.f32.gmra.mrb[78].mxu0 %v1126_v60 }
 0x16b   : > { %v1133_v20 = vmul.f32 %v1077_v52, %v2896_v8 }
 0x16d   : > { %1554 = vmatprep.mubr.f32.mxu0 %v1133_v20 }
 0x16e   : > { %1555 = vmatmul.mubr.f32.gmra.mrb[80].mxu0 %v1132_v62 }
 0x1fd   : > { %v1765_v63 = vpop.f32.mrb[46].mxu0 }
 0x1fe   : > { %v1766_v29 = vpop.f32.mrb[47].mxu0 }
 0x1ff   : > { %v1767_v54 = vadd.f32 %v1766_v29, %v1765_v63 }
 0x201   : > { %v1768_v56 = vpop.f32.mrb[48].mxu0  ;;  %v1824_v7 = vpop.f32.mrb[62].mxu1 }
 0x202   : > { %v1769_v32 = vpop.f32.mrb[49].mxu0  ;;  %v1825_v30 = vpop.f32.mrb[63].mxu1 }
 0x203   : > { %v1770_v0 = vadd.f32 %v1769_v32, %v1768_v56  ;;  %v1826_v22 = vadd.f32 %v1825_v30, %v1824_v7 }
 0x205   : > { %v1407_v10 = vadd.f32 %v1826_v22, %v1767_v54  ;;  %v1771_v2 = vpop.f32.mrb[50].mxu0  ;;  %v1827_v34 = vpop.f32.mrb[64].mxu1 }
 0x206   : > { %v1772_v47 = vpop.f32.mrb[51].mxu0  ;;  %v1828_v44 = vpop.f32.mrb[65].mxu1 }
 0x207   : > { %v1773_v4 = vadd.f32 %v1772_v47, %v1771_v2  ;;  %v1829_v36 = vadd.f32 %v1828_v44, %v1827_v34 }
 0x209   : > { %v1412_v1 = vadd.f32 %v1829_v36, %v1770_v0  ;;  %v1774_v14 = vpop.f32.mrb[52].mxu0  ;;  %v1830_v35 = vpop.f32.mrb[66].mxu1 }
 0x20a   : > { %v1775_v6 = vpop.f32.mrb[53].mxu0  ;;  %v1831_v37 = vpop.f32.mrb[67].mxu1 }
 0x20b   : > { %v1776_v38 = vadd.f32 %v1775_v6, %v1774_v14  ;;  %v1832_v13 = vadd.f32 %v1831_v37, %v1830_v35 }
 0x20d   : > { %v1417_v9 = vadd.f32 %v1832_v13, %v1773_v4  ;;  %v1777_v39 = vpop.f32.mrb[54].mxu0  ;;  %v1833_v24 = vpop.f32.mrb[68].mxu1 }
 0x20e   : > { %v1778_v41 = vpop.f32.mrb[55].mxu0  ;;  %v1834_v40 = vpop.f32.mrb[69].mxu1 }
 0x20f   : > { %v1779_v17 = vadd.f32 %v1778_v41, %v1777_v39  ;;  %v1835_v42 = vadd.f32 %v1834_v40, %v1833_v24 }
 0x211   : > { %v1422_v43 = vadd.f32 %v1835_v42, %v1776_v38  ;;  %v1780_v15 = vpop.f32.mrb[56].mxu0  ;;  %v1836_v19 = vpop.f32.mrb[70].mxu1 }
 0x212   : > { %v1781_v53 = vpop.f32.mrb[57].mxu0  ;;  %v1837_v21 = vpop.f32.mrb[71].mxu1 }
 0x213   : > { %v1782_v51 = vadd.f32 %v1781_v53, %v1780_v15  ;;  %v1838_v23 = vadd.f32 %v1837_v21, %v1836_v19 }
 0x215   : > { %v1427_v57 = vadd.f32 %v1838_v23, %v1779_v17  ;;  %v1783_v58 = vpop.f32.mrb[58].mxu0  ;;  %v1839_v46 = vpop.f32.mrb[72].mxu1 }
 0x216   : > { %v1784_v3 = vpop.f32.mrb[59].mxu0  ;;  %v1840_v16 = vpop.f32.mrb[73].mxu1 }
 0x217   : > { %v1785_v11 = vadd.f32 %v1784_v3, %v1783_v58  ;;  %v1841_v55 = vadd.f32 %v1840_v16, %v1839_v46 }
 0x219   : > { %v1432_v33 = vadd.f32 %v1841_v55, %v1782_v51  ;;  %v1786_v26 = vpop.f32.mrb[60].mxu0  ;;  %v1842_v5 = vpop.f32.mrb[74].mxu1 }
 0x21a   : > { %v1787_v59 = vpop.f32.mrb[61].mxu0  ;;  %v1843_v28 = vpop.f32.mrb[75].mxu1 }
 0x21b   : > { %v1788_v25 = vadd.f32 %v1787_v59, %v1786_v26  ;;  %v1844_v50 = vadd.f32 %v1843_v28, %v1842_v5 }
 0x21d   : > { %v1437_v31 = vadd.f32 %v1844_v50, %v1785_v11  ;;  %v1789_v18 = vpop.f32.mrb[62].mxu0  ;;  %v1845_v61 = vpop.f32.mrb[76].mxu1 }
 0x21e   : > { %v1790_v60 = vpop.f32.mrb[63].mxu0  ;;  %v1846_v27 = vpop.f32.mrb[77].mxu1 }
 0x21f   : > { %v1791_v49 = vadd.f32 %v1790_v60, %v1789_v18  ;;  %v1847_v12 = vadd.f32 %v1846_v27, %v1845_v61 }
 0x221   : > { %v1442_v45 = vadd.f32 %v1847_v12, %v1788_v25  ;;  %v1848_v48 = vpop.f32.mrb[78].mxu1  ;;  %v1883_v62 = vpop.f32.mrb[64].mxu0 }
 0x222   : > { %v1849_v52 = vpop.f32.mrb[79].mxu1  ;;  %v1884_v8 = vpop.f32.mrb[65].mxu0 }
 0x223   : > { %v1850_v20 = vadd.f32 %v1849_v52, %v1848_v48  ;;  %v1885_v63 = vadd.f32 %v1884_v8, %v1883_v62 }
 0x225   : > { %v1447_v29 = vadd.f32 %v1850_v20, %v1791_v49  ;;  %v1517_v54 = vadd.f32 %v1885_v63, %v1407_v10  ;;  %v1886_v56 = vpop.f32.mrb[66].mxu0 }
 0x226   : > { %v1887_v7 = vpop.f32.mrb[67].mxu0 }
 0x227   : > { %1561 = vst.msk [vmem:[%s2846_s16] sm:$0xff] %vm1560_vm1, %v1517_v54  ;;  %v1888_v32 = vadd.f32 %v1887_v7, %v1886_v56 }
 0x229   : > { %v1522_v30 = vadd.f32 %v1888_v32, %v1412_v1  ;;  %v1889_v0 = vpop.f32.mrb[68].mxu0 }
 0x22a   : > { %v1890_v22 = vpop.f32.mrb[69].mxu0 }
 0x22b   : > { %1562 = vst.msk [vmem:[%s2846_s16 + $0x8] sm:$0xff] %vm1560_vm1, %v1522_v30  ;;  %v1891_v2 = vadd.f32 %v1890_v22, %v1889_v0 }
 0x22d   : > { %v1527_v34 = vadd.f32 %v1891_v2, %v1417_v9  ;;  %v1892_v47 = vpop.f32.mrb[70].mxu0 }
 0x22e   : > { %v1893_v44 = vpop.f32.mrb[71].mxu0 }
 0x22f   : > { %1563 = vst.msk [vmem:[%s2846_s16 + $0x10] sm:$0xff] %vm1560_vm1, %v1527_v34  ;;  %v1894_v10 = vadd.f32 %v1893_v44, %v1892_v47 }
 0x231   : > { %v1532_v4 = vadd.f32 %v1894_v10, %v1422_v43  ;;  %v1895_v36 = vpop.f32.mrb[72].mxu0 }
 0x232   : > { %v1896_v14 = vpop.f32.mrb[73].mxu0 }
 0x233   : > { %1564 = vst.msk [vmem:[%s2846_s16 + $0x18] sm:$0xff] %vm1560_vm1, %v1532_v4  ;;  %v1897_v1 = vadd.f32 %v1896_v14, %v1895_v36 }
 0x235   : > { %v1537_v35 = vadd.f32 %v1897_v1, %v1427_v57  ;;  %v1898_v6 = vpop.f32.mrb[74].mxu0 }
 0x236   : > { %v1899_v37 = vpop.f32.mrb[75].mxu0 }
 0x237   : > { %1565 = vst.msk [vmem:[%s2846_s16 + $0x20] sm:$0xff] %vm1560_vm1, %v1537_v35  ;;  %v1900_v38 = vadd.f32 %v1899_v37, %v1898_v6 }
 0x239   : > { %v1542_v13 = vadd.f32 %v1900_v38, %v1432_v33  ;;  %v1901_v9 = vpop.f32.mrb[76].mxu0 }
 0x23a   : > { %v1902_v39 = vpop.f32.mrb[77].mxu0 }
 0x23b   : > { %1566 = vst.msk [vmem:[%s2846_s16 + $0x28] sm:$0xff] %vm1560_vm1, %v1542_v13  ;;  %v1903_v24 = vadd.f32 %v1902_v39, %v1901_v9 }
 0x23d   : > { %v1547_v41 = vadd.f32 %v1903_v24, %v1437_v31  ;;  %v1904_v40 = vpop.f32.mrb[78].mxu0 }
 0x23e   : > { %v1905_v17 = vpop.f32.mrb[79].mxu0 }
 0x23f   : > { %1567 = vst.msk [vmem:[%s2846_s16 + $0x30] sm:$0xff] %vm1560_vm1, %v1547_v41  ;;  %v1906_v42 = vadd.f32 %v1905_v17, %v1904_v40 }
 0x241   : > { %v1552_v43 = vadd.f32 %v1906_v42, %v1442_v45  ;;  %v1907_v15 = vpop.f32.mrb[80].mxu0 }
 0x242   : > { %v1908_v19 = vpop.f32.mrb[81].mxu0 }
 0x243   : > { %1568 = vst.msk [vmem:[%s2846_s16 + $0x38] sm:$0xff] %vm1560_vm1, %v1552_v43  ;;  %v1909_v53 = vadd.f32 %v1908_v19, %v1907_v15 }
 0x245   : > { %v1557_v21 = vadd.f32 %v1909_v53, %v1447_v29 }
 0x247   : > { %1569 = vst.msk [vmem:[%s2846_s16 + $0x40] sm:$0xff] %vm1560_vm1, %v1557_v21 }
 0x248 PF: > { %s13_s14 = sadd.s32 1, %s2133_s14   ;;  %s2897_s12 = smov %s2129_s13 }
 0x249   : > { %p10_p5 = scmp.ge.s32.totalorder %s13_s14, 4   ;;  %s2898_s13 = smov %s2900_s15 }
 0x24b   :  { %12 = sbr.rel (!%p10_p5) target bundleno = 2 (0x2), region = 65 }

// kernel: forward.6
= control target key start
LH: loop header
LB: loop body
LE: loop exit
PB: predicated region body
PF: predicated region fallthrough
CT: control target
= control target key end

     0   :  { %s2754_s12 = smov 0   ;;  %s2756_s13 = smov 0   ;;  %s3850_s0 = inlined_call_operand.vmem [shape: f32[2,256,48], index: 0, kind: input, shape index: {}]   ;;  %s3851_s1 = inlined_call_operand.vmem [shape: f32[2,768,32], index: 1, kind: input, shape index: {}]   ;;  %s3852_s2 = inlined_call_operand.vmem [shape: f32[48,1536], index: 2, kind: input, shape index: {}]   ;;  %s3853_s3 = inlined_call_operand.vmem [shape: f32[2,256,32], index: 3, kind: output, shape index: {}]  }
   0x1   :  { %s2758_s14 = smov 0   ;;  %s2760_s15 = smov 0  }
   0x2   :  { %s2762_s16 = smov 0  }
   0x3 LB: > { %s22_s17 = sadd.s32 1, %s2723_s14  ;;  %s25_s18 = sadd.s32 1, %s2727_s15  ;;  %s2731_s16 = sphi %s2762_s16, %s13_s16   ;;  %s2727_s15 = sphi %s2760_s15, %s3959_s15   ;;  %s2723_s14 = sphi %s2758_s14, %s3958_s14   ;;  %s2719_s13 = sphi %s2756_s13, %s3957_s13   ;;  %s2715_s12 = sphi %s2754_s12, %s3956_s12  }
   0x4   : > { %p23_p0 = scmp.ge.s32.totalorder %s22_s17, 2  ;;  %p2131_p1 = scmp.ge.s32.totalorder %s2731_s16, 1 }
   0x5   : > { %p168_p2 = scmp.lt.s32.totalorder %s2731_s16, 5 }
   0x6   : > { %s3961_s17 = smov (%p23_p0, %s22_s17), 0  ;;  %s3963_s18 = smov (!%p23_p0, %s25_s18), %s2727_s15 }
   0x7   : > { %p169_p3 = pnand %p2131_p1, %p168_p2  ;;  %p27_p4 = scmp.ge.s32.totalorder %s3963_s18, 2 }
   0x9   : > { %s3965_s18 = smov (%p27_p4, %s3963_s18), 0  ;;  %172 = sbr.rel (%p169_p3) target bundleno = 686 (0x2ae), region = 32 }
  0x10   : > { %v295_v0 = vld [vmem:[%s3852_s2 + $0x8] sm:$0xff]  ;;  %v294_v2 = vld [vmem:[%s3852_s2] sm:$0xff]  ;;  %s2132_s25 = sshll.u32 %s2715_s12, 4  ;;  %p206_p5 = scmp.lt.s32.totalorder %s2719_s13, 1  ;;  %v2733_v7 = vmov 0.0   ;;  %v297_v18 = vld [vmem:[%s3852_s2 + $0x18] sm:$0xff] }
  0x11   : > { %v307_v1 = vld [vmem:[%s3852_s2 + $0x68] sm:$0xff]  ;;  %v306_v4 = vld [vmem:[%s3852_s2 + $0x60] sm:$0xff]  ;;  %479 = vmatprep.mubr.f32.mxu0 %v2733_v7  ;;  %527 = vmatprep.mubr.f32.mxu1 %v2733_v7  ;;  %p208_p6 = scmp.lt.s32.totalorder %s2132_s25, 31  ;;  %v309_v19 = vld [vmem:[%s3852_s2 + $0x78] sm:$0xff]  ;;  %vm366_vm0 = vcmask 392192   ;;  %vm2008_vm1 = vcmask 261120  }
  0x12   : > { %v2477_v3 = vpack.c.bf16 %v307_v1, %v295_v0  ;;  %v319_v5 = vld [vmem:[%s3852_s2 + $0xc8] sm:$0xff]  ;;  %v2479_v8 = vpack.c.bf16 %v306_v4, %v294_v2  ;;  %v318_v10 = vld [vmem:[%s3852_s2 + $0xc0] sm:$0xff]  ;;  %s3967_s13 = smov (!%p206_p5, %s2719_s13), 1  ;;  %v296_v21 = vld [vmem:[%s3852_s2 + $0x10] sm:$0xff]  ;;  %v2489_v27 = vpack.c.bf16 %v309_v19, %v297_v18 }
  0x13   : > { %v331_v6 = vld [vmem:[%s3852_s2 + $0x128] sm:$0xff]  ;;  %v330_v11 = vld [vmem:[%s3852_s2 + $0x120] sm:$0xff]  ;;  %s3969_s25 = smov (!%p208_p6, %s2132_s25), 31  ;;  %s2133_s21 = sshll.u32 %s3967_s13, 5  ;;  %v308_v22 = vld [vmem:[%s3852_s2 + $0x70] sm:$0xff] }
  0x14   : > { %v2481_v9 = vpack.c.bf16 %v331_v6, %v319_v5  ;;  %v343_v12 = vld [vmem:[%s3852_s2 + $0x188] sm:$0xff]  ;;  %2478 = vmatprep.subr.bf16.mxu0 %v2477_v3  ;;  %2645 = vmatprep.subr.bf16.mxu1 %v2477_v3  ;;  %v2483_v14 = vpack.c.bf16 %v330_v11, %v318_v10  ;;  %v342_v15 = vld [vmem:[%s3852_s2 + $0x180] sm:$0xff]  ;;  %s2834_s24 = sadd.s32 %s2133_s21, %s3969_s25  ;;  %v321_v29 = vld [vmem:[%s3852_s2 + $0xd8] sm:$0xff]  ;;  %v2491_v45 = vpack.c.bf16 %v308_v22, %v296_v21  ;;  %s2651_s10 = smul.u32 768, %s3967_s13 }
  0x15   : > { %v355_v13 = vld [vmem:[%s3852_s2 + $0x1e8] sm:$0xff]  ;;  %2480 = vmatpush1.bf16.msra.mxu0 %v2479_v8  ;;  %2648 = vmatpush1.bf16.msra.mxu1 %v2479_v8  ;;  %v354_v17 = vld [vmem:[%s3852_s2 + $0x1e0] sm:$0xff]  ;;  %s2134_s30 = sshll.u32 %s2834_s24, 3  ;;  %v333_v30 = vld [vmem:[%s3852_s2 + $0x138] sm:$0xff] }
  0x16   : > { %2482 = vmatprep.subr.bf16.mxu0 %v2481_v9  ;;  %2646 = vmatprep.subr.bf16.mxu1 %v2481_v9  ;;  %v2485_v16 = vpack.c.bf16 %v355_v13, %v343_v12  ;;  %v299_v20 = vld [vmem:[%s3852_s2 + $0x28] sm:$0xff]  ;;  %s2851_s25 = scalar_lea.vmem %s3850_s0, %s2134_s30  ;;  %v2487_v24 = vpack.c.bf16 %v354_v17, %v342_v15  ;;  %v298_v35 = vld [vmem:[%s3852_s2 + $0x20] sm:$0xff]  ;;  %v2493_v51 = vpack.c.bf16 %v333_v30, %v321_v29  ;;  %v320_v55 = vld [vmem:[%s3852_s2 + $0xd0] sm:$0xff]  ;;  %s3254_s19 = scalar_lea.vmem %s3851_s1, %s2651_s10 }
  0x17   : > { %v311_v23 = vld [vmem:[%s3852_s2 + $0x88] sm:$0xff]  ;;  %v230_v25 = vld [vmem:[%s2851_s25] sm:$0xff]  ;;  %v232_v38 = vld [vmem:[%s2851_s25 + $0x10] sm:$0xff]  ;;  %s3785_s21 = scalar_lea.vmem %s3853_s3, %s2134_s30 }
  0x18   : > { %v238_v26 = vld [vmem:[%s2851_s25 + $0x40] sm:$0xff]  ;;  %v231_v28 = vld [vmem:[%s2851_s25 + $0x8] sm:$0xff]  ;;  %v246_v31 = vand.u32 2147483647, %v230_v25  ;;  %v2501_v34 = vpack.c.bf16 %v311_v23, %v299_v20  ;;  %v240_v39 = vld [vmem:[%s2851_s25 + $0x50] sm:$0xff] }
  0x19   : > { %2484 = vmatpush1.bf16.msra.mxu0 %v2483_v14  ;;  %2649 = vmatpush1.bf16.msra.mxu1 %v2483_v14  ;;  %v254_v32 = vand.u32 2147483647, %v238_v26  ;;  %v247_v33 = vand.u32 2147483647, %v231_v28  ;;  %v310_v36 = vld [vmem:[%s3852_s2 + $0x80] sm:$0xff]  ;;  %v239_v37 = vld [vmem:[%s2851_s25 + $0x48] sm:$0xff] }
  0x1a   : > { %2486 = vmatprep.subr.bf16.mxu0 %v2485_v16  ;;  %2647 = vmatprep.subr.bf16.mxu1 %v2485_v16  ;;  %v262_v40 = vsub.f32 1.0, %v246_v31  ;;  %v255_v43 = vand.u32 2147483647, %v239_v37  ;;  %v233_v44 = vld [vmem:[%s2851_s25 + $0x18] sm:$0xff]  ;;  %v248_v46 = vand.u32 2147483647, %v232_v38  ;;  %v2503_v58 = vpack.c.bf16 %v310_v36, %v298_v35 }
  0x1b   : > { %v270_v41 = vsub.f32 1.0, %v254_v32  ;;  %v263_v42 = vsub.f32 1.0, %v247_v33  ;;  %v256_v47 = vand.u32 2147483647, %v240_v39  ;;  %v241_v52 = vld [vmem:[%s2851_s25 + $0x58] sm:$0xff]  ;;  %v332_v56 = vld [vmem:[%s3852_s2 + $0x130] sm:$0xff] }
  0x1c   : > { %v2881_v48 = vmax.f32 %v262_v40, 0.0  ;;  %v271_v50 = vsub.f32 1.0, %v255_v43  ;;  %v249_v54 = vand.u32 2147483647, %v233_v44  ;;  %v234_v57 = vld [vmem:[%s2851_s25 + $0x20] sm:$0xff]  ;;  %v264_v60 = vsub.f32 1.0, %v248_v46 }
  0x1d   : > { %2488 = vmatpush1.bf16.msra.mxu0 %v2487_v24  ;;  %2650 = vmatpush1.bf16.msra.mxu1 %v2487_v24  ;;  %v2883_v49 = vmax.f32 %v270_v41, 0.0  ;;  %v2886_v53 = vmax.f32 %v263_v42, 0.0  ;;  %v272_v61 = vsub.f32 1.0, %v256_v47  ;;  %v257_v62 = vand.u32 2147483647, %v241_v52  ;;  %v242_v63 = vld [vmem:[%s2851_s25 + $0x60] sm:$0xff] }
  0x1e   : > { %2490 = vmatprep.subr.bf16.mxu1 %v2489_v27  ;;  %2502 = vmatprep.subr.bf16.mxu0 %v2501_v34  ;;  %v2899_v59 = vmax.f32 %v271_v50, 0.0  ;;  %v2495_v0 = vpack.c.bf16 %v332_v56, %v320_v55  ;;  %v250_v1 = vand.u32 2147483647, %v234_v57  ;;  %v345_v2 = vld [vmem:[%s3852_s2 + $0x198] sm:$0xff]  ;;  %v258_v3 = vand.u32 2147483647, %v242_v63 }
  0x1f   : > { %v357_v4 = vld [vmem:[%s3852_s2 + $0x1f8] sm:$0xff]  ;;  %v344_v5 = vld [vmem:[%s3852_s2 + $0x190] sm:$0xff]  ;;  %v2920_v8 = vmax.f32 %v264_v60, 0.0  ;;  %v2922_v9 = vmax.f32 %v272_v61, 0.0  ;;  %v265_v10 = vsub.f32 1.0, %v249_v54  ;;  %v273_v11 = vsub.f32 1.0, %v257_v62 }
  0x20   : > { %2139 = vmatmul.mubr.msk.f32.vlgmr.msra.gmra.mrb[0].mxu0 %vm366_vm0, %v2881_v48  ;;  %2147 = vmatmul.mubr.msk.f32.vlgmr.msra.gmra.mrb[0].mxu1 %vm366_vm0, %v2883_v49  ;;  %v356_v6 = vld [vmem:[%s3852_s2 + $0x1f0] sm:$0xff]  ;;  %v235_v12 = vld [vmem:[%s2851_s25 + $0x28] sm:$0xff]  ;;  %v2497_v14 = vpack.c.bf16 %v357_v4, %v345_v2  ;;  %v266_v17 = vsub.f32 1.0, %v250_v1  ;;  %v322_v20 = vld [vmem:[%s3852_s2 + $0xe0] sm:$0xff]  ;;  %v274_v29 = vsub.f32 1.0, %v258_v3 }
  0x21   : > { %2492 = vmatpush1.bf16.msra.mxu1 %v2491_v45  ;;  %485 = vmatprep.mubr.f32.mxu0 %v2733_v7  ;;  %v243_v13 = vld [vmem:[%s2851_s25 + $0x68] sm:$0xff]  ;;  %v2499_v18 = vpack.c.bf16 %v356_v6, %v344_v5  ;;  %v334_v21 = vld [vmem:[%s3852_s2 + $0x140] sm:$0xff]  ;;  %v251_v22 = vand.u32 2147483647, %v235_v12  ;;  %v236_v24 = vld [vmem:[%s2851_s25 + $0x30] sm:$0xff]  ;;  %v2948_v27 = vmax.f32 %v265_v10, 0.0 }
  0x22   : > { %533 = vmatprep.mubr.f32.mxu1 %v2733_v7  ;;  %2494 = vmatprep.subr.bf16.mxu1 %v2493_v51  ;;  %v323_v15 = vld [vmem:[%s3852_s2 + $0xe8] sm:$0xff]  ;;  %v259_v23 = vand.u32 2147483647, %v243_v13  ;;  %v2507_v25 = vpack.c.bf16 %v334_v21, %v322_v20  ;;  %v2950_v28 = vmax.f32 %v273_v11, 0.0  ;;  %v346_v31 = vld [vmem:[%s3852_s2 + $0x1a0] sm:$0xff]  ;;  %v244_v33 = vld [vmem:[%s2851_s25 + $0x70] sm:$0xff] }
  0x23   : > { %2504 = vmatpush1.bf16.msra.mxu0 %v2503_v58  ;;  %v335_v16 = vld [vmem:[%s3852_s2 + $0x148] sm:$0xff]  ;;  %v358_v32 = vld [vmem:[%s3852_s2 + $0x200] sm:$0xff]  ;;  %v301_v34 = vld [vmem:[%s3852_s2 + $0x38] sm:$0xff]  ;;  %v2970_v38 = vmax.f32 %v266_v17, 0.0  ;;  %v267_v39 = vsub.f32 1.0, %v251_v22  ;;  %v2976_v42 = vmax.f32 %v274_v29, 0.0 }
  0x24   : > { %2140 = vmatmul.mubr.msk.f32.gmra.mrb[2].mxu0 %vm366_vm0, %v2886_v53  ;;  %2148 = vmatmul.mubr.msk.f32.gmra.mrb[2].mxu1 %vm366_vm0, %v2899_v59  ;;  %v2505_v19 = vpack.c.bf16 %v335_v16, %v323_v15  ;;  %v347_v26 = vld [vmem:[%s3852_s2 + $0x1a8] sm:$0xff]  ;;  %v313_v35 = vld [vmem:[%s3852_s2 + $0x98] sm:$0xff]  ;;  %v275_v40 = vsub.f32 1.0, %v259_v23  ;;  %v2511_v41 = vpack.c.bf16 %v358_v32, %v346_v31  ;;  %v252_v43 = vand.u32 2147483647, %v236_v24  ;;  %v300_v2 = vld [vmem:[%s3852_s2 + $0x30] sm:$0xff] }
  0x25   : > { %491 = vmatprep.mubr.f32.mxu0 %v2733_v7  ;;  %539 = vmatprep.mubr.f32.mxu1 %v2733_v7  ;;  %v359_v30 = vld [vmem:[%s3852_s2 + $0x208] sm:$0xff]  ;;  %v2513_v37 = vpack.c.bf16 %v313_v35, %v301_v34  ;;  %v260_v44 = vand.u32 2147483647, %v244_v33  ;;  %v237_v45 = vld [vmem:[%s2851_s25 + $0x38] sm:$0xff]  ;;  %v2988_v52 = vmax.f32 %v267_v39, 0.0  ;;  %v312_v3 = vld [vmem:[%s3852_s2 + $0x90] sm:$0xff] }
  0x26   : > { %2496 = vmatpush1.bf16.msra.mxu1 %v2495_v0  ;;  %2506 = vmatprep.subr.bf16.mxu0 %v2505_v19  ;;  %v2509_v36 = vpack.c.bf16 %v359_v30, %v347_v26  ;;  %v245_v46 = vld [vmem:[%s2851_s25 + $0x78] sm:$0xff]  ;;  %v303_v47 = vld [vmem:[%s3852_s2 + $0x48] sm:$0xff]  ;;  %v2990_v54 = vmax.f32 %v275_v40, 0.0  ;;  %v268_v55 = vsub.f32 1.0, %v252_v43  ;;  %v253_v57 = vand.u32 2147483647, %v237_v45 }
  0x27   : > { %2498 = vmatprep.subr.bf16.mxu1 %v2497_v14  ;;  %2508 = vmatpush1.bf16.msra.mxu0 %v2507_v25  ;;  %v315_v50 = vld [vmem:[%s3852_s2 + $0xa8] sm:$0xff]  ;;  %v276_v56 = vsub.f32 1.0, %v260_v44  ;;  %v261_v58 = vand.u32 2147483647, %v245_v46  ;;  %v325_v4 = vld [vmem:[%s3852_s2 + $0xf8] sm:$0xff]  ;;  %v302_v6 = vld [vmem:[%s3852_s2 + $0x40] sm:$0xff]  ;;  %v2515_v11 = vpack.c.bf16 %v312_v3, %v300_v2 }
  0x28   : > { %2141 = vmatmul.mubr.msk.f32.gmra.mrb[4].mxu0 %vm366_vm0, %v2920_v8  ;;  %2149 = vmatmul.mubr.msk.f32.gmra.mrb[4].mxu1 %vm366_vm0, %v2922_v9  ;;  %v2525_v51 = vpack.c.bf16 %v315_v50, %v303_v47  ;;  %v3002_v60 = vmax.f32 %v268_v55, 0.0  ;;  %v269_v62 = vsub.f32 1.0, %v253_v57  ;;  %v337_v5 = vld [vmem:[%s3852_s2 + $0x158] sm:$0xff]  ;;  %v314_v10 = vld [vmem:[%s3852_s2 + $0xa0] sm:$0xff]  ;;  %v324_v13 = vld [vmem:[%s3852_s2 + $0xf0] sm:$0xff] }
  0x29   : > { %497 = vmatprep.mubr.f32.mxu0 %v2733_v7  ;;  %545 = vmatprep.mubr.f32.mxu1 %v2733_v7  ;;  %v3004_v61 = vmax.f32 %v276_v56, 0.0  ;;  %v277_v63 = vsub.f32 1.0, %v261_v58  ;;  %v2517_v12 = vpack.c.bf16 %v337_v5, %v325_v4  ;;  %v336_v14 = vld [vmem:[%s3852_s2 + $0x150] sm:$0xff]  ;;  %v349_v15 = vld [vmem:[%s3852_s2 + $0x1b8] sm:$0xff]  ;;  %v2527_v16 = vpack.c.bf16 %v314_v10, %v302_v6  ;;  %v327_v17 = vld [vmem:[%s3852_s2 + $0x108] sm:$0xff] }
  0x2a   : > { %2500 = vmatpush1.bf16.msra.mxu1 %v2499_v18  ;;  %2510 = vmatprep.subr.bf16.mxu0 %v2509_v36  ;;  %v3012_v0 = vmax.f32 %v269_v62, 0.0  ;;  %v339_v18 = vld [vmem:[%s3852_s2 + $0x168] sm:$0xff]  ;;  %v361_v19 = vld [vmem:[%s3852_s2 + $0x218] sm:$0xff]  ;;  %v326_v20 = vld [vmem:[%s3852_s2 + $0x100] sm:$0xff]  ;;  %v2519_v22 = vpack.c.bf16 %v336_v14, %v324_v13 }
  0x2b   : > { %2514 = vmatprep.subr.bf16.mxu1 %v2513_v37  ;;  %2512 = vmatpush1.bf16.msra.mxu0 %v2511_v41  ;;  %v3014_v1 = vmax.f32 %v277_v63, 0.0  ;;  %v338_v21 = vld [vmem:[%s3852_s2 + $0x160] sm:$0xff]  ;;  %v348_v23 = vld [vmem:[%s3852_s2 + $0x1b0] sm:$0xff]  ;;  %v2529_v25 = vpack.c.bf16 %v339_v18, %v327_v17  ;;  %v2521_v26 = vpack.c.bf16 %v361_v19, %v349_v15  ;;  %v351_v30 = vld [vmem:[%s3852_s2 + $0x1c8] sm:$0xff] }
  0x2c   : > { %2142 = vmatmul.mubr.msk.f32.gmra.mrb[6].mxu0 %vm366_vm0, %v2948_v27  ;;  %2150 = vmatmul.mubr.msk.f32.gmra.mrb[6].mxu1 %vm366_vm0, %v2950_v28  ;;  %v360_v24 = vld [vmem:[%s3852_s2 + $0x210] sm:$0xff]  ;;  %v2531_v29 = vpack.c.bf16 %v338_v21, %v326_v20  ;;  %v363_v31 = vld [vmem:[%s3852_s2 + $0x228] sm:$0xff]  ;;  %v350_v32 = vld [vmem:[%s3852_s2 + $0x1c0] sm:$0xff] }
  0x2d   : > { %503 = vmatprep.mubr.f32.mxu0 %v2733_v7  ;;  %551 = vmatprep.mubr.f32.mxu1 %v2733_v7  ;;  %v362_v33 = vld [vmem:[%s3852_s2 + $0x220] sm:$0xff]  ;;  %v305_v34 = vld [vmem:[%s3852_s2 + $0x58] sm:$0xff]  ;;  %v2523_v36 = vpack.c.bf16 %v360_v24, %v348_v23  ;;  %v2533_v37 = vpack.c.bf16 %v363_v31, %v351_v30  ;;  %v304_v41 = vld [vmem:[%s3852_s2 + $0x50] sm:$0xff] }
  0x2e   : > { %2526 = vmatprep.subr.bf16.mxu0 %v2525_v51  ;;  %v317_v35 = vld [vmem:[%s3852_s2 + $0xb8] sm:$0xff]  ;;  %v2535_v39 = vpack.c.bf16 %v362_v33, %v350_v32  ;;  %v316_v43 = vld [vmem:[%s3852_s2 + $0xb0] sm:$0xff]  ;;  %v1493_v3 = vld [vmem:[%s3254_s19 + $0x80] sm:$0xff] }
  0x2f   : > { %v2537_v40 = vpack.c.bf16 %v317_v35, %v305_v34  ;;  %v329_v44 = vld [vmem:[%s3852_s2 + $0x118] sm:$0xff]  ;;  %v2539_v46 = vpack.c.bf16 %v316_v43, %v304_v41  ;;  %v328_v50 = vld [vmem:[%s3852_s2 + $0x110] sm:$0xff]  ;;  %v1494_v4 = vld [vmem:[%s3254_s19 + $0x88] sm:$0xff] }
  0x30   : > { %2143 = vmatmul.mubr.msk.f32.gmra.mrb[8].mxu0 %vm366_vm0, %v2970_v38  ;;  %2151 = vmatmul.mubr.msk.f32.gmra.mrb[8].mxu1 %vm366_vm0, %v2976_v42  ;;  %v341_v45 = vld [vmem:[%s3852_s2 + $0x178] sm:$0xff]  ;;  %v340_v51 = vld [vmem:[%s3852_s2 + $0x170] sm:$0xff]  ;;  %v1477_v5 = vld [vmem:[%s3254_s19] sm:$0xff]  ;;  %v2549_v6 = vpack.c.bf16 %v1494_v4, %v1493_v3 }
  0x31   : > { %509 = vmatprep.mubr.f32.mxu0 %v2733_v7  ;;  %557 = vmatprep.mubr.f32.mxu1 %v2733_v7  ;;  %v2541_v47 = vpack.c.bf16 %v341_v45, %v329_v44  ;;  %v353_v55 = vld [vmem:[%s3852_s2 + $0x1d8] sm:$0xff]  ;;  %v2543_v57 = vpack.c.bf16 %v340_v51, %v328_v50  ;;  %v352_v62 = vld [vmem:[%s3852_s2 + $0x1d0] sm:$0xff]  ;;  %v1478_v10 = vld [vmem:[%s3254_s19 + $0x8] sm:$0xff] }
  0x32   : > { %v365_v56 = vld [vmem:[%s3852_s2 + $0x238] sm:$0xff]  ;;  %v364_v63 = vld [vmem:[%s3852_s2 + $0x230] sm:$0xff]  ;;  %v1497_v18 = vld [vmem:[%s3254_s19 + $0xa0] sm:$0xff] }
  0x33   : > { %v2545_v58 = vpack.c.bf16 %v365_v56, %v353_v55  ;;  %v2547_v2 = vpack.c.bf16 %v364_v63, %v352_v62  ;;  %v1496_v13 = vld [vmem:[%s3254_s19 + $0x98] sm:$0xff]  ;;  %v1479_v14 = vld [vmem:[%s3254_s19 + $0x10] sm:$0xff]  ;;  %v1498_v19 = vld [vmem:[%s3254_s19 + $0xa8] sm:$0xff] }
  0x34   : > { %2144 = vmatmul.mubr.msk.f32.gmra.mrb[10].mxu0 %vm366_vm0, %v2988_v52  ;;  %2152 = vmatmul.mubr.msk.f32.gmra.mrb[10].mxu1 %vm366_vm0, %v2990_v54  ;;  %v1481_v20 = vld [vmem:[%s3254_s19 + $0x20] sm:$0xff]  ;;  %v2557_v21 = vpack.c.bf16 %v1498_v19, %v1497_v18  ;;  %v1499_v24 = vld [vmem:[%s3254_s19 + $0xb0] sm:$0xff]  ;;  %v1484_v30 = vld [vmem:[%s3254_s19 + $0x38] sm:$0xff] }
  0x35   : > { %515 = vmatprep.mubr.f32.mxu0 %v2733_v7  ;;  %563 = vmatprep.mubr.f32.mxu1 %v2733_v7  ;;  %v1525_v32 = vld [vmem:[%s3254_s19 + $0x180] sm:$0xff]  ;;  %v1526_v33 = vld [vmem:[%s3254_s19 + $0x188] sm:$0xff]  ;;  %v1527_v45 = vld [vmem:[%s3254_s19 + $0x190] sm:$0xff] }
  0x36   : > { %v2581_v34 = vpack.c.bf16 %v1526_v33, %v1525_v32  ;;  %v1501_v35 = vld [vmem:[%s3254_s19 + $0xc0] sm:$0xff]  ;;  %v1510_v44 = vld [vmem:[%s3254_s19 + $0x108] sm:$0xff]  ;;  %v1511_v51 = vld [vmem:[%s3254_s19 + $0x110] sm:$0xff] }
  0x37   : > { %v1509_v43 = vld [vmem:[%s3254_s19 + $0x100] sm:$0xff]  ;;  %v1512_v55 = vld [vmem:[%s3254_s19 + $0x118] sm:$0xff]  ;;  %v1487_v63 = vld [vmem:[%s3254_s19 + $0x50] sm:$0xff] }
  0x38   : > { %2145 = vmatmul.mubr.msk.f32.gmra.mrb[12].mxu0 %vm366_vm0, %v3002_v60  ;;  %2153 = vmatmul.mubr.msk.f32.gmra.mrb[12].mxu1 %vm366_vm0, %v3004_v61  ;;  %v1529_v56 = vld [vmem:[%s3254_s19 + $0x1a0] sm:$0xff]  ;;  %v1504_v62 = vld [vmem:[%s3254_s19 + $0xd8] sm:$0xff]  ;;  %v1534_v18 = vld [vmem:[%s3254_s19 + $0x1c8] sm:$0xff] }
  0x39   : > { %521 = vmatprep.mubr.f32.mxu0 %v2733_v7  ;;  %569 = vmatprep.mubr.f32.mxu1 %v2733_v7  ;;  %v1488_v4 = vld [vmem:[%s3254_s19 + $0x58] sm:$0xff]  ;;  %v1506_v19 = vld [vmem:[%s3254_s19 + $0xe8] sm:$0xff]  ;;  %v1519_v33 = vld [vmem:[%s3254_s19 + $0x150] sm:$0xff] }
  0x3c   : > { %2146 = vmatmul.mubr.msk.f32.gmra.mrb[14].mxu0 %vm366_vm0, %v3012_v0  ;;  %2154 = vmatmul.mubr.msk.f32.gmra.mrb[14].mxu1 %vm366_vm0, %v3014_v1 }
  0x3d   : > { %640 = vmatprep.mubr.f32.mxu1 %v2733_v7  ;;  %801 = vmatprep.mubr.f32.mxu0 %v2733_v7 }
  0x40   : > { %2155 = vmatmul.mubr.msk.f32.vlgmr.msra.gmra.mrb[16].mxu1 %vm366_vm0, %v2881_v48  ;;  %2171 = vmatmul.mubr.msk.f32.vlgmr.msra.gmra.mrb[16].mxu0 %vm366_vm0, %v2881_v48 }
  0x41   : > { %2516 = vmatpush1.bf16.msra.mxu1 %v2515_v11  ;;  %646 = vmatprep.mubr.f32.mxu1 %v2733_v7  ;;  %v2551_v11 = vpack.c.bf16 %v1478_v10, %v1477_v5  ;;  %v1513_v10 = vld [vmem:[%s3254_s19 + $0x120] sm:$0xff] }
  0x42   : > { %807 = vmatprep.mubr.f32.mxu0 %v2733_v7  ;;  %2518 = vmatprep.subr.bf16.mxu1 %v2517_v12  ;;  %v1495_v12 = vld [vmem:[%s3254_s19 + $0x90] sm:$0xff] }
  0x43   : > { %2528 = vmatpush1.bf16.msra.mxu0 %v2527_v16  ;;  %v2553_v15 = vpack.c.bf16 %v1496_v13, %v1495_v12  ;;  %v1480_v16 = vld [vmem:[%s3254_s19 + $0x18] sm:$0xff] }
  0x44   : > { %2156 = vmatmul.mubr.msk.f32.gmra.mrb[18].mxu1 %vm366_vm0, %v2886_v53  ;;  %2172 = vmatmul.mubr.msk.f32.gmra.mrb[18].mxu0 %vm366_vm0, %v2886_v53  ;;  %v2555_v17 = vpack.c.bf16 %v1480_v16, %v1479_v14  ;;  %v1532_v12 = vld [vmem:[%s3254_s19 + $0x1b8] sm:$0xff] }
  0x45   : > { %652 = vmatprep.mubr.f32.mxu1 %v2733_v7  ;;  %813 = vmatprep.mubr.f32.mxu0 %v2733_v7  ;;  %v1516_v16 = vld [vmem:[%s3254_s19 + $0x138] sm:$0xff] }
  0x46   : > { %2520 = vmatpush1.bf16.msra.mxu1 %v2519_v22  ;;  %2530 = vmatprep.subr.bf16.mxu0 %v2529_v25  ;;  %v1482_v22 = vld [vmem:[%s3254_s19 + $0x28] sm:$0xff]  ;;  %v1500_v25 = vld [vmem:[%s3254_s19 + $0xb8] sm:$0xff] }
  0x47   : > { %2522 = vmatprep.subr.bf16.mxu1 %v2521_v26  ;;  %2532 = vmatpush1.bf16.msra.mxu0 %v2531_v29  ;;  %v2559_v23 = vpack.c.bf16 %v1482_v22, %v1481_v20  ;;  %v1483_v26 = vld [vmem:[%s3254_s19 + $0x30] sm:$0xff]  ;;  %v2561_v29 = vpack.c.bf16 %v1500_v25, %v1499_v24  ;;  %v1489_v20 = vld [vmem:[%s3254_s19 + $0x60] sm:$0xff] }
  0x48   : > { %2157 = vmatmul.mubr.msk.f32.gmra.mrb[20].mxu1 %vm366_vm0, %v2920_v8  ;;  %2173 = vmatmul.mubr.msk.f32.gmra.mrb[20].mxu0 %vm366_vm0, %v2920_v8  ;;  %v2563_v31 = vpack.c.bf16 %v1484_v30, %v1483_v26  ;;  %v1517_v26 = vld [vmem:[%s3254_s19 + $0x140] sm:$0xff]  ;;  %v1536_v30 = vld [vmem:[%s3254_s19 + $0x1d8] sm:$0xff] }
  0x49   : > { %658 = vmatprep.mubr.f32.mxu1 %v2733_v7  ;;  %819 = vmatprep.mubr.f32.mxu0 %v2733_v7 }
  0x4a   : > { %2524 = vmatpush1.bf16.msra.mxu1 %v2523_v36  ;;  %2534 = vmatprep.subr.bf16.mxu0 %v2533_v37  ;;  %v1502_v36 = vld [vmem:[%s3254_s19 + $0xc8] sm:$0xff]  ;;  %v1485_v37 = vld [vmem:[%s3254_s19 + $0x40] sm:$0xff] }
  0x4b   : > { %2536 = vmatpush1.bf16.msra.mxu0 %v2535_v39  ;;  %2538 = vmatprep.subr.bf16.mxu1 %v2537_v40  ;;  %v2565_v39 = vpack.c.bf16 %v1502_v36, %v1501_v35  ;;  %v1486_v40 = vld [vmem:[%s3254_s19 + $0x48] sm:$0xff]  ;;  %v1537_v35 = vld [vmem:[%s3254_s19 + $0x1e0] sm:$0xff] }
  0x4c   : > { %2158 = vmatmul.mubr.msk.f32.gmra.mrb[22].mxu1 %vm366_vm0, %v2948_v27  ;;  %2174 = vmatmul.mubr.msk.f32.gmra.mrb[22].mxu0 %vm366_vm0, %v2948_v27  ;;  %v2567_v41 = vpack.c.bf16 %v1486_v40, %v1485_v37  ;;  %v1538_v36 = vld [vmem:[%s3254_s19 + $0x1e8] sm:$0xff]  ;;  %v1508_v37 = vld [vmem:[%s3254_s19 + $0xf8] sm:$0xff] }
  0x4d   : > { %664 = vmatprep.mubr.f32.mxu1 %v2733_v7  ;;  %825 = vmatprep.mubr.f32.mxu0 %v2733_v7 }
  0x4e   : > { %2550 = vmatprep.subr.bf16.mxu0 %v2549_v6  ;;  %v2571_v6 = vpack.c.bf16 %v1488_v4, %v1487_v63  ;;  %v1558_v63 = vld [vmem:[%s3254_s19 + $0x288] sm:$0xff] }
  0x50   : > { %2159 = vmatmul.mubr.msk.f32.gmra.mrb[24].mxu1 %vm366_vm0, %v2970_v38  ;;  %2175 = vmatmul.mubr.msk.f32.gmra.mrb[24].mxu0 %vm366_vm0, %v2970_v38 }
  0x51   : > { %670 = vmatprep.mubr.f32.mxu1 %v2733_v7  ;;  %831 = vmatprep.mubr.f32.mxu0 %v2733_v7 }
  0x54   : > { %2160 = vmatmul.mubr.msk.f32.gmra.mrb[26].mxu1 %vm366_vm0, %v2988_v52  ;;  %2176 = vmatmul.mubr.msk.f32.gmra.mrb[26].mxu0 %vm366_vm0, %v2988_v52 }
  0x55   : > { %676 = vmatprep.mubr.f32.mxu1 %v2733_v7  ;;  %837 = vmatprep.mubr.f32.mxu0 %v2733_v7 }
  0x58   : > { %2161 = vmatmul.mubr.msk.f32.gmra.mrb[28].mxu1 %vm366_vm0, %v3002_v60  ;;  %2177 = vmatmul.mubr.msk.f32.gmra.mrb[28].mxu0 %vm366_vm0, %v3002_v60 }
  0x59   : > { %682 = vmatprep.mubr.f32.mxu1 %v2733_v7  ;;  %843 = vmatprep.mubr.f32.mxu0 %v2733_v7 }
  0x5c   : > { %2162 = vmatmul.mubr.msk.f32.gmra.mrb[30].mxu1 %vm366_vm0, %v3012_v0  ;;  %2178 = vmatmul.mubr.msk.f32.gmra.mrb[30].mxu0 %vm366_vm0, %v3012_v0 }
  0x5d   : > { %688 = vmatprep.mubr.f32.mxu1 %v2733_v7  ;;  %849 = vmatprep.mubr.f32.mxu0 %v2733_v7 }
  0x60   : > { %2163 = vmatmul.mubr.msk.f32.gmra.mrb[32].mxu1 %vm366_vm0, %v2883_v49  ;;  %2179 = vmatmul.mubr.msk.f32.gmra.mrb[32].mxu0 %vm366_vm0, %v2883_v49 }
  0x61   : > { %694 = vmatprep.mubr.f32.mxu1 %v2733_v7  ;;  %855 = vmatprep.mubr.f32.mxu0 %v2733_v7 }
  0x64   : > { %2164 = vmatmul.mubr.msk.f32.gmra.mrb[34].mxu1 %vm366_vm0, %v2899_v59  ;;  %2180 = vmatmul.mubr.msk.f32.gmra.mrb[34].mxu0 %vm366_vm0, %v2899_v59 }
  0x65   : > { %700 = vmatprep.mubr.f32.mxu1 %v2733_v7  ;;  %861 = vmatprep.mubr.f32.mxu0 %v2733_v7 }
  0x68   : > { %2165 = vmatmul.mubr.msk.f32.gmra.mrb[36].mxu1 %vm366_vm0, %v2922_v9  ;;  %2181 = vmatmul.mubr.msk.f32.gmra.mrb[36].mxu0 %vm366_vm0, %v2922_v9 }
  0x69   : > { %706 = vmatprep.mubr.f32.mxu1 %v2733_v7  ;;  %867 = vmatprep.mubr.f32.mxu0 %v2733_v7 }
  0x6c   : > { %2166 = vmatmul.mubr.msk.f32.gmra.mrb[38].mxu1 %vm366_vm0, %v2950_v28  ;;  %2182 = vmatmul.mubr.msk.f32.gmra.mrb[38].mxu0 %vm366_vm0, %v2950_v28 }
  0x6d   : > { %712 = vmatprep.mubr.f32.mxu1 %v2733_v7  ;;  %873 = vmatprep.mubr.f32.mxu0 %v2733_v7 }
  0x70   : > { %2167 = vmatmul.mubr.msk.f32.gmra.mrb[40].mxu1 %vm366_vm0, %v2976_v42  ;;  %2183 = vmatmul.mubr.msk.f32.gmra.mrb[40].mxu0 %vm366_vm0, %v2976_v42 }
  0x71   : > { %718 = vmatprep.mubr.f32.mxu1 %v2733_v7  ;;  %879 = vmatprep.mubr.f32.mxu0 %v2733_v7 }
  0x74   : > { %2168 = vmatmul.mubr.msk.f32.gmra.mrb[42].mxu1 %vm366_vm0, %v2990_v54  ;;  %2184 = vmatmul.mubr.msk.f32.gmra.mrb[42].mxu0 %vm366_vm0, %v2990_v54 }
  0x75   : > { %724 = vmatprep.mubr.f32.mxu1 %v2733_v7  ;;  %885 = vmatprep.mubr.f32.mxu0 %v2733_v7 }
  0x78   : > { %2169 = vmatmul.mubr.msk.f32.gmra.mrb[44].mxu1 %vm366_vm0, %v3004_v61  ;;  %2185 = vmatmul.mubr.msk.f32.gmra.mrb[44].mxu0 %vm366_vm0, %v3004_v61 }
  0x79   : > { %730 = vmatprep.mubr.f32.mxu1 %v2733_v7  ;;  %891 = vmatprep.mubr.f32.mxu0 %v2733_v7 }
  0x7c   : > { %2170 = vmatmul.mubr.msk.f32.gmra.mrb[46].mxu1 %vm366_vm0, %v3014_v1  ;;  %2186 = vmatmul.mubr.msk.f32.gmra.mrb[46].mxu0 %vm366_vm0, %v3014_v1 }
  0x7d   : > { %962 = vmatprep.mubr.f32.mxu1 %v2733_v7  ;;  %1123 = vmatprep.mubr.f32.mxu0 %v2733_v7 }
  0x80   : > { %2187 = vmatmul.mubr.msk.f32.vlgmr.msra.gmra.mrb[48].mxu1 %vm366_vm0, %v2881_v48  ;;  %2203 = vmatmul.mubr.msk.f32.vlgmr.msra.gmra.mrb[48].mxu0 %vm366_vm0, %v2881_v48 }
  0x81   : > { %2540 = vmatpush1.bf16.msra.mxu1 %v2539_v46  ;;  %968 = vmatprep.mubr.f32.mxu1 %v2733_v7  ;;  %v1528_v46 = vld [vmem:[%s3254_s19 + $0x198] sm:$0xff] }
  0x82   : > { %1129 = vmatprep.mubr.f32.mxu0 %v2733_v7  ;;  %2542 = vmatprep.subr.bf16.mxu1 %v2541_v47  ;;  %v2583_v47 = vpack.c.bf16 %v1510_v44, %v1509_v43  ;;  %v2585_v50 = vpack.c.bf16 %v1528_v46, %v1527_v45  ;;  %v1492_v43 = vld [vmem:[%s3254_s19 + $0x78] sm:$0xff]  ;;  %v2605_v44 = vpack.c.bf16 %v1538_v36, %v1537_v35  ;;  %v1521_v46 = vld [vmem:[%s3254_s19 + $0x160] sm:$0xff] }
  0x83   : > { %2552 = vmatpush3.bf16.msra.mxu0 %v2551_v11  ;;  %v1514_v11 = vld [vmem:[%s3254_s19 + $0x128] sm:$0xff] }
  0x84   : > { %2188 = vmatmul.mubr.msk.f32.gmra.mrb[50].mxu1 %vm366_vm0, %v2886_v53  ;;  %2204 = vmatmul.mubr.msk.f32.gmra.mrb[50].mxu0 %vm366_vm0, %v2886_v53  ;;  %v2591_v13 = vpack.c.bf16 %v1514_v11, %v1513_v10 }
  0x85   : > { %974 = vmatprep.mubr.f32.mxu1 %v2733_v7  ;;  %1135 = vmatprep.mubr.f32.mxu0 %v2733_v7 }
  0x86   : > { %2544 = vmatpush1.bf16.msra.mxu1 %v2543_v57  ;;  %2554 = vmatprep.subr.bf16.mxu0 %v2553_v15  ;;  %v1530_v57 = vld [vmem:[%s3254_s19 + $0x1a8] sm:$0xff]  ;;  %v1515_v15 = vld [vmem:[%s3254_s19 + $0x130] sm:$0xff] }
  0x87   : > { %2546 = vmatprep.subr.bf16.mxu1 %v2545_v58  ;;  %2556 = vmatpush3.bf16.msra.mxu0 %v2555_v17  ;;  %v1503_v58 = vld [vmem:[%s3254_s19 + $0xd0] sm:$0xff]  ;;  %v2589_v5 = vpack.c.bf16 %v1530_v57, %v1529_v56  ;;  %v1533_v17 = vld [vmem:[%s3254_s19 + $0x1c0] sm:$0xff]  ;;  %v1524_v57 = vld [vmem:[%s3254_s19 + $0x178] sm:$0xff] }
  0x88   : > { %2189 = vmatmul.mubr.msk.f32.gmra.mrb[52].mxu1 %vm366_vm0, %v2920_v8  ;;  %2205 = vmatmul.mubr.msk.f32.gmra.mrb[52].mxu0 %vm366_vm0, %v2920_v8  ;;  %v2569_v3 = vpack.c.bf16 %v1504_v62, %v1503_v58  ;;  %v2597_v24 = vpack.c.bf16 %v1534_v18, %v1533_v17  ;;  %v1523_v56 = vld [vmem:[%s3254_s19 + $0x170] sm:$0xff]  ;;  %v1557_v62 = vld [vmem:[%s3254_s19 + $0x280] sm:$0xff] }
  0x89   : > { %980 = vmatprep.mubr.f32.mxu1 %v2733_v7  ;;  %1141 = vmatprep.mubr.f32.mxu0 %v2733_v7  ;;  %v2611_v58 = vpack.c.bf16 %v1524_v57, %v1523_v56 }
  0x8a   : > { %2548 = vmatpush1.bf16.msra.mxu1 %v2547_v2  ;;  %2558 = vmatprep.subr.bf16.mxu0 %v2557_v21  ;;  %v2587_v2 = vpack.c.bf16 %v1512_v55, %v1511_v51  ;;  %v2595_v21 = vpack.c.bf16 %v1516_v16, %v1515_v15 }
  0x8b   : > { %2560 = vmatpush3.bf16.msra.mxu0 %v2559_v23  ;;  %2582 = vmatprep.subr.bf16.mxu1 %v2581_v34  ;;  %v1490_v23 = vld [vmem:[%s3254_s19 + $0x68] sm:$0xff]  ;;  %v1520_v34 = vld [vmem:[%s3254_s19 + $0x158] sm:$0xff] }
  0x8c   : > { %2190 = vmatmul.mubr.msk.f32.gmra.mrb[54].mxu1 %vm366_vm0, %v2948_v27  ;;  %2206 = vmatmul.mubr.msk.f32.gmra.mrb[54].mxu0 %vm366_vm0, %v2948_v27  ;;  %v2575_v25 = vpack.c.bf16 %v1490_v23, %v1489_v20  ;;  %v2603_v40 = vpack.c.bf16 %v1520_v34, %v1519_v33 }
  0x8d   : > { %986 = vmatprep.mubr.f32.mxu1 %v2733_v7  ;;  %1147 = vmatprep.mubr.f32.mxu0 %v2733_v7 }
  0x8e   : > { %2562 = vmatprep.subr.bf16.mxu0 %v2561_v29  ;;  %v1518_v29 = vld [vmem:[%s3254_s19 + $0x148] sm:$0xff] }
  0x8f   : > { %2564 = vmatpush3.bf16.msra.mxu0 %v2563_v31  ;;  %v2599_v31 = vpack.c.bf16 %v1518_v29, %v1517_v26 }
  0x90   : > { %2191 = vmatmul.mubr.msk.f32.gmra.mrb[56].mxu1 %vm366_vm0, %v2970_v38  ;;  %2207 = vmatmul.mubr.msk.f32.gmra.mrb[56].mxu0 %vm366_vm0, %v2970_v38 }
  0x91   : > { %992 = vmatprep.mubr.f32.mxu1 %v2733_v7  ;;  %1153 = vmatprep.mubr.f32.mxu0 %v2733_v7 }
  0x92   : > { %2566 = vmatprep.subr.bf16.mxu0 %v2565_v39  ;;  %v1491_v39 = vld [vmem:[%s3254_s19 + $0x70] sm:$0xff] }
  0x93   : > { %2568 = vmatpush3.bf16.msra.mxu0 %v2567_v41  ;;  %v2579_v45 = vpack.c.bf16 %v1492_v43, %v1491_v39 }
  0x94   : > { %2192 = vmatmul.mubr.msk.f32.gmra.mrb[58].mxu1 %vm366_vm0, %v2988_v52  ;;  %2208 = vmatmul.mubr.msk.f32.gmra.mrb[58].mxu0 %vm366_vm0, %v2988_v52 }
  0x95   : > { %998 = vmatprep.mubr.f32.mxu1 %v2733_v7  ;;  %1159 = vmatprep.mubr.f32.mxu0 %v2733_v7 }
  0x96   : > { %2570 = vmatprep.subr.bf16.mxu0 %v2569_v3 }
  0x97   : > { %2572 = vmatpush3.bf16.msra.mxu0 %v2571_v6 }
  0x98   : > { %2193 = vmatmul.mubr.msk.f32.gmra.mrb[60].mxu1 %vm366_vm0, %v3002_v60  ;;  %2209 = vmatmul.mubr.msk.f32.gmra.mrb[60].mxu0 %vm366_vm0, %v3002_v60 }
  0x99   : > { %1004 = vmatprep.mubr.f32.mxu1 %v2733_v7  ;;  %1165 = vmatprep.mubr.f32.mxu0 %v2733_v7 }
  0x9c   : > { %2194 = vmatmul.mubr.msk.f32.gmra.mrb[62].mxu1 %vm366_vm0, %v3012_v0  ;;  %2210 = vmatmul.mubr.msk.f32.gmra.mrb[62].mxu0 %vm366_vm0, %v3012_v0 }
  0x9d   : > { %1010 = vmatprep.mubr.f32.mxu1 %v2733_v7  ;;  %1171 = vmatprep.mubr.f32.mxu0 %v2733_v7 }
  0xa0   : > { %2195 = vmatmul.mubr.msk.f32.gmra.mrb[64].mxu1 %vm366_vm0, %v2883_v49  ;;  %2211 = vmatmul.mubr.msk.f32.gmra.mrb[64].mxu0 %vm366_vm0, %v2883_v49 }
  0xa1   : > { %1016 = vmatprep.mubr.f32.mxu1 %v2733_v7  ;;  %1177 = vmatprep.mubr.f32.mxu0 %v2733_v7 }
  0xa4   : > { %2196 = vmatmul.mubr.msk.f32.gmra.mrb[66].mxu1 %vm366_vm0, %v2899_v59  ;;  %2212 = vmatmul.mubr.msk.f32.gmra.mrb[66].mxu0 %vm366_vm0, %v2899_v59 }
  0xa5   : > { %1022 = vmatprep.mubr.f32.mxu1 %v2733_v7  ;;  %1183 = vmatprep.mubr.f32.mxu0 %v2733_v7 }
  0xa8   : > { %2197 = vmatmul.mubr.msk.f32.gmra.mrb[68].mxu1 %vm366_vm0, %v2922_v9  ;;  %2213 = vmatmul.mubr.msk.f32.gmra.mrb[68].mxu0 %vm366_vm0, %v2922_v9 }
  0xa9   : > { %1028 = vmatprep.mubr.f32.mxu1 %v2733_v7  ;;  %1189 = vmatprep.mubr.f32.mxu0 %v2733_v7 }
  0xac   : > { %2198 = vmatmul.mubr.msk.f32.gmra.mrb[70].mxu1 %vm366_vm0, %v2950_v28  ;;  %2214 = vmatmul.mubr.msk.f32.gmra.mrb[70].mxu0 %vm366_vm0, %v2950_v28 }
  0xad   : > { %1034 = vmatprep.mubr.f32.mxu1 %v2733_v7  ;;  %1195 = vmatprep.mubr.f32.mxu0 %v2733_v7 }
  0xb0   : > { %2199 = vmatmul.mubr.msk.f32.gmra.mrb[72].mxu1 %vm366_vm0, %v2976_v42  ;;  %2215 = vmatmul.mubr.msk.f32.gmra.mrb[72].mxu0 %vm366_vm0, %v2976_v42 }
  0xb1   : > { %1040 = vmatprep.mubr.f32.mxu1 %v2733_v7  ;;  %1201 = vmatprep.mubr.f32.mxu0 %v2733_v7 }
  0xb4   : > { %2200 = vmatmul.mubr.msk.f32.gmra.mrb[74].mxu1 %vm366_vm0, %v2990_v54  ;;  %2216 = vmatmul.mubr.msk.f32.gmra.mrb[74].mxu0 %vm366_vm0, %v2990_v54 }
  0xb5   : > { %1046 = vmatprep.mubr.f32.mxu1 %v2733_v7  ;;  %1207 = vmatprep.mubr.f32.mxu0 %v2733_v7 }
  0xb8   : > { %2201 = vmatmul.mubr.msk.f32.gmra.mrb[76].mxu1 %vm366_vm0, %v3004_v61  ;;  %2217 = vmatmul.mubr.msk.f32.gmra.mrb[76].mxu0 %vm366_vm0, %v3004_v61 }
  0xb9   : > { %1052 = vmatprep.mubr.f32.mxu1 %v2733_v7  ;;  %1213 = vmatprep.mubr.f32.mxu0 %v2733_v7 }
  0xbc   : > { %2202 = vmatmul.mubr.msk.f32.gmra.mrb[78].mxu1 %vm366_vm0, %v3014_v1  ;;  %2218 = vmatmul.mubr.msk.f32.gmra.mrb[78].mxu0 %vm366_vm0, %v3014_v1 }
  0xbd   : > { %1284 = vmatprep.mubr.f32.mxu1 %v2733_v7 }
  0xc0   : > { %2219 = vmatmul.mubr.msk.f32.vlgmr.msra.gmra.mrb[80].mxu1 %vm366_vm0, %v2881_v48  ;;  %v1531_v48 = vld [vmem:[%s3254_s19 + $0x1b0] sm:$0xff] }
  0xc1   : > { %1290 = vmatprep.mubr.f32.mxu1 %v2733_v7  ;;  %2584 = vmatpush3.bf16.msra.mxu1 %v2583_v47  ;;  %v2593_v14 = vpack.c.bf16 %v1532_v12, %v1531_v48  ;;  %v1522_v47 = vld [vmem:[%s3254_s19 + $0x168] sm:$0xff] }
  0xc2   : > { %2586 = vmatprep.subr.bf16.mxu1 %v2585_v50  ;;  %v1540_v50 = vld [vmem:[%s3254_s19 + $0x1f8] sm:$0xff]  ;;  %v2607_v51 = vpack.c.bf16 %v1522_v47, %v1521_v46 }
  0xc4   : > { %2220 = vmatmul.mubr.msk.f32.gmra.mrb[82].mxu1 %vm366_vm0, %v2886_v53  ;;  %v1505_v53 = vld [vmem:[%s3254_s19 + $0xe0] sm:$0xff] }
  0xc5   : > { %1296 = vmatprep.mubr.f32.mxu1 %v2733_v7  ;;  %2588 = vmatpush3.bf16.msra.mxu1 %v2587_v2  ;;  %v2573_v22 = vpack.c.bf16 %v1506_v19, %v1505_v53 }
  0xc6   : > { %2590 = vmatprep.subr.bf16.mxu1 %v2589_v5 }
  0xc7   : > { %2574 = vmatprep.subr.bf16.mxu0 %v2573_v22 }
  0xc8   : > { %2221 = vmatmul.mubr.msk.f32.gmra.mrb[84].mxu1 %vm366_vm0, %v2920_v8  ;;  %v1535_v8 = vld [vmem:[%s3254_s19 + $0x1d0] sm:$0xff]  ;;  %2576 = vmatpush3.bf16.msra.mxu0 %v2575_v25 }
  0xc9   : > { %1302 = vmatprep.mubr.f32.mxu1 %v2733_v7  ;;  %2592 = vmatpush3.bf16.msra.mxu1 %v2591_v13  ;;  %v2601_v32 = vpack.c.bf16 %v1536_v30, %v1535_v8 }
  0xca   : > { %2594 = vmatprep.subr.bf16.mxu1 %v2593_v14 }
  0xcc   : > { %2222 = vmatmul.mubr.msk.f32.gmra.mrb[86].mxu1 %vm366_vm0, %v2948_v27  ;;  %v1507_v27 = vld [vmem:[%s3254_s19 + $0xf0] sm:$0xff] }
  0xcd   : > { %1308 = vmatprep.mubr.f32.mxu1 %v2733_v7  ;;  %2596 = vmatpush3.bf16.msra.mxu1 %v2595_v21  ;;  %v2577_v41 = vpack.c.bf16 %v1508_v37, %v1507_v27 }
  0xce   : > { %2598 = vmatprep.subr.bf16.mxu1 %v2597_v24 }
  0xcf   : > { %2578 = vmatprep.subr.bf16.mxu0 %v2577_v41 }
  0xd0   : > { %2223 = vmatmul.mubr.msk.f32.gmra.mrb[88].mxu1 %vm366_vm0, %v2970_v38  ;;  %v1539_v38 = vld [vmem:[%s3254_s19 + $0x1f0] sm:$0xff]  ;;  %2580 = vmatpush3.bf16.msra.mxu0 %v2579_v45 }
  0xd1   : > { %1314 = vmatprep.mubr.f32.mxu1 %v2733_v7  ;;  %2600 = vmatpush3.bf16.msra.mxu1 %v2599_v31  ;;  %v2609_v55 = vpack.c.bf16 %v1540_v50, %v1539_v38 }
  0xd2   : > { %2602 = vmatprep.subr.bf16.mxu1 %v2601_v32 }
  0xd4   : > { %2224 = vmatmul.mubr.msk.f32.gmra.mrb[90].mxu1 %vm366_vm0, %v2988_v52  ;;  %v2613_v52 = vpack.c.bf16 %v1558_v63, %v1557_v62 }
  0xd5   : > { %1320 = vmatprep.mubr.f32.mxu1 %v2733_v7  ;;  %2604 = vmatpush3.bf16.msra.mxu1 %v2603_v40 }
  0xd6   : > { %2606 = vmatprep.subr.bf16.mxu1 %v2605_v44  ;;  %2614 = vmatprep.subr.bf16.mxu0 %v2613_v52 }
  0xd8   : > { %2225 = vmatmul.mubr.msk.f32.gmra.mrb[92].mxu1 %vm366_vm0, %v3002_v60 }
  0xd9   : > { %1326 = vmatprep.mubr.f32.mxu1 %v2733_v7  ;;  %2608 = vmatpush3.bf16.msra.mxu1 %v2607_v51 }
  0xda   : > { %2610 = vmatprep.subr.bf16.mxu1 %v2609_v55 }
  0xdc   : > { %2226 = vmatmul.mubr.msk.f32.gmra.mrb[94].mxu1 %vm366_vm0, %v3012_v0 }
  0xdd   : > { %1332 = vmatprep.mubr.f32.mxu1 %v2733_v7  ;;  %2612 = vmatpush3.bf16.msra.mxu1 %v2611_v58 }
  0xe0   : > { %2227 = vmatmul.mubr.msk.f32.gmra.mrb[96].mxu1 %vm366_vm0, %v2883_v49 }
  0xe1   : > { %1338 = vmatprep.mubr.f32.mxu1 %v2733_v7 }
  0xe4   : > { %2228 = vmatmul.mubr.msk.f32.gmra.mrb[98].mxu1 %vm366_vm0, %v2899_v59 }
  0xe5   : > { %1344 = vmatprep.mubr.f32.mxu1 %v2733_v7 }
  0xe8   : > { %2229 = vmatmul.mubr.msk.f32.gmra.mrb[100].mxu1 %vm366_vm0, %v2922_v9 }
  0xe9   : > { %1350 = vmatprep.mubr.f32.mxu1 %v2733_v7 }
  0xec   : > { %2230 = vmatmul.mubr.msk.f32.gmra.mrb[102].mxu1 %vm366_vm0, %v2950_v28 }
  0xed   : > { %1356 = vmatprep.mubr.f32.mxu1 %v2733_v7 }
  0xf0   : > { %2231 = vmatmul.mubr.msk.f32.gmra.mrb[104].mxu1 %vm366_vm0, %v2976_v42 }
  0xf1   : > { %1362 = vmatprep.mubr.f32.mxu1 %v2733_v7 }
  0xf3   : > { %v3422_v49 = vpop.f32.mrb[0].mxu1  ;;  %v3424_v59 = vpop.f32.mrb[0].mxu0 }
  0xf4   : > { %v3426_v60 = vpop.f32.mrb[1].mxu1  ;;  %2232 = vmatmul.mubr.msk.f32.gmra.mrb[106].mxu1 %vm366_vm0, %v2990_v54  ;;  %v3430_v9 = vpop.f32.mrb[1].mxu0 }
  0xf5   : > { %1368 = vmatprep.mubr.f32.mxu1 %v2733_v7 }
  0xf7   : > { %v3433_v28 = vpop.f32.mrb[2].mxu1  ;;  %v3435_v0 = vpop.f32.mrb[2].mxu0 }
  0xf8   : > { %v3437_v42 = vpop.f32.mrb[3].mxu1  ;;  %2233 = vmatmul.mubr.msk.f32.gmra.mrb[108].mxu1 %vm366_vm0, %v3004_v61  ;;  %v3441_v2 = vpop.f32.mrb[3].mxu0 }
  0xf9   : > { %1374 = vmatprep.mubr.f32.mxu1 %v2733_v7 }
  0xfb   : > { %v3444_v3 = vpop.f32.mrb[4].mxu1  ;;  %v3446_v54 = vpop.f32.mrb[4].mxu0 }
  0xfc   : > { %v3448_v4 = vpop.f32.mrb[5].mxu1  ;;  %2234 = vmatmul.mubr.msk.f32.gmra.mrb[110].mxu1 %vm366_vm0, %v3014_v1  ;;  %v3452_v5 = vpop.f32.mrb[5].mxu0 }
  0xff   : > { %v3454_v6 = vpop.f32.mrb[6].mxu1  ;;  %v3456_v10 = vpop.f32.mrb[6].mxu0 }
 0x100   : > { %v3458_v61 = vpop.f32.mrb[7].mxu1  ;;  %v3460_v11 = vpop.f32.mrb[7].mxu0 }
 0x101   : > { %3854 = vst [vmem:[#allocation2_spill] sm:$0xff] %v3458_v61 }
 0x103   : > { %v3462_v7 = vpop.f32.mrb[8].mxu1  ;;  %v3464_v48 = vpop.f32.mrb[8].mxu0 }
 0x104   : > { %3855 = vst [vmem:[#allocation3_spill] sm:$0xff] %v3462_v7  ;;  %v3466_v12 = vpop.f32.mrb[9].mxu1  ;;  %v3468_v13 = vpop.f32.mrb[9].mxu0  ;;  %v1544_v7 = vld [vmem:[%s3254_s19 + $0x218] sm:$0xff] }
 0x105   : > { %3856 = vst [vmem:[#allocation4_spill] sm:$0xff] %v3466_v12 }
 0x107   : > { %v3470_v14 = vpop.f32.mrb[10].mxu1  ;;  %v3472_v1 = vpop.f32.mrb[10].mxu0 }
 0x108   : > { %3857 = vst [vmem:[#allocation5_spill] sm:$0xff] %v3470_v14  ;;  %v3474_v15 = vpop.f32.mrb[11].mxu1  ;;  %v3476_v16 = vpop.f32.mrb[11].mxu0  ;;  %v1559_v14 = vld [vmem:[%s3254_s19 + $0x290] sm:$0xff] }
 0x109   : > { %3858 = vst [vmem:[#allocation6_spill] sm:$0xff] %v3474_v15 }
 0x10b   : > { %v3478_v17 = vpop.f32.mrb[12].mxu1  ;;  %v3480_v18 = vpop.f32.mrb[12].mxu0 }
 0x10c   : > { %3859 = vst [vmem:[#allocation7_spill] sm:$0xff] %v3478_v17  ;;  %v3482_v53 = vpop.f32.mrb[13].mxu1  ;;  %v3484_v19 = vpop.f32.mrb[13].mxu0 }
 0x10d   : > { %3860 = vst [vmem:[#allocation8_spill] sm:$0xff] %v3482_v53 }
 0x10f   : > { %v3486_v20 = vpop.f32.mrb[14].mxu1  ;;  %v3488_v21 = vpop.f32.mrb[14].mxu0 }
 0x110   : > { %3861 = vst [vmem:[#allocation9_spill] sm:$0xff] %v3486_v20  ;;  %v3490_v22 = vpop.f32.mrb[15].mxu1  ;;  %v3492_v23 = vpop.f32.mrb[15].mxu0 }
 0x111   : > { %3862 = vst [vmem:[#allocation10_spill] sm:$0xff] %v3490_v22 }
 0x113   : > { %v3494_v24 = vpop.f32.mrb[16].mxu1  ;;  %v3496_v25 = vpop.f32.mrb[16].mxu0 }
 0x114   : > { %3863 = vst [vmem:[#allocation11_spill] sm:$0xff] %v3496_v25  ;;  %v3498_v26 = vpop.f32.mrb[17].mxu1  ;;  %v3500_v29 = vpop.f32.mrb[17].mxu0 }
 0x115   : > { %3864 = vst [vmem:[#allocation12_spill] sm:$0xff] %v3500_v29 }
 0x117   : > { %v3502_v8 = vpop.f32.mrb[18].mxu1  ;;  %v3504_v30 = vpop.f32.mrb[18].mxu0 }
 0x118   : > { %3865 = vst [vmem:[#allocation13_spill] sm:$0xff] %v3504_v30  ;;  %v3506_v31 = vpop.f32.mrb[19].mxu1  ;;  %v3508_v32 = vpop.f32.mrb[19].mxu0 }
 0x119   : > { %3866 = vst [vmem:[#allocation14_spill] sm:$0xff] %v3508_v32 }
 0x11b   : > { %v3510_v33 = vpop.f32.mrb[20].mxu1  ;;  %v3512_v34 = vpop.f32.mrb[20].mxu0 }
 0x11c   : > { %3867 = vst [vmem:[#allocation15_spill] sm:$0xff] %v3512_v34  ;;  %v3514_v35 = vpop.f32.mrb[21].mxu1  ;;  %v3516_v36 = vpop.f32.mrb[21].mxu0 }
 0x11d   : > { %3868 = vst [vmem:[#allocation16_spill] sm:$0xff] %v3516_v36 }
 0x11f   : > { %v3518_v27 = vpop.f32.mrb[22].mxu1  ;;  %v3520_v37 = vpop.f32.mrb[22].mxu0 }
 0x120   : > { %3869 = vst [vmem:[#allocation17_spill] sm:$0xff] %v3520_v37  ;;  %v3522_v39 = vpop.f32.mrb[23].mxu1  ;;  %v3524_v40 = vpop.f32.mrb[23].mxu0 }
 0x121   : > { %3870 = vst [vmem:[#allocation18_spill] sm:$0xff] %v3524_v40 }
 0x123   : > { %v3526_v41 = vpop.f32.mrb[24].mxu1  ;;  %v3528_v43 = vpop.f32.mrb[24].mxu0 }
 0x124   : > { %3871 = vst [vmem:[#allocation19_spill] sm:$0xff] %v3528_v43  ;;  %v3530_v44 = vpop.f32.mrb[25].mxu1  ;;  %v3532_v45 = vpop.f32.mrb[25].mxu0 }
 0x125   : > { %3872 = vst [vmem:[#allocation20_spill] sm:$0xff] %v3532_v45 }
 0x127   : > { %v3534_v46 = vpop.f32.mrb[26].mxu1  ;;  %v3536_v47 = vpop.f32.mrb[26].mxu0 }
 0x128   : > { %3873 = vst [vmem:[#allocation21_spill] sm:$0xff] %v3536_v47  ;;  %v3538_v38 = vpop.f32.mrb[27].mxu1  ;;  %v3540_v50 = vpop.f32.mrb[27].mxu0 }
 0x129   : > { %3874 = vst [vmem:[#allocation22_spill] sm:$0xff] %v3540_v50 }
 0x12b   : > { %v3542_v51 = vpop.f32.mrb[28].mxu1  ;;  %v3544_v55 = vpop.f32.mrb[28].mxu0 }
 0x12c   : > { %3875 = vst [vmem:[#allocation23_spill] sm:$0xff] %v3544_v55  ;;  %v3546_v56 = vpop.f32.mrb[29].mxu1  ;;  %v3548_v57 = vpop.f32.mrb[29].mxu0 }
 0x12d   : > { %3876 = vst [vmem:[#allocation24_spill] sm:$0xff] %v3548_v57 }
 0x12f   : > { %v3550_v58 = vpop.f32.mrb[30].mxu1  ;;  %v3552_v62 = vpop.f32.mrb[30].mxu0 }
 0x130   : > { %3877 = vst [vmem:[#allocation25_spill] sm:$0xff] %v3552_v62  ;;  %v3554_v63 = vpop.f32.mrb[31].mxu1  ;;  %v3556_v52 = vpop.f32.mrb[31].mxu0 }
 0x131   : > { %3878 = vst [vmem:[#allocation26_spill] sm:$0xff] %v3556_v52 }
 0x133   : > { %v3558_v47 = vpop.f32.mrb[32].mxu1  ;;  %v3560_v45 = vpop.f32.mrb[32].mxu0 }
 0x134   : > { %3879 = vst [vmem:[#allocation27_spill] sm:$0xff] %v3560_v45  ;;  %v3562_v50 = vpop.f32.mrb[33].mxu1  ;;  %v3564_v43 = vpop.f32.mrb[33].mxu0 }
 0x135   : > { %3880 = vst [vmem:[#allocation28_spill] sm:$0xff] %v3564_v43 }
 0x137   : > { %v3566_v55 = vpop.f32.mrb[34].mxu1  ;;  %v3568_v40 = vpop.f32.mrb[34].mxu0 }
 0x138   : > { %3881 = vst [vmem:[#allocation29_spill] sm:$0xff] %v3568_v40  ;;  %v3570_v57 = vpop.f32.mrb[35].mxu1  ;;  %v3572_v37 = vpop.f32.mrb[35].mxu0 }
 0x139   : > { %3882 = vst [vmem:[#allocation30_spill] sm:$0xff] %v3572_v37 }
 0x13b   : > { %v3574_v62 = vpop.f32.mrb[36].mxu1  ;;  %v3576_v36 = vpop.f32.mrb[36].mxu0 }
 0x13c   : > { %3883 = vst [vmem:[#allocation31_spill] sm:$0xff] %v3576_v36  ;;  %v3578_v52 = vpop.f32.mrb[37].mxu1  ;;  %v3580_v34 = vpop.f32.mrb[37].mxu0 }
 0x13d   : > { %3884 = vst [vmem:[#allocation32_spill] sm:$0xff] %v3580_v34 }
 0x13f   : > { %v3582_v45 = vpop.f32.mrb[38].mxu1  ;;  %v3584_v32 = vpop.f32.mrb[38].mxu0 }
 0x140   : > { %3885 = vst [vmem:[#allocation33_spill] sm:$0xff] %v3582_v45  ;;  %3886 = vst [vmem:[#allocation34_spill] sm:$0xff] %v3584_v32  ;;  %v3586_v43 = vpop.f32.mrb[39].mxu1  ;;  %v3588_v30 = vpop.f32.mrb[39].mxu0  ;;  %v1561_v45 = vld [vmem:[%s3254_s19 + $0x2a0] sm:$0xff] }
 0x141   : > { %3887 = vst [vmem:[#allocation35_spill] sm:$0xff] %v3586_v43  ;;  %3888 = vst [vmem:[#allocation36_spill] sm:$0xff] %v3588_v30 }
 0x143   : > { %v3590_v40 = vpop.f32.mrb[40].mxu1  ;;  %v3592_v37 = vpop.f32.mrb[40].mxu0 }
 0x144   : > { %3889 = vst [vmem:[#allocation37_spill] sm:$0xff] %v3590_v40  ;;  %3890 = vst [vmem:[#allocation38_spill] sm:$0xff] %v3592_v37  ;;  %v3594_v29 = vpop.f32.mrb[41].mxu1  ;;  %v3596_v36 = vpop.f32.mrb[41].mxu0  ;;  %v1543_v40 = vld [vmem:[%s3254_s19 + $0x210] sm:$0xff] }
 0x145   : > { %3891 = vst [vmem:[#allocation39_spill] sm:$0xff] %v3594_v29  ;;  %3892 = vst [vmem:[#allocation40_spill] sm:$0xff] %v3596_v36 }
 0x147   : > { %v3598_v25 = vpop.f32.mrb[42].mxu1  ;;  %v3600_v34 = vpop.f32.mrb[42].mxu0 }
 0x148   : > { %3893 = vst [vmem:[#allocation41_spill] sm:$0xff] %v3598_v25  ;;  %3894 = vst [vmem:[#allocation42_spill] sm:$0xff] %v3600_v34  ;;  %v3602_v32 = vpop.f32.mrb[43].mxu1  ;;  %v3604_v22 = vpop.f32.mrb[43].mxu0 }
 0x149   : > { %3895 = vst [vmem:[#allocation43_spill] sm:$0xff] %v3602_v32  ;;  %3896 = vst [vmem:[#allocation44_spill] sm:$0xff] %v3604_v22  ;;  %v1541_v32 = vld [vmem:[%s3254_s19 + $0x200] sm:$0xff]  ;;  %v1542_v22 = vld [vmem:[%s3254_s19 + $0x208] sm:$0xff] }
 0x14b   : > { %v3606_v30 = vpop.f32.mrb[44].mxu1  ;;  %v3608_v20 = vpop.f32.mrb[44].mxu0 }
 0x14c   : > { %3897 = vst [vmem:[#allocation45_spill] sm:$0xff] %v3606_v30  ;;  %3898 = vst [vmem:[#allocation46_spill] sm:$0xff] %v3608_v20  ;;  %v3610_v37 = vpop.f32.mrb[45].mxu1  ;;  %v3612_v53 = vpop.f32.mrb[45].mxu0  ;;  %v1560_v20 = vld [vmem:[%s3254_s19 + $0x298] sm:$0xff] }
 0x14d   : > { %3899 = vst [vmem:[#allocation47_spill] sm:$0xff] %v3610_v37  ;;  %3900 = vst [vmem:[#allocation48_spill] sm:$0xff] %v3612_v53  ;;  %v2617_v12 = vpack.c.bf16 %v1560_v20, %v1559_v14 }
 0x14f   : > { %v3614_v17 = vpop.f32.mrb[46].mxu1  ;;  %v3616_v36 = vpop.f32.mrb[46].mxu0 }
 0x150   : > { %3901 = vst [vmem:[#allocation49_spill] sm:$0xff] %v3614_v17  ;;  %3902 = vst [vmem:[#allocation50_spill] sm:$0xff] %v3616_v36  ;;  %v3618_v15 = vpop.f32.mrb[47].mxu1  ;;  %v3620_v34 = vpop.f32.mrb[47].mxu0 }
 0x151   : > { %3903 = vst [vmem:[#allocation51_spill] sm:$0xff] %v3618_v15  ;;  %3904 = vst [vmem:[#allocation52_spill] sm:$0xff] %v3620_v34  ;;  %v2615_v34 = vpack.c.bf16 %v1542_v22, %v1541_v32 }
 0x153   : > { %v964_v25 = vpop.f32.mrb[48].mxu1  ;;  %v1125_v30 = vpop.f32.mrb[48].mxu0 }
 0x154   : > { %v1381_v53 = vmul.f32 %v964_v25, %v3424_v59  ;;  %v1383_v17 = vmul.f32 %v1125_v30, %v3494_v24  ;;  %v966_v37 = vpop.f32.mrb[49].mxu1  ;;  %v1127_v36 = vpop.f32.mrb[49].mxu0  ;;  %v1562_v59 = vld [vmem:[%s3254_s19 + $0x2a8] sm:$0xff] }
 0x155   : > { %v1382_v15 = vmul.f32 %v966_v37, %v3430_v9  ;;  %v1384_v29 = vmul.f32 %v1127_v36, %v3498_v26  ;;  %v2621_v22 = vpack.c.bf16 %v1562_v59, %v1561_v45  ;;  %v1545_v26 = vld [vmem:[%s3254_s19 + $0x220] sm:$0xff]  ;;  %v1547_v37 = vld [vmem:[%s3254_s19 + $0x230] sm:$0xff]  ;;  %v1566_v45 = vld [vmem:[%s3254_s19 + $0x2c8] sm:$0xff] }
 0x157   : > { %v970_v43 = vpop.f32.mrb[50].mxu1  ;;  %v1131_v61 = vpop.f32.mrb[50].mxu0  ;;  %1637 = vmatprep.mubr.f32.mxu0 %v1382_v15  ;;  %1782 = vmatprep.mubr.f32.mxu1 %v1384_v29  ;;  %v2619_v15 = vpack.c.bf16 %v1544_v7, %v1543_v40  ;;  %v1546_v29 = vld [vmem:[%s3254_s19 + $0x228] sm:$0xff]  ;;  %v1548_v40 = vld [vmem:[%s3254_s19 + $0x238] sm:$0xff] }
 0x158   : > { %v1387_v24 = vmul.f32 %v970_v43, %v3435_v0  ;;  %v1389_v25 = vmul.f32 %v1131_v61, %v3502_v8  ;;  %v972_v30 = vpop.f32.mrb[51].mxu1  ;;  %v1133_v9 = vpop.f32.mrb[51].mxu0  ;;  %1638 = vmatmul.mubr.f32.vlgmr.msra.gmra.mrb[80].mxu0 %v1381_v53  ;;  %1783 = vmatmul.mubr.f32.vlgmr.msra.gmra.mrb[112].mxu1 %v1383_v17  ;;  %v1563_v61 = vld [vmem:[%s3254_s19 + $0x2b0] sm:$0xff]  ;;  %v1564_v8 = vld [vmem:[%s3254_s19 + $0x2b8] sm:$0xff] }
 0x159   : > { %v1388_v14 = vmul.f32 %v972_v30, %v3441_v2  ;;  %v1390_v20 = vmul.f32 %v1133_v9, %v3506_v31  ;;  %2616 = vmatpush3.bf16.msra.mxu0 %v2615_v34  ;;  %v2623_v34 = vpack.c.bf16 %v1546_v29, %v1545_v26  ;;  %v2625_v36 = vpack.c.bf16 %v1564_v8, %v1563_v61  ;;  %v1568_v26 = vld [vmem:[%s3254_s19 + $0x2d8] sm:$0xff] }
 0x15a   : > { %2618 = vmatprep.subr.bf16.mxu0 %v2617_v12  ;;  %v2627_v9 = vpack.c.bf16 %v1548_v40, %v1547_v37 }
 0x15b   : > { %v976_v32 = vpop.f32.mrb[52].mxu1  ;;  %v1137_v0 = vpop.f32.mrb[52].mxu0  ;;  %1642 = vmatprep.mubr.f32.mxu0 %v1388_v14  ;;  %1787 = vmatprep.mubr.f32.mxu1 %v1390_v20  ;;  %v1549_v20 = vld [vmem:[%s3254_s19 + $0x240] sm:$0xff] }
 0x15c   : > { %v1393_v17 = vmul.f32 %v976_v32, %v3446_v54  ;;  %v1395_v2 = vmul.f32 %v1137_v0, %v3510_v33  ;;  %v978_v53 = vpop.f32.mrb[53].mxu1  ;;  %v1139_v31 = vpop.f32.mrb[53].mxu0  ;;  %1643 = vmatmul.mubr.f32.gmra.mrb[82].mxu0 %v1387_v24  ;;  %1788 = vmatmul.mubr.f32.gmra.mrb[114].mxu1 %v1389_v25  ;;  %v1565_v33 = vld [vmem:[%s3254_s19 + $0x2c0] sm:$0xff] }
 0x15d   : > { %v1394_v7 = vmul.f32 %v978_v53, %v3452_v5  ;;  %v1396_v12 = vmul.f32 %v1139_v31, %v3514_v35  ;;  %2620 = vmatpush3.bf16.msra.mxu0 %v2619_v15  ;;  %v2629_v14 = vpack.c.bf16 %v1566_v45, %v1565_v33  ;;  %v1550_v15 = vld [vmem:[%s3254_s19 + $0x248] sm:$0xff]  ;;  %v1552_v53 = vld [vmem:[%s3254_s19 + $0x258] sm:$0xff] }
 0x15e   : > { %2622 = vmatprep.subr.bf16.mxu0 %v2621_v22  ;;  %v2631_v8 = vpack.c.bf16 %v1550_v15, %v1549_v20  ;;  %v1554_v33 = vld [vmem:[%s3254_s19 + $0x268] sm:$0xff]  ;;  %v1556_v20 = vld [vmem:[%s3254_s19 + $0x278] sm:$0xff] }
 0x15f   : > { %v982_v43 = vpop.f32.mrb[54].mxu1  ;;  %v1143_v54 = vpop.f32.mrb[54].mxu0  ;;  %1647 = vmatprep.mubr.f32.mxu0 %v1394_v7  ;;  %1792 = vmatprep.mubr.f32.mxu1 %v1396_v12  ;;  %v1570_v7 = vld [vmem:[%s3254_s19 + $0x2e8] sm:$0xff] }
 0x160   : > { %v1399_v59 = vmul.f32 %v982_v43, %v3456_v10  ;;  %v1401_v5 = vmul.f32 %v1143_v54, %v3518_v27  ;;  %v984_v24 = vpop.f32.mrb[55].mxu1  ;;  %v1145_v35 = vpop.f32.mrb[55].mxu0  ;;  %1648 = vmatmul.mubr.f32.gmra.mrb[84].mxu0 %v1393_v17  ;;  %1793 = vmatmul.mubr.f32.gmra.mrb[116].mxu1 %v1395_v2  ;;  %v1567_v27 = vld [vmem:[%s3254_s19 + $0x2d0] sm:$0xff]  ;;  %v1553_v54 = vld [vmem:[%s3254_s19 + $0x260] sm:$0xff] }
 0x161   : > { %v1400_v25 = vmul.f32 %v984_v24, %v3460_v11  ;;  %v1402_v30 = vmul.f32 %v1145_v35, %v3522_v39  ;;  %2624 = vmatpush3.bf16.msra.mxu0 %v2623_v34  ;;  %v2633_v17 = vpack.c.bf16 %v1568_v26, %v1567_v27  ;;  %v1551_v2 = vld [vmem:[%s3254_s19 + $0x250] sm:$0xff] }
 0x162   : > { %2626 = vmatprep.subr.bf16.mxu0 %v2625_v36  ;;  %v2635_v40 = vpack.c.bf16 %v1552_v53, %v1551_v2 }
 0x163   : > { %v988_v22 = vpop.f32.mrb[56].mxu1  ;;  %v1149_v10 = vpop.f32.mrb[56].mxu0  ;;  %1652 = vmatprep.mubr.f32.mxu0 %v1400_v25  ;;  %1797 = vmatprep.mubr.f32.mxu1 %v1402_v30  ;;  %v2639_v30 = vpack.c.bf16 %v1554_v33, %v1553_v54  ;;  %v3909_v33 = vld [vmem:[#allocation37_spill] sm:$0xff] }
 0x164   : > { %v1405_v29 = vmul.f32 %v988_v22, %v3464_v48  ;;  %v1407_v11 = vmul.f32 %v1149_v10, %v3526_v41  ;;  %v990_v32 = vpop.f32.mrb[57].mxu1  ;;  %v1151_v39 = vpop.f32.mrb[57].mxu0  ;;  %1653 = vmatmul.mubr.f32.gmra.mrb[86].mxu0 %v1399_v59  ;;  %1798 = vmatmul.mubr.f32.gmra.mrb[118].mxu1 %v1401_v5  ;;  %v1569_v41 = vld [vmem:[%s3254_s19 + $0x2e0] sm:$0xff]  ;;  %v1572_v59 = vld [vmem:[%s3254_s19 + $0x2f8] sm:$0xff] }
 0x165   : > { %v1406_v0 = vmul.f32 %v990_v32, %v3468_v13  ;;  %v1408_v61 = vmul.f32 %v1151_v39, %v3530_v44  ;;  %2628 = vmatpush3.bf16.msra.mxu0 %v2627_v9  ;;  %v2637_v43 = vpack.c.bf16 %v1570_v7, %v1569_v41 }
 0x166   : > { %2630 = vmatprep.subr.bf16.mxu0 %v2629_v14  ;;  %v1555_v14 = vld [vmem:[%s3254_s19 + $0x270] sm:$0xff] }
 0x167   : > { %v994_v31 = vpop.f32.mrb[58].mxu1  ;;  %v1155_v48 = vpop.f32.mrb[58].mxu0  ;;  %1657 = vmatprep.mubr.f32.mxu0 %v1406_v0  ;;  %1802 = vmatprep.mubr.f32.mxu1 %v1408_v61  ;;  %v2643_v26 = vpack.c.bf16 %v1556_v20, %v1555_v14 }
 0x168   : > { %v1411_v12 = vmul.f32 %v994_v31, %v3472_v1  ;;  %v1413_v13 = vmul.f32 %v1155_v48, %v3534_v46  ;;  %v996_v34 = vpop.f32.mrb[59].mxu1  ;;  %v1157_v44 = vpop.f32.mrb[59].mxu0  ;;  %1658 = vmatmul.mubr.f32.gmra.mrb[88].mxu0 %v1405_v29  ;;  %1803 = vmatmul.mubr.f32.gmra.mrb[120].mxu1 %v1407_v11  ;;  %v1571_v46 = vld [vmem:[%s3254_s19 + $0x2f0] sm:$0xff] }
 0x169   : > { %v1412_v36 = vmul.f32 %v996_v34, %v3476_v16  ;;  %v1414_v37 = vmul.f32 %v1157_v44, %v3538_v38  ;;  %2632 = vmatpush3.bf16.msra.mxu0 %v2631_v8  ;;  %v2641_v9 = vpack.c.bf16 %v1572_v59, %v1571_v46  ;;  %v3910_v46 = vld [vmem:[#allocation4_spill] sm:$0xff] }
 0x16a   : > { %2634 = vmatprep.subr.bf16.mxu0 %v2633_v17 }
 0x16b   : > { %v1000_v45 = vpop.f32.mrb[60].mxu1  ;;  %v1161_v1 = vpop.f32.mrb[60].mxu0  ;;  %1662 = vmatprep.mubr.f32.mxu0 %v1412_v36  ;;  %1807 = vmatprep.mubr.f32.mxu1 %v1414_v37  ;;  %v3907_v37 = vld [vmem:[#allocation35_spill] sm:$0xff] }
 0x16c   : > { %v1417_v5 = vmul.f32 %v1000_v45, %v3480_v18  ;;  %v1419_v16 = vmul.f32 %v1161_v1, %v3542_v51  ;;  %v1002_v24 = vpop.f32.mrb[61].mxu1  ;;  %v1163_v38 = vpop.f32.mrb[61].mxu0  ;;  %1663 = vmatmul.mubr.f32.gmra.mrb[90].mxu0 %v1411_v12  ;;  %1808 = vmatmul.mubr.f32.gmra.mrb[122].mxu1 %v1413_v13  ;;  %v3905_v13 = vld [vmem:[#allocation33_spill] sm:$0xff] }
 0x16d   : > { %v1418_v35 = vmul.f32 %v1002_v24, %v3484_v19  ;;  %v1420_v25 = vmul.f32 %v1163_v38, %v3546_v56  ;;  %2636 = vmatpush3.bf16.msra.mxu0 %v2635_v40 }
 0x16e   : > { %2638 = vmatprep.subr.bf16.mxu0 %v2637_v43 }
 0x16f   : > { %v1006_v15 = vpop.f32.mrb[62].mxu1  ;;  %v1167_v22 = vpop.f32.mrb[62].mxu0  ;;  %1667 = vmatprep.mubr.f32.mxu0 %v1418_v35  ;;  %1812 = vmatprep.mubr.f32.mxu1 %v1420_v25  ;;  %v3912_v35 = vld [vmem:[#allocation5_spill] sm:$0xff] }
 0x170   : > { %v1423_v18 = vmul.f32 %v1006_v15, %v3488_v21  ;;  %v1425_v51 = vmul.f32 %v1167_v22, %v3550_v58  ;;  %v1008_v10 = vpop.f32.mrb[63].mxu1  ;;  %v1169_v27 = vpop.f32.mrb[63].mxu0  ;;  %1668 = vmatmul.mubr.f32.gmra.mrb[92].mxu0 %v1417_v5  ;;  %1813 = vmatmul.mubr.f32.gmra.mrb[124].mxu1 %v1419_v16  ;;  %v3911_v5 = vld [vmem:[#allocation39_spill] sm:$0xff]  ;;  %v3914_v15 = vld [vmem:[#allocation6_spill] sm:$0xff] }
 0x171   : > { %v1424_v19 = vmul.f32 %v1008_v10, %v3492_v23  ;;  %v1426_v56 = vmul.f32 %v1169_v27, %v3554_v63  ;;  %2640 = vmatpush3.bf16.msra.mxu0 %v2639_v30  ;;  %v3913_v30 = vld [vmem:[#allocation41_spill] sm:$0xff] }
 0x172   : > { %2642 = vmatprep.subr.bf16.mxu0 %v2641_v9 }
 0x173   : > { %v1012_v29 = vpop.f32.mrb[64].mxu1  ;;  %v1173_v11 = vpop.f32.mrb[64].mxu0  ;;  %1672 = vmatprep.mubr.f32.mxu0 %v1424_v19  ;;  %1817 = vmatprep.mubr.f32.mxu1 %v1426_v56  ;;  %v3916_v19 = vld [vmem:[#allocation7_spill] sm:$0xff] }
 0x174   : > { %v1429_v32 = vmul.f32 %v1012_v29, %v3422_v49  ;;  %v1431_v21 = vmul.f32 %v1173_v11, %v3558_v47  ;;  %v1014_v58 = vpop.f32.mrb[65].mxu1  ;;  %v1175_v39 = vpop.f32.mrb[65].mxu0  ;;  %1673 = vmatmul.mubr.f32.gmra.mrb[94].mxu0 %v1423_v18  ;;  %1818 = vmatmul.mubr.f32.gmra.mrb[126].mxu1 %v1425_v51  ;;  %v3915_v18 = vld [vmem:[#allocation43_spill] sm:$0xff] }
 0x175   : > { %v1430_v0 = vmul.f32 %v1014_v58, %v3426_v60  ;;  %v1432_v23 = vmul.f32 %v1175_v39, %v3562_v50  ;;  %2644 = vmatpush3.bf16.msra.mxu0 %v2643_v26  ;;  %v3917_v26 = vld [vmem:[#allocation45_spill] sm:$0xff]  ;;  %v3919_v39 = vld [vmem:[#allocation47_spill] sm:$0xff] }
 0x177   : > { %v1018_v63 = vpop.f32.mrb[66].mxu1  ;;  %v1179_v61 = vpop.f32.mrb[66].mxu0  ;;  %1677 = vmatprep.mubr.f32.mxu0 %v1430_v0  ;;  %1822 = vmatprep.mubr.f32.mxu1 %v1432_v23 }
 0x178   : > { %v1435_v8 = vmul.f32 %v1018_v63, %v3433_v28  ;;  %v1437_v17 = vmul.f32 %v1179_v61, %v3566_v55  ;;  %v1020_v49 = vpop.f32.mrb[67].mxu1  ;;  %v1181_v2 = vpop.f32.mrb[67].mxu0  ;;  %1678 = vmatmul.mubr.f32.gmra.mrb[96].mxu0 %v1429_v32  ;;  %1823 = vmatmul.mubr.f32.gmra.mrb[128].mxu1 %v1431_v21  ;;  %v3918_v21 = vld [vmem:[#allocation8_spill] sm:$0xff]  ;;  %v3920_v61 = vld [vmem:[#allocation9_spill] sm:$0xff] }
 0x179   : > { %v1436_v47 = vmul.f32 %v1020_v49, %v3437_v42  ;;  %v1438_v53 = vmul.f32 %v1181_v2, %v3570_v57 }
 0x17b   : > { %v1024_v60 = vpop.f32.mrb[68].mxu1  ;;  %v1185_v31 = vpop.f32.mrb[68].mxu0  ;;  %1682 = vmatprep.mubr.f32.mxu0 %v1436_v47  ;;  %1827 = vmatprep.mubr.f32.mxu1 %v1438_v53  ;;  %v3922_v53 = vld [vmem:[#allocation10_spill] sm:$0xff] }
 0x17c   : > { %v1441_v50 = vmul.f32 %v1024_v60, %v3444_v3  ;;  %v1443_v48 = vmul.f32 %v1185_v31, %v3574_v62  ;;  %v1026_v41 = vpop.f32.mrb[69].mxu1  ;;  %v1187_v28 = vpop.f32.mrb[69].mxu0  ;;  %1683 = vmatmul.mubr.f32.gmra.mrb[98].mxu0 %v1435_v8  ;;  %1828 = vmatmul.mubr.f32.gmra.mrb[130].mxu1 %v1437_v17  ;;  %v3906_v62 = vld [vmem:[#allocation2_spill] sm:$0xff]  ;;  %v3921_v17 = vld [vmem:[#allocation49_spill] sm:$0xff]  ;;  %v3923_v31 = vld [vmem:[#allocation51_spill] sm:$0xff] }
 0x17d   : > { %v1442_v55 = vmul.f32 %v1026_v41, %v3448_v4  ;;  %v1444_v7 = vmul.f32 %v1187_v28, %v3578_v52  ;;  %v3908_v52 = vld [vmem:[#allocation3_spill] sm:$0xff] }
 0x17e   : > { %v3924_v41 = vld [vmem:[#allocation11_spill] sm:$0xff] }
 0x17f   : > { %v1030_v12 = vpop.f32.mrb[70].mxu1  ;;  %v1191_v42 = vpop.f32.mrb[70].mxu0  ;;  %1687 = vmatprep.mubr.f32.mxu0 %v1442_v55  ;;  %1832 = vmatprep.mubr.f32.mxu1 %v1444_v7  ;;  %v3925_v7 = vld [vmem:[#allocation12_spill] sm:$0xff] }
 0x180   : > { %v1447_v57 = vmul.f32 %v1030_v12, %v3454_v6  ;;  %v1449_v34 = vmul.f32 %v1191_v42, %v3905_v13  ;;  %v1032_v44 = vpop.f32.mrb[71].mxu1  ;;  %v1193_v3 = vpop.f32.mrb[71].mxu0  ;;  %1688 = vmatmul.mubr.f32.gmra.mrb[100].mxu0 %v1441_v50  ;;  %1833 = vmatmul.mubr.f32.gmra.mrb[132].mxu1 %v1443_v48 }
 0x181   : > { %v1448_v36 = vmul.f32 %v1032_v44, %v3906_v62  ;;  %v1450_v40 = vmul.f32 %v1193_v3, %v3907_v37  ;;  %v3927_v44 = vld [vmem:[#allocation14_spill] sm:$0xff] }
 0x183   : > { %v1036_v43 = vpop.f32.mrb[72].mxu1  ;;  %v1197_v4 = vpop.f32.mrb[72].mxu0  ;;  %1692 = vmatprep.mubr.f32.mxu0 %v1448_v36  ;;  %1837 = vmatprep.mubr.f32.mxu1 %v1450_v40  ;;  %v3928_v36 = vld [vmem:[#allocation15_spill] sm:$0xff] }
 0x184   : > { %v1453_v54 = vmul.f32 %v1036_v43, %v3908_v52  ;;  %v1455_v45 = vmul.f32 %v1197_v4, %v3909_v33  ;;  %v1038_v1 = vpop.f32.mrb[73].mxu1  ;;  %v1199_v6 = vpop.f32.mrb[73].mxu0  ;;  %1693 = vmatmul.mubr.f32.gmra.mrb[102].mxu0 %v1447_v57  ;;  %1838 = vmatmul.mubr.f32.gmra.mrb[134].mxu1 %v1449_v34  ;;  %v3926_v57 = vld [vmem:[#allocation13_spill] sm:$0xff]  ;;  %v3929_v43 = vld [vmem:[#allocation16_spill] sm:$0xff] }
 0x185   : > { %v1454_v59 = vmul.f32 %v1038_v1, %v3910_v46  ;;  %v1456_v16 = vmul.f32 %v1199_v6, %v3911_v5  ;;  %v3931_v1 = vld [vmem:[#allocation18_spill] sm:$0xff] }
 0x187   : > { %v1042_v24 = vpop.f32.mrb[74].mxu1  ;;  %v1203_v38 = vpop.f32.mrb[74].mxu0  ;;  %1697 = vmatprep.mubr.f32.mxu0 %v1454_v59  ;;  %1842 = vmatprep.mubr.f32.mxu1 %v1456_v16  ;;  %v3932_v59 = vld [vmem:[#allocation19_spill] sm:$0xff] }
 0x188   : > { %v1459_v25 = vmul.f32 %v1042_v24, %v3912_v35  ;;  %v1461_v9 = vmul.f32 %v1203_v38, %v3913_v30  ;;  %v1044_v14 = vpop.f32.mrb[75].mxu1  ;;  %v1205_v20 = vpop.f32.mrb[75].mxu0  ;;  %1698 = vmatmul.mubr.f32.gmra.mrb[104].mxu0 %v1453_v54  ;;  %1843 = vmatmul.mubr.f32.gmra.mrb[136].mxu1 %v1455_v45  ;;  %v3930_v54 = vld [vmem:[#allocation17_spill] sm:$0xff]  ;;  %v3933_v24 = vld [vmem:[#allocation20_spill] sm:$0xff] }
 0x189   : > { %v1460_v22 = vmul.f32 %v1044_v14, %v3914_v15  ;;  %v1462_v51 = vmul.f32 %v1205_v20, %v3915_v18  ;;  %v3935_v14 = vld [vmem:[#allocation22_spill] sm:$0xff] }
 0x18b   : > { %v1048_v10 = vpop.f32.mrb[76].mxu1  ;;  %v1209_v27 = vpop.f32.mrb[76].mxu0  ;;  %1702 = vmatprep.mubr.f32.mxu0 %v1460_v22  ;;  %1847 = vmatprep.mubr.f32.mxu1 %v1462_v51  ;;  %v3936_v22 = vld [vmem:[#allocation23_spill] sm:$0xff] }
 0x18c   : > { %v1465_v56 = vmul.f32 %v1048_v10, %v3916_v19  ;;  %v1467_v29 = vmul.f32 %v1209_v27, %v3917_v26  ;;  %v1050_v11 = vpop.f32.mrb[77].mxu1  ;;  %v1211_v32 = vpop.f32.mrb[77].mxu0  ;;  %1703 = vmatmul.mubr.f32.gmra.mrb[106].mxu0 %v1459_v25  ;;  %1848 = vmatmul.mubr.f32.gmra.mrb[138].mxu1 %v1461_v9  ;;  %v3934_v25 = vld [vmem:[#allocation21_spill] sm:$0xff]  ;;  %v3937_v10 = vld [vmem:[#allocation24_spill] sm:$0xff] }
 0x18d   : > { %v1466_v58 = vmul.f32 %v1050_v11, %v3918_v21  ;;  %v1468_v0 = vmul.f32 %v1211_v32, %v3919_v39  ;;  %v3939_v11 = vld [vmem:[#allocation26_spill] sm:$0xff] }
 0x18f   : > { %v1054_v23 = vpop.f32.mrb[78].mxu1  ;;  %v1215_v63 = vpop.f32.mrb[78].mxu0  ;;  %1707 = vmatprep.mubr.f32.mxu0 %v1466_v58  ;;  %1852 = vmatprep.mubr.f32.mxu1 %v1468_v0  ;;  %v3940_v58 = vld [vmem:[#allocation27_spill] sm:$0xff] }
 0x190   : > { %v1471_v8 = vmul.f32 %v1054_v23, %v3920_v61  ;;  %v1473_v49 = vmul.f32 %v1215_v63, %v3921_v17  ;;  %v1056_v2 = vpop.f32.mrb[79].mxu1  ;;  %v1217_v47 = vpop.f32.mrb[79].mxu0  ;;  %1708 = vmatmul.mubr.f32.gmra.mrb[108].mxu0 %v1465_v56  ;;  %1853 = vmatmul.mubr.f32.gmra.mrb[140].mxu1 %v1467_v29  ;;  %v3938_v56 = vld [vmem:[#allocation25_spill] sm:$0xff]  ;;  %v3941_v23 = vld [vmem:[#allocation28_spill] sm:$0xff] }
 0x191   : > { %v1472_v60 = vmul.f32 %v1056_v2, %v3922_v53  ;;  %v1474_v50 = vmul.f32 %v1217_v47, %v3923_v31  ;;  %v3943_v2 = vld [vmem:[#allocation30_spill] sm:$0xff] }
 0x193   : > { %v1286_v48 = vpop.f32.mrb[80].mxu1  ;;  %1712 = vmatprep.mubr.f32.mxu0 %v1472_v60  ;;  %1857 = vmatprep.mubr.f32.mxu1 %v1474_v50  ;;  %v3944_v60 = vld [vmem:[#allocation31_spill] sm:$0xff] }
 0x194   : > { %v1385_v28 = vmul.f32 %v1286_v48, %v3924_v41  ;;  %v1288_v55 = vpop.f32.mrb[81].mxu1  ;;  %1713 = vmatmul.mubr.f32.gmra.mrb[110].mxu0 %v1471_v8  ;;  %1858 = vmatmul.mubr.f32.gmra.mrb[142].mxu1 %v1473_v49  ;;  %v3942_v8 = vld [vmem:[#allocation29_spill] sm:$0xff]  ;;  %v3945_v48 = vld [vmem:[#allocation32_spill] sm:$0xff] }
 0x195   : > { %v1386_v12 = vmul.f32 %v1288_v55, %v3925_v7  ;;  %v3946_v55 = vld [vmem:[#allocation34_spill] sm:$0xff] }
 0x197   : > { %v1292_v42 = vpop.f32.mrb[82].mxu1  ;;  %1927 = vmatprep.mubr.f32.mxu0 %v1386_v12 }
 0x198   : > { %v1391_v13 = vmul.f32 %v1292_v42, %v3926_v57  ;;  %v1294_v34 = vpop.f32.mrb[83].mxu1  ;;  %1928 = vmatmul.mubr.f32.vlgmr.msra.gmra.mrb[112].mxu0 %v1385_v28  ;;  %v3947_v42 = vld [vmem:[#allocation36_spill] sm:$0xff] }
 0x199   : > { %v1392_v3 = vmul.f32 %v1294_v34, %v3927_v44  ;;  %v3948_v34 = vld [vmem:[#allocation38_spill] sm:$0xff] }
 0x19b   : > { %v1298_v62 = vpop.f32.mrb[84].mxu1  ;;  %1932 = vmatprep.mubr.f32.mxu0 %v1392_v3 }
 0x19c   : > { %v1397_v37 = vmul.f32 %v1298_v62, %v3928_v36  ;;  %v1300_v40 = vpop.f32.mrb[85].mxu1  ;;  %1933 = vmatmul.mubr.f32.gmra.mrb[114].mxu0 %v1391_v13  ;;  %v3949_v62 = vld [vmem:[#allocation40_spill] sm:$0xff] }
 0x19d   : > { %v1398_v4 = vmul.f32 %v1300_v40, %v3929_v43  ;;  %v3950_v40 = vld [vmem:[#allocation42_spill] sm:$0xff] }
 0x19f   : > { %v1304_v52 = vpop.f32.mrb[86].mxu1  ;;  %1937 = vmatprep.mubr.f32.mxu0 %v1398_v4 }
 0x1a0   : > { %v1403_v33 = vmul.f32 %v1304_v52, %v3930_v54  ;;  %v1306_v45 = vpop.f32.mrb[87].mxu1  ;;  %1938 = vmatmul.mubr.f32.gmra.mrb[116].mxu0 %v1397_v37  ;;  %v3951_v52 = vld [vmem:[#allocation44_spill] sm:$0xff] }
 0x1a1   : > { %v1404_v6 = vmul.f32 %v1306_v45, %v3931_v1  ;;  %v3952_v45 = vld [vmem:[#allocation46_spill] sm:$0xff] }
 0x1a3   : > { %v1310_v46 = vpop.f32.mrb[88].mxu1  ;;  %1942 = vmatprep.mubr.f32.mxu0 %v1404_v6 }
 0x1a4   : > { %v1409_v5 = vmul.f32 %v1310_v46, %v3932_v59  ;;  %v1312_v16 = vpop.f32.mrb[89].mxu1  ;;  %1943 = vmatmul.mubr.f32.gmra.mrb[118].mxu0 %v1403_v33  ;;  %v3953_v46 = vld [vmem:[#allocation48_spill] sm:$0xff] }
 0x1a5   : > { %v1410_v38 = vmul.f32 %v1312_v16, %v3933_v24  ;;  %v3954_v16 = vld [vmem:[#allocation50_spill] sm:$0xff] }
 0x1a7   : > { %v1316_v35 = vpop.f32.mrb[90].mxu1  ;;  %1947 = vmatprep.mubr.f32.mxu0 %v1410_v38 }
 0x1a8   : > { %v1415_v30 = vmul.f32 %v1316_v35, %v3934_v25  ;;  %v1318_v9 = vpop.f32.mrb[91].mxu1  ;;  %1948 = vmatmul.mubr.f32.gmra.mrb[120].mxu0 %v1409_v5  ;;  %v3955_v35 = vld [vmem:[#allocation52_spill] sm:$0xff] }
 0x1a9   : > { %v1416_v20 = vmul.f32 %v1318_v9, %v3935_v14 }
 0x1ab   : > { %v1322_v15 = vpop.f32.mrb[92].mxu1  ;;  %1952 = vmatprep.mubr.f32.mxu0 %v1416_v20 }
 0x1ac   : > { %v1421_v18 = vmul.f32 %v1322_v15, %v3936_v22  ;;  %v1324_v51 = vpop.f32.mrb[93].mxu1  ;;  %1953 = vmatmul.mubr.f32.gmra.mrb[122].mxu0 %v1415_v30 }
 0x1ad   : > { %v1422_v27 = vmul.f32 %v1324_v51, %v3937_v10 }
 0x1af   : > { %v1328_v19 = vpop.f32.mrb[94].mxu1  ;;  %1957 = vmatprep.mubr.f32.mxu0 %v1422_v27 }
 0x1b0   : > { %v1427_v26 = vmul.f32 %v1328_v19, %v3938_v56  ;;  %v1330_v29 = vpop.f32.mrb[95].mxu1  ;;  %1958 = vmatmul.mubr.f32.gmra.mrb[124].mxu0 %v1421_v18 }
 0x1b1   : > { %v1428_v32 = vmul.f32 %v1330_v29, %v3939_v11 }
 0x1b3   : > { %v1334_v21 = vpop.f32.mrb[96].mxu1  ;;  %1962 = vmatprep.mubr.f32.mxu0 %v1428_v32 }
 0x1b4   : > { %v1433_v39 = vmul.f32 %v1334_v21, %v3940_v58  ;;  %v1336_v0 = vpop.f32.mrb[97].mxu1  ;;  %1963 = vmatmul.mubr.f32.gmra.mrb[126].mxu0 %v1427_v26 }
 0x1b5   : > { %v1434_v63 = vmul.f32 %v1336_v0, %v3941_v23 }
 0x1b7   : > { %v1340_v61 = vpop.f32.mrb[98].mxu1  ;;  %1967 = vmatprep.mubr.f32.mxu0 %v1434_v63 }
 0x1b8   : > { %v1439_v17 = vmul.f32 %v1340_v61, %v3942_v8  ;;  %v1342_v49 = vpop.f32.mrb[99].mxu1  ;;  %1968 = vmatmul.mubr.f32.gmra.mrb[128].mxu0 %v1433_v39 }
 0x1b9   : > { %v1440_v47 = vmul.f32 %v1342_v49, %v3943_v2 }
 0x1bb   : > { %v1346_v53 = vpop.f32.mrb[100].mxu1  ;;  %1972 = vmatprep.mubr.f32.mxu0 %v1440_v47 }
 0x1bc   : > { %v1445_v31 = vmul.f32 %v1346_v53, %v3944_v60  ;;  %v1348_v50 = vpop.f32.mrb[101].mxu1  ;;  %1973 = vmatmul.mubr.f32.gmra.mrb[130].mxu0 %v1439_v17 }
 0x1bd   : > { %v1446_v41 = vmul.f32 %v1348_v50, %v3945_v48 }
 0x1bf   : > { %v1352_v28 = vpop.f32.mrb[102].mxu1  ;;  %1977 = vmatprep.mubr.f32.mxu0 %v1446_v41 }
 0x1c0   : > { %v1451_v7 = vmul.f32 %v1352_v28, %v3946_v55  ;;  %v1354_v12 = vpop.f32.mrb[103].mxu1  ;;  %1978 = vmatmul.mubr.f32.gmra.mrb[132].mxu0 %v1445_v31 }
 0x1c1   : > { %v1452_v57 = vmul.f32 %v1354_v12, %v3947_v42 }
 0x1c3   : > { %v1358_v13 = vpop.f32.mrb[104].mxu1  ;;  %1982 = vmatprep.mubr.f32.mxu0 %v1452_v57 }
 0x1c4   : > { %v1457_v44 = vmul.f32 %v1358_v13, %v3948_v34  ;;  %v1360_v3 = vpop.f32.mrb[105].mxu1  ;;  %1983 = vmatmul.mubr.f32.gmra.mrb[134].mxu0 %v1451_v7 }
 0x1c5   : > { %v1458_v36 = vmul.f32 %v1360_v3, %v3949_v62 }
 0x1c7   : > { %v1364_v37 = vpop.f32.mrb[106].mxu1  ;;  %1987 = vmatprep.mubr.f32.mxu0 %v1458_v36 }
 0x1c8   : > { %v1463_v43 = vmul.f32 %v1364_v37, %v3950_v40  ;;  %v1366_v4 = vpop.f32.mrb[107].mxu1  ;;  %1988 = vmatmul.mubr.f32.gmra.mrb[136].mxu0 %v1457_v44 }
 0x1c9   : > { %v1464_v54 = vmul.f32 %v1366_v4, %v3951_v52 }
 0x1cb   : > { %v1370_v33 = vpop.f32.mrb[108].mxu1  ;;  %1992 = vmatprep.mubr.f32.mxu0 %v1464_v54 }
 0x1cc   : > { %v1469_v1 = vmul.f32 %v1370_v33, %v3952_v45  ;;  %v1372_v6 = vpop.f32.mrb[109].mxu1  ;;  %1993 = vmatmul.mubr.f32.gmra.mrb[138].mxu0 %v1463_v43 }
 0x1cd   : > { %v1470_v59 = vmul.f32 %v1372_v6, %v3953_v46 }
 0x1cf   : > { %v1376_v5 = vpop.f32.mrb[110].mxu1  ;;  %1997 = vmatprep.mubr.f32.mxu0 %v1470_v59 }
 0x1d0   : > { %v1475_v24 = vmul.f32 %v1376_v5, %v3954_v16  ;;  %v1378_v38 = vpop.f32.mrb[111].mxu1  ;;  %1998 = vmatmul.mubr.f32.gmra.mrb[140].mxu0 %v1469_v1 }
 0x1d1   : > { %v1476_v25 = vmul.f32 %v1378_v38, %v3955_v35 }
 0x1d3   : > { %2002 = vmatprep.mubr.f32.mxu0 %v1476_v25 }
 0x1d4   : > { %2003 = vmatmul.mubr.f32.gmra.mrb[142].mxu0 %v1475_v24 }
 0x22b   : > { %v2269_v30 = vpop.f32.mrb[80].mxu0  ;;  %v2349_v9 = vpop.f32.mrb[112].mxu1 }
 0x22c   : > { %v2270_v14 = vpop.f32.mrb[81].mxu0  ;;  %v2350_v20 = vpop.f32.mrb[113].mxu1 }
 0x22d   : > { %v2271_v15 = vadd.f32 %v2270_v14, %v2269_v30  ;;  %v2351_v22 = vadd.f32 %v2350_v20, %v2349_v9 }
 0x22f   : > { %v3748_v18 = vadd.f32 %v2351_v22, %v2271_v15  ;;  %v2272_v51 = vpop.f32.mrb[82].mxu0  ;;  %v2352_v10 = vpop.f32.mrb[114].mxu1 }
 0x230   : > { %v2273_v27 = vpop.f32.mrb[83].mxu0  ;;  %v2353_v19 = vpop.f32.mrb[115].mxu1 }
 0x231   : > { %v2274_v56 = vadd.f32 %v2273_v27, %v2272_v51  ;;  %v2354_v26 = vadd.f32 %v2353_v19, %v2352_v10 }
 0x233   : > { %v3750_v29 = vadd.f32 %v2354_v26, %v2274_v56  ;;  %v2275_v11 = vpop.f32.mrb[84].mxu0  ;;  %v2355_v32 = vpop.f32.mrb[116].mxu1 }
 0x234   : > { %v2276_v21 = vpop.f32.mrb[85].mxu0  ;;  %v2356_v58 = vpop.f32.mrb[117].mxu1 }
 0x235   : > { %v2277_v39 = vadd.f32 %v2276_v21, %v2275_v11  ;;  %v2357_v0 = vadd.f32 %v2356_v58, %v2355_v32 }
 0x237   : > { %v3752_v23 = vadd.f32 %v2357_v0, %v2277_v39  ;;  %v2278_v63 = vpop.f32.mrb[86].mxu0  ;;  %v2358_v61 = vpop.f32.mrb[118].mxu1 }
 0x238   : > { %v2279_v8 = vpop.f32.mrb[87].mxu0  ;;  %v2359_v17 = vpop.f32.mrb[119].mxu1 }
 0x239   : > { %v2280_v49 = vadd.f32 %v2279_v8, %v2278_v63  ;;  %v2360_v2 = vadd.f32 %v2359_v17, %v2358_v61 }
 0x23b   : > { %v3754_v47 = vadd.f32 %v2360_v2, %v2280_v49  ;;  %v2281_v53 = vpop.f32.mrb[88].mxu0  ;;  %v2361_v60 = vpop.f32.mrb[120].mxu1 }
 0x23c   : > { %v2282_v31 = vpop.f32.mrb[89].mxu0  ;;  %v2362_v50 = vpop.f32.mrb[121].mxu1 }
 0x23d   : > { %v2283_v48 = vadd.f32 %v2282_v31, %v2281_v53  ;;  %v2363_v41 = vadd.f32 %v2362_v50, %v2361_v60 }
 0x23f   : > { %v3756_v28 = vadd.f32 %v2363_v41, %v2283_v48  ;;  %v2284_v55 = vpop.f32.mrb[90].mxu0  ;;  %v2364_v7 = vpop.f32.mrb[122].mxu1 }
 0x240   : > { %v2285_v12 = vpop.f32.mrb[91].mxu0  ;;  %v2365_v42 = vpop.f32.mrb[123].mxu1 }
 0x241   : > { %v2286_v57 = vadd.f32 %v2285_v12, %v2284_v55  ;;  %v2366_v13 = vadd.f32 %v2365_v42, %v2364_v7 }
 0x243   : > { %v3758_v34 = vadd.f32 %v2366_v13, %v2286_v57  ;;  %v2287_v44 = vpop.f32.mrb[92].mxu0  ;;  %v2367_v3 = vpop.f32.mrb[124].mxu1 }
 0x244   : > { %v2288_v62 = vpop.f32.mrb[93].mxu0  ;;  %v2368_v36 = vpop.f32.mrb[125].mxu1 }
 0x245   : > { %v2289_v37 = vadd.f32 %v2288_v62, %v2287_v44  ;;  %v2369_v40 = vadd.f32 %v2368_v36, %v2367_v3 }
 0x247   : > { %v3760_v43 = vadd.f32 %v2369_v40, %v2289_v37  ;;  %v2290_v4 = vpop.f32.mrb[94].mxu0  ;;  %v2370_v52 = vpop.f32.mrb[126].mxu1 }
 0x248   : > { %v2291_v54 = vpop.f32.mrb[95].mxu0  ;;  %v2371_v33 = vpop.f32.mrb[127].mxu1 }
 0x249   : > { %v2292_v45 = vadd.f32 %v2291_v54, %v2290_v4  ;;  %v2372_v1 = vadd.f32 %v2371_v33, %v2370_v52 }
 0x24b   : > { %v3762_v6 = vadd.f32 %v2372_v1, %v2292_v45  ;;  %v2293_v46 = vpop.f32.mrb[96].mxu0  ;;  %v2373_v59 = vpop.f32.mrb[128].mxu1 }
 0x24c   : > { %v2294_v5 = vpop.f32.mrb[97].mxu0  ;;  %v2374_v16 = vpop.f32.mrb[129].mxu1 }
 0x24d   : > { %v2295_v24 = vadd.f32 %v2294_v5, %v2293_v46  ;;  %v2375_v38 = vadd.f32 %v2374_v16, %v2373_v59 }
 0x24f   : > { %v3764_v35 = vadd.f32 %v2375_v38, %v2295_v24  ;;  %v2296_v25 = vpop.f32.mrb[98].mxu0  ;;  %v2376_v30 = vpop.f32.mrb[130].mxu1 }
 0x250   : > { %v2297_v9 = vpop.f32.mrb[99].mxu0  ;;  %v2377_v14 = vpop.f32.mrb[131].mxu1 }
 0x251   : > { %v2298_v20 = vadd.f32 %v2297_v9, %v2296_v25  ;;  %v2378_v15 = vadd.f32 %v2377_v14, %v2376_v30 }
 0x253   : > { %v3766_v22 = vadd.f32 %v2378_v15, %v2298_v20  ;;  %v2299_v51 = vpop.f32.mrb[100].mxu0  ;;  %v2379_v10 = vpop.f32.mrb[132].mxu1 }
 0x254   : > { %v2300_v27 = vpop.f32.mrb[101].mxu0  ;;  %v2380_v19 = vpop.f32.mrb[133].mxu1 }
 0x255   : > { %v2301_v56 = vadd.f32 %v2300_v27, %v2299_v51  ;;  %v2381_v26 = vadd.f32 %v2380_v19, %v2379_v10 }
 0x257   : > { %v3768_v11 = vadd.f32 %v2381_v26, %v2301_v56  ;;  %v2302_v32 = vpop.f32.mrb[102].mxu0  ;;  %v2382_v21 = vpop.f32.mrb[134].mxu1 }
 0x258   : > { %v2303_v58 = vpop.f32.mrb[103].mxu0  ;;  %v2383_v39 = vpop.f32.mrb[135].mxu1 }
 0x259   : > { %v2304_v0 = vadd.f32 %v2303_v58, %v2302_v32  ;;  %v2384_v63 = vadd.f32 %v2383_v39, %v2382_v21 }
 0x25b   : > { %v3770_v61 = vadd.f32 %v2384_v63, %v2304_v0  ;;  %v2305_v8 = vpop.f32.mrb[104].mxu0  ;;  %v2385_v17 = vpop.f32.mrb[136].mxu1 }
 0x25c   : > { %v2306_v49 = vpop.f32.mrb[105].mxu0  ;;  %v2386_v2 = vpop.f32.mrb[137].mxu1 }
 0x25d   : > { %v2307_v53 = vadd.f32 %v2306_v49, %v2305_v8  ;;  %v2387_v60 = vadd.f32 %v2386_v2, %v2385_v17 }
 0x25f   : > { %v3772_v31 = vadd.f32 %v2387_v60, %v2307_v53  ;;  %v2308_v50 = vpop.f32.mrb[106].mxu0  ;;  %v2388_v48 = vpop.f32.mrb[138].mxu1 }
 0x260   : > { %v2309_v41 = vpop.f32.mrb[107].mxu0  ;;  %v2389_v55 = vpop.f32.mrb[139].mxu1 }
 0x261   : > { %v2310_v7 = vadd.f32 %v2309_v41, %v2308_v50  ;;  %v2390_v12 = vadd.f32 %v2389_v55, %v2388_v48 }
 0x263   : > { %v3774_v42 = vadd.f32 %v2390_v12, %v2310_v7  ;;  %v2311_v57 = vpop.f32.mrb[108].mxu0  ;;  %v2391_v13 = vpop.f32.mrb[140].mxu1 }
 0x264   : > { %v2312_v44 = vpop.f32.mrb[109].mxu0  ;;  %v2392_v3 = vpop.f32.mrb[141].mxu1 }
 0x265   : > { %v2313_v62 = vadd.f32 %v2312_v44, %v2311_v57  ;;  %v2393_v36 = vadd.f32 %v2392_v3, %v2391_v13 }
 0x267   : > { %v3776_v37 = vadd.f32 %v2393_v36, %v2313_v62  ;;  %v2314_v40 = vpop.f32.mrb[110].mxu0  ;;  %v2394_v4 = vpop.f32.mrb[142].mxu1 }
 0x268   : > { %v2315_v52 = vpop.f32.mrb[111].mxu0  ;;  %v2395_v54 = vpop.f32.mrb[143].mxu1 }
 0x269   : > { %v2316_v33 = vadd.f32 %v2315_v52, %v2314_v40  ;;  %v2396_v45 = vadd.f32 %v2395_v54, %v2394_v4 }
 0x26b   : > { %v3778_v1 = vadd.f32 %v2396_v45, %v2316_v33  ;;  %v2429_v46 = vpop.f32.mrb[112].mxu0 }
 0x26c   : > { %v2430_v59 = vpop.f32.mrb[113].mxu0 }
 0x26d   : > { %v2431_v5 = vadd.f32 %v2430_v59, %v2429_v46 }
 0x26f   : > { %v1930_v16 = vadd.f32 %v2431_v5, %v3748_v18  ;;  %v2432_v24 = vpop.f32.mrb[114].mxu0 }
 0x270   : > { %v2433_v38 = vpop.f32.mrb[115].mxu0 }
 0x271   : > { %2009 = vst.msk [vmem:[%s3785_s21] sm:$0xff] %vm2008_vm1, %v1930_v16  ;;  %v2434_v25 = vadd.f32 %v2433_v38, %v2432_v24 }
 0x273   : > { %v1935_v30 = vadd.f32 %v2434_v25, %v3750_v29  ;;  %v2435_v9 = vpop.f32.mrb[116].mxu0 }
 0x274   : > { %v2436_v14 = vpop.f32.mrb[117].mxu0 }
 0x275   : > { %2010 = vst.msk [vmem:[%s3785_s21 + $0x8] sm:$0xff] %vm2008_vm1, %v1935_v30  ;;  %v2437_v20 = vadd.f32 %v2436_v14, %v2435_v9 }
 0x277   : > { %v1940_v15 = vadd.f32 %v2437_v20, %v3752_v23  ;;  %v2438_v51 = vpop.f32.mrb[118].mxu0 }
 0x278   : > { %v2439_v10 = vpop.f32.mrb[119].mxu0 }
 0x279   : > { %2011 = vst.msk [vmem:[%s3785_s21 + $0x10] sm:$0xff] %vm2008_vm1, %v1940_v15  ;;  %v2440_v18 = vadd.f32 %v2439_v10, %v2438_v51 }
 0x27b   : > { %v1945_v27 = vadd.f32 %v2440_v18, %v3754_v47  ;;  %v2441_v19 = vpop.f32.mrb[120].mxu0 }
 0x27c   : > { %v2442_v56 = vpop.f32.mrb[121].mxu0 }
 0x27d   : > { %2012 = vst.msk [vmem:[%s3785_s21 + $0x18] sm:$0xff] %vm2008_vm1, %v1945_v27  ;;  %v2443_v29 = vadd.f32 %v2442_v56, %v2441_v19 }
 0x27f   : > { %v1950_v26 = vadd.f32 %v2443_v29, %v3756_v28  ;;  %v2444_v32 = vpop.f32.mrb[122].mxu0 }
 0x280   : > { %v2445_v21 = vpop.f32.mrb[123].mxu0 }
 0x281   : > { %2013 = vst.msk [vmem:[%s3785_s21 + $0x20] sm:$0xff] %vm2008_vm1, %v1950_v26  ;;  %v2446_v23 = vadd.f32 %v2445_v21, %v2444_v32 }
 0x283   : > { %v1955_v58 = vadd.f32 %v2446_v23, %v3758_v34  ;;  %v2447_v39 = vpop.f32.mrb[124].mxu0 }
 0x284   : > { %v2448_v0 = vpop.f32.mrb[125].mxu0 }
 0x285   : > { %2014 = vst.msk [vmem:[%s3785_s21 + $0x28] sm:$0xff] %vm2008_vm1, %v1955_v58  ;;  %v2449_v47 = vadd.f32 %v2448_v0, %v2447_v39 }
 0x287   : > { %v1960_v63 = vadd.f32 %v2449_v47, %v3760_v43  ;;  %v2450_v8 = vpop.f32.mrb[126].mxu0 }
 0x288   : > { %v2451_v17 = vpop.f32.mrb[127].mxu0 }
 0x289   : > { %2015 = vst.msk [vmem:[%s3785_s21 + $0x30] sm:$0xff] %vm2008_vm1, %v1960_v63  ;;  %v2452_v28 = vadd.f32 %v2451_v17, %v2450_v8 }
 0x28b   : > { %v1965_v49 = vadd.f32 %v2452_v28, %v3762_v6  ;;  %v2453_v2 = vpop.f32.mrb[128].mxu0 }
 0x28c   : > { %v2454_v53 = vpop.f32.mrb[129].mxu0 }
 0x28d   : > { %2016 = vst.msk [vmem:[%s3785_s21 + $0x38] sm:$0xff] %vm2008_vm1, %v1965_v49  ;;  %v2455_v34 = vadd.f32 %v2454_v53, %v2453_v2 }
 0x28f   : > { %v1970_v60 = vadd.f32 %v2455_v34, %v3764_v35  ;;  %v2456_v50 = vpop.f32.mrb[130].mxu0 }
 0x290   : > { %v2457_v48 = vpop.f32.mrb[131].mxu0 }
 0x291   : > { %2017 = vst.msk [vmem:[%s3785_s21 + $0x40] sm:$0xff] %vm2008_vm1, %v1970_v60  ;;  %v2458_v43 = vadd.f32 %v2457_v48, %v2456_v50 }
 0x293   : > { %v1975_v41 = vadd.f32 %v2458_v43, %v3766_v22  ;;  %v2459_v55 = vpop.f32.mrb[132].mxu0 }
 0x294   : > { %v2460_v7 = vpop.f32.mrb[133].mxu0 }
 0x295   : > { %2018 = vst.msk [vmem:[%s3785_s21 + $0x48] sm:$0xff] %vm2008_vm1, %v1975_v41  ;;  %v2461_v6 = vadd.f32 %v2460_v7, %v2459_v55 }
 0x297   : > { %v1980_v12 = vadd.f32 %v2461_v6, %v3768_v11  ;;  %v2462_v57 = vpop.f32.mrb[134].mxu0 }
 0x298   : > { %v2463_v13 = vpop.f32.mrb[135].mxu0 }
 0x299   : > { %2019 = vst.msk [vmem:[%s3785_s21 + $0x50] sm:$0xff] %vm2008_vm1, %v1980_v12  ;;  %v2464_v35 = vadd.f32 %v2463_v13, %v2462_v57 }
 0x29b   : > { %v1985_v44 = vadd.f32 %v2464_v35, %v3770_v61  ;;  %v2465_v3 = vpop.f32.mrb[136].mxu0 }
 0x29c   : > { %v2466_v62 = vpop.f32.mrb[137].mxu0 }
 0x29d   : > { %2020 = vst.msk [vmem:[%s3785_s21 + $0x58] sm:$0xff] %vm2008_vm1, %v1985_v44  ;;  %v2467_v22 = vadd.f32 %v2466_v62, %v2465_v3 }
 0x29f   : > { %v1990_v36 = vadd.f32 %v2467_v22, %v3772_v31  ;;  %v2468_v40 = vpop.f32.mrb[138].mxu0 }
 0x2a0   : > { %v2469_v4 = vpop.f32.mrb[139].mxu0 }
 0x2a1   : > { %2021 = vst.msk [vmem:[%s3785_s21 + $0x60] sm:$0xff] %vm2008_vm1, %v1990_v36  ;;  %v2470_v11 = vadd.f32 %v2469_v4, %v2468_v40 }
 0x2a3   : > { %v1995_v52 = vadd.f32 %v2470_v11, %v3774_v42  ;;  %v2471_v54 = vpop.f32.mrb[140].mxu0 }
 0x2a4   : > { %v2472_v33 = vpop.f32.mrb[141].mxu0 }
 0x2a5   : > { %2022 = vst.msk [vmem:[%s3785_s21 + $0x68] sm:$0xff] %vm2008_vm1, %v1995_v52  ;;  %v2473_v61 = vadd.f32 %v2472_v33, %v2471_v54 }
 0x2a7   : > { %v2000_v45 = vadd.f32 %v2473_v61, %v3776_v37  ;;  %v2474_v46 = vpop.f32.mrb[142].mxu0 }
 0x2a8   : > { %v2475_v59 = vpop.f32.mrb[143].mxu0 }
 0x2a9   : > { %2023 = vst.msk [vmem:[%s3785_s21 + $0x70] sm:$0xff] %vm2008_vm1, %v2000_v45  ;;  %v2476_v31 = vadd.f32 %v2475_v59, %v2474_v46 }
 0x2ab   : > { %v2005_v5 = vadd.f32 %v2476_v31, %v3778_v1 }
 0x2ad   : > { %2024 = vst.msk [vmem:[%s3785_s21 + $0x78] sm:$0xff] %vm2008_vm1, %v2005_v5 }
 0x2ae PF: > { %s13_s16 = sadd.s32 1, %s2731_s16   ;;  %s3956_s12 = smov %s2723_s14 }
 0x2af   : > { %p10_p7 = scmp.ge.s32.totalorder %s13_s16, 6   ;;  %s3957_s13 = smov %s2727_s15 }
 0x2b0   : > { %s3958_s14 = smov %s3961_s17  ;;  %s3959_s15 = smov %s3965_s18 }
 0x2b1   :  { %12 = sbr.rel (!%p10_p7) target bundleno = 3 (0x3), region = 65 }

// kernel: forward.7
= control target key start
LH: loop header
LB: loop body
LE: loop exit
PB: predicated region body
PF: predicated region fallthrough
CT: control target
= control target key end

     0   :  { %v2511_v7 = vmov 0.0   ;;  %vm125_vm0 = vcmask 261120   ;;  %s3803_s0 = inlined_call_operand.vmem [shape: f32[16,32], index: 0, kind: input, shape index: {}]   ;;  %s3804_s1 = inlined_call_operand.vmem [shape: f32[16,1024], index: 1, kind: input, shape index: {}]   ;;  %s3805_s2 = inlined_call_operand.vmem [shape: f32[32,1024], index: 2, kind: input, shape index: {}]   ;;  %s3806_s3 = inlined_call_operand.vmem [shape: f32[1,1024], index: 3, kind: input, shape index: {}]   ;;  %s3807_s4 = inlined_call_operand.vmem [shape: f32[1024,32], index: 4, kind: input, shape index: {}]   ;;  %s3808_s5 = inlined_call_operand.vmem [shape: f32[32,32], index: 5, kind: input, shape index: {}]   ;;  %s3809_s6 = inlined_call_operand.vmem [shape: f32[32,1024], index: 6, kind: input, shape index: {}]   ;;  %s3810_s7 = inlined_call_operand.vmem [shape: f32[1024,32], index: 7, kind: input, shape index: {}]   ;;  %s3811_s8 = inlined_call_operand.vmem [shape: f32[1,32], index: 8, kind: input, shape index: {}]   ;;  %s3812_s9 = inlined_call_operand.hbm [shape: f32[16,32], index: 9, kind: output, shape index: {}]  }
   0x1   :  { %v52_v0 = vld [vmem:[%s3805_s2 + $0x8] sm:$0xff]  ;;  %v54_v2 = vld [vmem:[%s3805_s2 + $0x18] sm:$0xff]  ;;  %v51_v5 = vld [vmem:[%s3805_s2] sm:$0xff]  ;;  %196 = vmatprep.mubr.f32.mxu0 %v2511_v7  ;;  %273 = vmatprep.mubr.f32.mxu1 %v2511_v7 }
   0x2   :  { %v60_v1 = vld [vmem:[%s3805_s2 + $0x48] sm:$0xff]  ;;  %v62_v4 = vld [vmem:[%s3805_s2 + $0x58] sm:$0xff]  ;;  %v59_v6 = vld [vmem:[%s3805_s2 + $0x40] sm:$0xff] }
   0x3   :  { %v2144_v3 = vpack.c.bf16 %v60_v1, %v52_v0  ;;  %v2152_v8 = vpack.c.bf16 %v62_v4, %v54_v2  ;;  %v2146_v9 = vpack.c.bf16 %v59_v6, %v51_v5  ;;  %v53_v10 = vld [vmem:[%s3805_s2 + $0x10] sm:$0xff]  ;;  %v68_v12 = vld [vmem:[%s3805_s2 + $0x88] sm:$0xff]  ;;  %v70_v15 = vld [vmem:[%s3805_s2 + $0x98] sm:$0xff] }
   0x4   :  { %v61_v11 = vld [vmem:[%s3805_s2 + $0x50] sm:$0xff]  ;;  %v76_v14 = vld [vmem:[%s3805_s2 + $0xc8] sm:$0xff]  ;;  %v78_v16 = vld [vmem:[%s3805_s2 + $0xd8] sm:$0xff] }
   0x5   :  { %2145 = vmatprep.subr.bf16.mxu0 %v2144_v3  ;;  %v2154_v13 = vpack.c.bf16 %v61_v11, %v53_v10  ;;  %2153 = vmatprep.subr.bf16.mxu1 %v2152_v8  ;;  %v2148_v17 = vpack.c.bf16 %v76_v14, %v68_v12  ;;  %v2156_v18 = vpack.c.bf16 %v78_v16, %v70_v15  ;;  %v67_v19 = vld [vmem:[%s3805_s2 + $0x80] sm:$0xff]  ;;  %v69_v21 = vld [vmem:[%s3805_s2 + $0x90] sm:$0xff]  ;;  %v56_v24 = vld [vmem:[%s3805_s2 + $0x28] sm:$0xff] }
   0x6   :  { %2147 = vmatpush1.bf16.msra.mxu0 %v2146_v9  ;;  %v75_v20 = vld [vmem:[%s3805_s2 + $0xc0] sm:$0xff]  ;;  %v77_v23 = vld [vmem:[%s3805_s2 + $0xd0] sm:$0xff]  ;;  %v64_v26 = vld [vmem:[%s3805_s2 + $0x68] sm:$0xff] }
   0x7   :  { %2155 = vmatpush1.bf16.msra.mxu1 %v2154_v13  ;;  %v2150_v22 = vpack.c.bf16 %v75_v20, %v67_v19  ;;  %2149 = vmatprep.subr.bf16.mxu0 %v2148_v17  ;;  %v2158_v25 = vpack.c.bf16 %v77_v23, %v69_v21  ;;  %v55_v27 = vld [vmem:[%s3805_s2 + $0x20] sm:$0xff]  ;;  %v2160_v30 = vpack.c.bf16 %v64_v26, %v56_v24  ;;  %v58_v31 = vld [vmem:[%s3805_s2 + $0x38] sm:$0xff]  ;;  %v57_v34 = vld [vmem:[%s3805_s2 + $0x30] sm:$0xff] }
   0x8   :  { %2157 = vmatprep.subr.bf16.mxu1 %v2156_v18  ;;  %v63_v28 = vld [vmem:[%s3805_s2 + $0x60] sm:$0xff]  ;;  %v66_v32 = vld [vmem:[%s3805_s2 + $0x78] sm:$0xff]  ;;  %v65_v35 = vld [vmem:[%s3805_s2 + $0x70] sm:$0xff] }
   0x9   :  { %v2630_v29 = vld [vmem:[%s3803_s0] sm:$0xff]  ;;  %v2168_v33 = vpack.c.bf16 %v66_v32, %v58_v31  ;;  %v72_v36 = vld [vmem:[%s3805_s2 + $0xa8] sm:$0xff]  ;;  %v2162_v37 = vpack.c.bf16 %v63_v28, %v55_v27  ;;  %v2170_v41 = vpack.c.bf16 %v65_v35, %v57_v34  ;;  %v74_v43 = vld [vmem:[%s3805_s2 + $0xb8] sm:$0xff] }
   0xa   :  { %2151 = vmatpush1.bf16.msra.mxu0 %v2150_v22  ;;  %v80_v38 = vld [vmem:[%s3805_s2 + $0xe8] sm:$0xff]  ;;  %v71_v39 = vld [vmem:[%s3805_s2 + $0xa0] sm:$0xff]  ;;  %v82_v44 = vld [vmem:[%s3805_s2 + $0xf8] sm:$0xff] }
   0xb   :  { %2159 = vmatpush1.bf16.msra.mxu1 %v2158_v25  ;;  %2161 = vmatprep.subr.bf16.mxu0 %v2160_v30  ;;  %v79_v40 = vld [vmem:[%s3805_s2 + $0xe0] sm:$0xff]  ;;  %v2164_v42 = vpack.c.bf16 %v80_v38, %v72_v36  ;;  %v73_v45 = vld [vmem:[%s3805_s2 + $0xb0] sm:$0xff]  ;;  %v2172_v46 = vpack.c.bf16 %v82_v44, %v74_v43  ;;  %v473_v49 = vld [vmem:[%s3807_s4 + $0x88] sm:$0xff] }
   0xc   :  { %2169 = vmatprep.subr.bf16.mxu1 %v2168_v33  ;;  %v81_v47 = vld [vmem:[%s3805_s2 + $0xf0] sm:$0xff]  ;;  %v472_v48 = vld [vmem:[%s3807_s4 + $0x80] sm:$0xff]  ;;  %v34_v50 = vld [vmem:[%s3803_s0 + $0x8] sm:$0xff]  ;;  %v2166_v53 = vpack.c.bf16 %v79_v40, %v71_v39 }
   0xd   :  { %1804 = vmatmul.mubr.msk.f32.vlgmr.msra.gmra.mrb[0].mxu0 %vm125_vm0, %v2630_v29  ;;  %v504_v51 = vld [vmem:[%s3807_s4 + $0x180] sm:$0xff]  ;;  %v505_v52 = vld [vmem:[%s3807_s4 + $0x188] sm:$0xff]  ;;  %v2174_v54 = vpack.c.bf16 %v81_v47, %v73_v45  ;;  %v2176_v55 = vpack.c.bf16 %v473_v49, %v472_v48  ;;  %v474_v61 = vld [vmem:[%s3807_s4 + $0x90] sm:$0xff] }
   0xe   :  { %1806 = vmatmul.mubr.msk.f32.vlgmr.msra.gmra.mrb[0].mxu1 %vm125_vm0, %v2630_v29  ;;  %202 = vmatprep.mubr.f32.mxu0 %v2511_v7  ;;  %v2208_v56 = vpack.c.bf16 %v505_v52, %v504_v51  ;;  %v456_v57 = vld [vmem:[%s3807_s4] sm:$0xff]  ;;  %v457_v58 = vld [vmem:[%s3807_s4 + $0x8] sm:$0xff]  ;;  %v475_v62 = vld [vmem:[%s3807_s4 + $0x98] sm:$0xff] }
   0xf   :  { %279 = vmatprep.mubr.f32.mxu1 %v2511_v7  ;;  %2163 = vmatpush1.bf16.msra.mxu0 %v2162_v37  ;;  %v488_v59 = vld [vmem:[%s3807_s4 + $0x100] sm:$0xff]  ;;  %v489_v60 = vld [vmem:[%s3807_s4 + $0x108] sm:$0xff]  ;;  %v506_v63 = vld [vmem:[%s3807_s4 + $0x190] sm:$0xff]  ;;  %v2178_v1 = vpack.c.bf16 %v457_v58, %v456_v57  ;;  %v2180_v3 = vpack.c.bf16 %v475_v62, %v474_v61 }
  0x10   :  { %2171 = vmatpush1.bf16.msra.mxu1 %v2170_v41  ;;  %2165 = vmatprep.subr.bf16.mxu0 %v2164_v42  ;;  %v507_v0 = vld [vmem:[%s3807_s4 + $0x198] sm:$0xff]  ;;  %v2210_v2 = vpack.c.bf16 %v489_v60, %v488_v59  ;;  %v458_v4 = vld [vmem:[%s3807_s4 + $0x10] sm:$0xff]  ;;  %v476_v10 = vld [vmem:[%s3807_s4 + $0xa0] sm:$0xff] }
  0x11   :  { %1805 = vmatmul.mubr.msk.f32.gmra.mrb[2].mxu0 %vm125_vm0, %v34_v50  ;;  %2173 = vmatprep.subr.bf16.mxu1 %v2172_v46  ;;  %v459_v5 = vld [vmem:[%s3807_s4 + $0x18] sm:$0xff]  ;;  %v490_v6 = vld [vmem:[%s3807_s4 + $0x110] sm:$0xff]  ;;  %v2212_v8 = vpack.c.bf16 %v507_v0, %v506_v63  ;;  %v477_v11 = vld [vmem:[%s3807_s4 + $0xa8] sm:$0xff] }
  0x12   :  { %1807 = vmatmul.mubr.msk.f32.gmra.mrb[2].mxu1 %vm125_vm0, %v34_v50  ;;  %350 = vmatprep.mubr.f32.mxu0 %v2511_v7  ;;  %v491_v9 = vld [vmem:[%s3807_s4 + $0x118] sm:$0xff]  ;;  %v508_v12 = vld [vmem:[%s3807_s4 + $0x1a0] sm:$0xff]  ;;  %v509_v13 = vld [vmem:[%s3807_s4 + $0x1a8] sm:$0xff]  ;;  %v2182_v14 = vpack.c.bf16 %v459_v5, %v458_v4  ;;  %v2184_v16 = vpack.c.bf16 %v477_v11, %v476_v10 }
  0x13   :  { %2167 = vmatpush1.bf16.msra.mxu0 %v2166_v53  ;;  %427 = vmatprep.mubr.f32.mxu1 %v2511_v7  ;;  %v2214_v15 = vpack.c.bf16 %v491_v9, %v490_v6  ;;  %v460_v17 = vld [vmem:[%s3807_s4 + $0x20] sm:$0xff]  ;;  %v461_v18 = vld [vmem:[%s3807_s4 + $0x28] sm:$0xff]  ;;  %v2216_v20 = vpack.c.bf16 %v509_v13, %v508_v12  ;;  %v478_v22 = vld [vmem:[%s3807_s4 + $0xb0] sm:$0xff] }
  0x14   :  { %2175 = vmatpush1.bf16.msra.mxu1 %v2174_v54  ;;  %2177 = vmatprep.subr.bf16.mxu0 %v2176_v55  ;;  %v492_v19 = vld [vmem:[%s3807_s4 + $0x120] sm:$0xff]  ;;  %v493_v21 = vld [vmem:[%s3807_s4 + $0x128] sm:$0xff]  ;;  %v479_v23 = vld [vmem:[%s3807_s4 + $0xb8] sm:$0xff]  ;;  %v2186_v26 = vpack.c.bf16 %v461_v18, %v460_v17 }
  0x15   :  { %2209 = vmatprep.subr.bf16.mxu1 %v2208_v56  ;;  %v510_v24 = vld [vmem:[%s3807_s4 + $0x1b0] sm:$0xff]  ;;  %v511_v25 = vld [vmem:[%s3807_s4 + $0x1b8] sm:$0xff]  ;;  %v2218_v27 = vpack.c.bf16 %v493_v21, %v492_v19  ;;  %v2188_v28 = vpack.c.bf16 %v479_v23, %v478_v22  ;;  %v480_v34 = vld [vmem:[%s3807_s4 + $0xc0] sm:$0xff] }
  0x16   :  { %1808 = vmatmul.mubr.msk.f32.vlgmr.msra.gmra.mrb[4].mxu0 %vm125_vm0, %v2630_v29  ;;  %v463_v30 = vld [vmem:[%s3807_s4 + $0x38] sm:$0xff]  ;;  %v494_v31 = vld [vmem:[%s3807_s4 + $0x130] sm:$0xff]  ;;  %v2220_v32 = vpack.c.bf16 %v511_v25, %v510_v24  ;;  %v481_v35 = vld [vmem:[%s3807_s4 + $0xc8] sm:$0xff] }
  0x17   :  { %1810 = vmatmul.mubr.msk.f32.vlgmr.msra.gmra.mrb[4].mxu1 %vm125_vm0, %v2630_v29  ;;  %356 = vmatprep.mubr.f32.mxu0 %v2511_v7  ;;  %v462_v29 = vld [vmem:[%s3807_s4 + $0x30] sm:$0xff]  ;;  %v495_v33 = vld [vmem:[%s3807_s4 + $0x138] sm:$0xff]  ;;  %v512_v36 = vld [vmem:[%s3807_s4 + $0x1c0] sm:$0xff] }
  0x18   :  { %433 = vmatprep.mubr.f32.mxu1 %v2511_v7  ;;  %2179 = vmatpush3.bf16.msra.mxu0 %v2178_v1  ;;  %v513_v37 = vld [vmem:[%s3807_s4 + $0x1c8] sm:$0xff]  ;;  %v2190_v38 = vpack.c.bf16 %v463_v30, %v462_v29 }
  0x19   :  { %2211 = vmatpush3.bf16.msra.mxu1 %v2210_v2  ;;  %2181 = vmatprep.subr.bf16.mxu0 %v2180_v3 }
  0x1a   :  { %1809 = vmatmul.mubr.msk.f32.gmra.mrb[6].mxu0 %vm125_vm0, %v34_v50  ;;  %2213 = vmatprep.subr.bf16.mxu1 %v2212_v8 }
  0x1b   :  { %1811 = vmatmul.mubr.msk.f32.gmra.mrb[6].mxu1 %vm125_vm0, %v34_v50 }
  0x1c   :  { %2183 = vmatpush3.bf16.msra.mxu0 %v2182_v14 }
  0x1d   :  { %2215 = vmatpush3.bf16.msra.mxu1 %v2214_v15  ;;  %2185 = vmatprep.subr.bf16.mxu0 %v2184_v16 }
  0x1e   :  { %2217 = vmatprep.subr.bf16.mxu1 %v2216_v20 }
  0x20   :  { %2187 = vmatpush3.bf16.msra.mxu0 %v2186_v26 }
  0x21   :  { %14 = vsyncpa [#allocation3], 0  ;;  %2219 = vmatpush3.bf16.msra.mxu1 %v2218_v27  ;;  %2189 = vmatprep.subr.bf16.mxu0 %v2188_v28  ;;  %v2222_v39 = vpack.c.bf16 %v495_v33, %v494_v31  ;;  %v2192_v40 = vpack.c.bf16 %v481_v35, %v480_v34  ;;  %v464_v41 = vld [vmem:[%s3807_s4 + $0x40] sm:$0xff]  ;;  %v465_v42 = vld [vmem:[%s3807_s4 + $0x48] sm:$0xff]  ;;  %v2224_v44 = vpack.c.bf16 %v513_v37, %v512_v36  ;;  %v85_v27 = vlaneseq  ;;  %s2512_s24 = smov [#allocation2]  }
  0x22   :  { %v496_v43 = vld [vmem:[%s3807_s4 + $0x140] sm:$0xff]  ;;  %2221 = vmatprep.subr.bf16.mxu1 %v2220_v32  ;;  %v497_v45 = vld [vmem:[%s3807_s4 + $0x148] sm:$0xff]  ;;  %v482_v46 = vld [vmem:[%s3807_s4 + $0xd0] sm:$0xff]  ;;  %v2194_v50 = vpack.c.bf16 %v465_v42, %v464_v41  ;;  %s1793_s25 = sshll.u32 %s2512_s24, 4  ;;  %s1794_s25 = int_to_ptr.vmem [resolvable:$true] %s1793_s25 }
  0x23   :  { %v483_v47 = vld [vmem:[%s3807_s4 + $0xd8] sm:$0xff]  ;;  %v514_v48 = vld [vmem:[%s3807_s4 + $0x1d0] sm:$0xff]  ;;  %v2226_v51 = vpack.c.bf16 %v497_v45, %v496_v43  ;;  %v484_v58 = vld [vmem:[%s3807_s4 + $0xe0] sm:$0xff]  ;;  %v2893_v28 = vshrl.u32 %v85_v27, 7  ;;  %s2487_s28 = scalar_lea.vmem %s1794_s25, 256  ;;  %p2492_p1 = scmp.lt.s32.totalorder %s1794_s25, %s1794_s25 }
  0x24   :  { %v515_v49 = vld [vmem:[%s3807_s4 + $0x1d8] sm:$0xff]  ;;  %2191 = vmatpush3.bf16.msra.mxu0 %v2190_v38  ;;  %v2196_v52 = vpack.c.bf16 %v483_v47, %v482_v46  ;;  %v466_v53 = vld [vmem:[%s3807_s4 + $0x50] sm:$0xff]  ;;  %v485_v59 = vld [vmem:[%s3807_s4 + $0xe8] sm:$0xff]  ;;  %p2488_p0 = scmp.ne.s32.totalorder %s1794_s25, %s2487_s28  ;;  %p2493_p2 = scmp.lt.s32.totalorder %s2487_s28, %s2487_s28 }
  0x25   :  { %2223 = vmatpush3.bf16.msra.mxu1 %v2222_v39  ;;  %2193 = vmatprep.subr.bf16.mxu0 %v2192_v40  ;;  %v467_v54 = vld [vmem:[%s3807_s4 + $0x58] sm:$0xff]  ;;  %v498_v55 = vld [vmem:[%s3807_s4 + $0x150] sm:$0xff]  ;;  %v2228_v56 = vpack.c.bf16 %v515_v49, %v514_v48  ;;  %v516_v60 = vld [vmem:[%s3807_s4 + $0x1e0] sm:$0xff]  ;;  %v2200_v0 = vpack.c.bf16 %v485_v59, %v484_v58  ;;  %v87_v29 = vsub.s32 0, %v2893_v28  ;;  %v95_v31 = vsub.s32 2, %v2893_v28 }
  0x26   :  { %2225 = vmatprep.subr.bf16.mxu1 %v2224_v44  ;;  %v499_v57 = vld [vmem:[%s3807_s4 + $0x158] sm:$0xff]  ;;  %v517_v61 = vld [vmem:[%s3807_s4 + $0x1e8] sm:$0xff]  ;;  %v2198_v62 = vpack.c.bf16 %v467_v54, %v466_v53  ;;  %v468_v1 = vld [vmem:[%s3807_s4 + $0x60] sm:$0xff]  ;;  %v91_v32 = vsub.s32 1, %v2893_v28  ;;  %v99_v33 = vsub.s32 3, %v2893_v28  ;;  %p2494_p3 = por %p2493_p2, %p2492_p1 }
  0x27   :  { %v2230_v63 = vpack.c.bf16 %v499_v57, %v498_v55  ;;  %v469_v2 = vld [vmem:[%s3807_s4 + $0x68] sm:$0xff]  ;;  %v2232_v3 = vpack.c.bf16 %v517_v61, %v516_v60  ;;  %v500_v4 = vld [vmem:[%s3807_s4 + $0x160] sm:$0xff]  ;;  %v486_v9 = vld [vmem:[%s3807_s4 + $0xf0] sm:$0xff]  ;;  %v107_v61 = vsub.s32 5, %v2893_v28 }
  0x28   :  { %2195 = vmatpush3.bf16.msra.mxu0 %v2194_v50  ;;  %v501_v5 = vld [vmem:[%s3807_s4 + $0x168] sm:$0xff]  ;;  %v2202_v6 = vpack.c.bf16 %v469_v2, %v468_v1  ;;  %v487_v10 = vld [vmem:[%s3807_s4 + $0xf8] sm:$0xff]  ;;  %v518_v11 = vld [vmem:[%s3807_s4 + $0x1f0] sm:$0xff]  ;;  %p2495_p4 = pnand %p2494_p3, %p2488_p0 }
  0x29   :  { %2227 = vmatpush3.bf16.msra.mxu1 %v2226_v51  ;;  %2197 = vmatprep.subr.bf16.mxu0 %v2196_v52  ;;  %v2234_v8 = vpack.c.bf16 %v501_v5, %v500_v4  ;;  %v2204_v12 = vpack.c.bf16 %v487_v10, %v486_v9  ;;  %v519_v13 = vld [vmem:[%s3807_s4 + $0x1f8] sm:$0xff]  ;;  %v470_v14 = vld [vmem:[%s3807_s4 + $0x70] sm:$0xff]  ;;  %v536_v21 = vld [vmem:[%s3807_s4 + $0x280] sm:$0xff]  ;;  %v115_v4 = vsub.s32 7, %v2893_v28 }
  0x2a   :  { %2229 = vmatprep.subr.bf16.mxu1 %v2228_v56  ;;  %v471_v15 = vld [vmem:[%s3807_s4 + $0x78] sm:$0xff]  ;;  %v2236_v16 = vpack.c.bf16 %v519_v13, %v518_v11  ;;  %v502_v18 = vld [vmem:[%s3807_s4 + $0x170] sm:$0xff]  ;;  %v537_v22 = vld [vmem:[%s3807_s4 + $0x288] sm:$0xff] }
  0x2b   :  { %v2206_v17 = vpack.c.bf16 %v471_v15, %v470_v14  ;;  %v503_v19 = vld [vmem:[%s3807_s4 + $0x178] sm:$0xff]  ;;  %v568_v23 = vld [vmem:[%s3807_s4 + $0x380] sm:$0xff]  ;;  %v569_v24 = vld [vmem:[%s3807_s4 + $0x388] sm:$0xff]  ;;  %v2240_v25 = vpack.c.bf16 %v537_v22, %v536_v21 }
  0x2c   :  { %2199 = vmatpush3.bf16.msra.mxu0 %v2198_v62  ;;  %v2238_v20 = vpack.c.bf16 %v503_v19, %v502_v18  ;;  %v2272_v26 = vpack.c.bf16 %v569_v24, %v568_v23  ;;  %v2899_v30 = vld [vmem:[%s3806_s3] sm:$0xff]  ;;  %v37_v37 = vld [vmem:[%s3804_s1 + $0x10] sm:$0xff]  ;;  %v2919_v41 = vld [vmem:[%s3804_s1 + $0x8] sm:$0xff] }
  0x2d   :  { %2231 = vmatpush3.bf16.msra.mxu1 %v2230_v63  ;;  %2201 = vmatprep.subr.bf16.mxu0 %v2200_v0  ;;  %v88_v34 = vrot.slane %v2899_v30, %v87_v29  ;;  %v96_v35 = vrot.slane %v2899_v30, %v95_v31  ;;  %v92_v36 = vrot.slane %v2899_v30, %v91_v32  ;;  %v2914_v39 = vld [vmem:[%s3804_s1] sm:$0xff]  ;;  %v521_v43 = vld [vmem:[%s3807_s4 + $0x208] sm:$0xff]  ;;  %v2930_v47 = vld [vmem:[%s3804_s1 + $0x18] sm:$0xff] }
  0x2e   :  { %2233 = vmatprep.subr.bf16.mxu1 %v2232_v3  ;;  %v100_v38 = vrot.slane %v2899_v30, %v99_v33  ;;  %v520_v42 = vld [vmem:[%s3807_s4 + $0x200] sm:$0xff]  ;;  %v553_v49 = vld [vmem:[%s3807_s4 + $0x308] sm:$0xff]  ;;  %v538_v53 = vld [vmem:[%s3807_s4 + $0x290] sm:$0xff]  ;;  %v3009_v27 = vrot.slane %v2899_v30, %v107_v61  ;;  %v3017_v33 = vrot.slane %v2899_v30, %v115_v4 }
  0x2f   :  { %v552_v48 = vld [vmem:[%s3807_s4 + $0x300] sm:$0xff]  ;;  %v539_v54 = vld [vmem:[%s3807_s4 + $0x298] sm:$0xff]  ;;  %v570_v55 = vld [vmem:[%s3807_s4 + $0x390] sm:$0xff]  ;;  %v2242_v57 = vpack.c.bf16 %v521_v43, %v520_v42 }
  0x30   :  { %2203 = vmatpush3.bf16.msra.mxu0 %v2202_v6  ;;  %v571_v58 = vld [vmem:[%s3807_s4 + $0x398] sm:$0xff]  ;;  %v2953_v59 = vld [vmem:[%s3807_s4 + $0x210] sm:$0xff]  ;;  %v2274_v0 = vpack.c.bf16 %v553_v49, %v552_v48  ;;  %v2970_v2 = vld [vmem:[%s3804_s1 + $0x40] sm:$0xff] }
  0x31   :  { %2235 = vmatpush3.bf16.msra.mxu1 %v2234_v8  ;;  %2205 = vmatprep.subr.bf16.mxu0 %v2204_v12  ;;  %v2958_v60 = vld [vmem:[%s3807_s4 + $0x218] sm:$0xff]  ;;  %v2965_v1 = vld [vmem:[%s3807_s4 + $0x310] sm:$0xff]  ;;  %v2244_v8 = vpack.c.bf16 %v539_v54, %v538_v53  ;;  %v2986_v13 = vld [vmem:[%s3804_s1 + $0x48] sm:$0xff]  ;;  %v2276_v15 = vpack.c.bf16 %v571_v58, %v570_v55 }
  0x32   :  { %2237 = vmatprep.subr.bf16.mxu1 %v2236_v16  ;;  %v555_v9 = vld [vmem:[%s3807_s4 + $0x318] sm:$0xff]  ;;  %v2981_v11 = vld [vmem:[%s3804_s1 + $0x50] sm:$0xff]  ;;  %v2246_v16 = vpack.c.bf16 %v2958_v60, %v2953_v59  ;;  %v541_v18 = vld [vmem:[%s3807_s4 + $0x2a8] sm:$0xff] }
  0x33   :  { %v2999_v21 = vld [vmem:[%s3804_s1 + $0x58] sm:$0xff]  ;;  %v572_v23 = vld [vmem:[%s3807_s4 + $0x3a0] sm:$0xff]  ;;  %v573_v24 = vld [vmem:[%s3807_s4 + $0x3a8] sm:$0xff] }
  0x34   :  { %2207 = vmatpush3.bf16.msra.mxu0 %v2206_v17  ;;  %v540_v17 = vld [vmem:[%s3807_s4 + $0x2a0] sm:$0xff]  ;;  %v2280_v43 = vpack.c.bf16 %v573_v24, %v572_v23  ;;  %v3055_v53 = vld [vmem:[%s3804_s1 + $0x38] sm:$0xff]  ;;  %v526_v59 = vld [vmem:[%s3807_s4 + $0x230] sm:$0xff] }
  0x35   :  { %2239 = vmatpush3.bf16.msra.mxu1 %v2238_v20  ;;  %2241 = vmatprep.subr.bf16.mxu0 %v2240_v25  ;;  %v524_v29 = vld [vmem:[%s3807_s4 + $0x220] sm:$0xff]  ;;  %v527_v60 = vld [vmem:[%s3807_s4 + $0x238] sm:$0xff]  ;;  %v558_v61 = vld [vmem:[%s3807_s4 + $0x330] sm:$0xff] }
  0x36   :  { %2273 = vmatprep.subr.bf16.mxu1 %v2272_v26  ;;  %v545_v4 = vld [vmem:[%s3807_s4 + $0x2c8] sm:$0xff]  ;;  %v546_v23 = vld [vmem:[%s3807_s4 + $0x2d0] sm:$0xff]  ;;  %v547_v24 = vld [vmem:[%s3807_s4 + $0x2d8] sm:$0xff] }
  0xe0   :  { %v198_v40 = vpop.f32.mrb[0].mxu0 }
  0xe1   :  { %v199_v44 = vadd.f32 %v198_v40, %v88_v34  ;;  %v275_v45 = vpop.f32.mrb[0].mxu1  ;;  %v200_v46 = vpop.f32.mrb[1].mxu0 }
  0xe2   :  { %v276_v50 = vadd.f32 %v275_v45, %v96_v35  ;;  %v201_v51 = vadd.f32 %v200_v46, %v92_v36  ;;  %v277_v52 = vpop.f32.mrb[1].mxu1  ;;  %v543_v45 = vld [vmem:[%s3807_s4 + $0x2b8] sm:$0xff]  ;;  %v3041_v46 = vld [vmem:[%s3804_s1 + $0x28] sm:$0xff] }
  0xe3   :  { %v278_v56 = vadd.f32 %v277_v52, %v100_v38  ;;  %v440_v5 = vmul.f32 %v199_v44, %v2914_v39  ;;  %v542_v44 = vld [vmem:[%s3807_s4 + $0x2b0] sm:$0xff] }
  0xe4   :  { %v442_v62 = vmul.f32 %v276_v50, %v37_v37  ;;  %v441_v63 = vmul.f32 %v201_v51, %v2919_v41  ;;  %v204_v3 = vpop.f32.mrb[2].mxu0  ;;  %v556_v37 = vld [vmem:[%s3807_s4 + $0x320] sm:$0xff]  ;;  %v574_v50 = vld [vmem:[%s3807_s4 + $0x3b0] sm:$0xff]  ;;  %v575_v51 = vld [vmem:[%s3807_s4 + $0x3b8] sm:$0xff]  ;;  %v2252_v58 = vpack.c.bf16 %v543_v45, %v542_v44 }
  0xe5   :  { %v443_v6 = vmul.f32 %v278_v56, %v2930_v47  ;;  %v205_v10 = vadd.f32 %v204_v3, %v88_v34  ;;  %v281_v12 = vpop.f32.mrb[2].mxu1  ;;  %v206_v14 = vpop.f32.mrb[3].mxu0  ;;  %v2278_v34 = vpack.c.bf16 %v555_v9, %v2965_v1  ;;  %v559_v1 = vld [vmem:[%s3807_s4 + $0x338] sm:$0xff]  ;;  %v544_v3 = vld [vmem:[%s3807_s4 + $0x2c0] sm:$0xff]  ;;  %v581_v45 = vld [vmem:[%s3807_s4 + $0x3e8] sm:$0xff] }
  0xe6   :  { %648 = vmatprep.mubr.f32.mxu0 %v441_v63  ;;  %v282_v19 = vadd.f32 %v281_v12, %v96_v35  ;;  %v207_v20 = vadd.f32 %v206_v14, %v92_v36  ;;  %v283_v22 = vpop.f32.mrb[3].mxu1  ;;  %v2248_v35 = vpack.c.bf16 %v541_v18, %v540_v17  ;;  %v525_v36 = vld [vmem:[%s3807_s4 + $0x228] sm:$0xff]  ;;  %v576_v9 = vld [vmem:[%s3807_s4 + $0x3c0] sm:$0xff]  ;;  %v2254_v14 = vpack.c.bf16 %v527_v60, %v526_v59  ;;  %v551_v60 = vld [vmem:[%s3807_s4 + $0x2f8] sm:$0xff] }
  0xe7   :  { %723 = vmatprep.mubr.f32.mxu1 %v443_v6  ;;  %649 = vmatmul.mubr.f32.vlgmr.msra.gmra.mrb[8].mxu0 %v440_v5  ;;  %v448_v25 = vmul.f32 %v205_v10, %v2970_v2  ;;  %v284_v26 = vadd.f32 %v283_v22, %v100_v38  ;;  %v557_v38 = vld [vmem:[%s3807_s4 + $0x328] sm:$0xff]  ;;  %v2250_v55 = vpack.c.bf16 %v525_v36, %v524_v29  ;;  %v528_v17 = vld [vmem:[%s3807_s4 + $0x240] sm:$0xff]  ;;  %v562_v36 = vld [vmem:[%s3807_s4 + $0x350] sm:$0xff] }
  0xe8   :  { %724 = vmatmul.mubr.f32.vlgmr.msra.gmra.mrb[8].mxu1 %v442_v62  ;;  %2243 = vmatpush3.bf16.msra.mxu0 %v2242_v57  ;;  %v450_v31 = vmul.f32 %v282_v19, %v2981_v11  ;;  %v449_v32 = vmul.f32 %v207_v20, %v2986_v13  ;;  %v2282_v57 = vpack.c.bf16 %v557_v38, %v556_v37  ;;  %v577_v10 = vld [vmem:[%s3807_s4 + $0x3c8] sm:$0xff]  ;;  %v560_v19 = vld [vmem:[%s3807_s4 + $0x340] sm:$0xff]  ;;  %v563_v38 = vld [vmem:[%s3807_s4 + $0x358] sm:$0xff] }
  0xe9   :  { %2275 = vmatpush3.bf16.msra.mxu1 %v2274_v0  ;;  %2245 = vmatprep.subr.bf16.mxu0 %v2244_v8  ;;  %v451_v40 = vmul.f32 %v284_v26, %v2999_v21  ;;  %v3030_v42 = vpop.f32.mrb[4].mxu0  ;;  %v2284_v0 = vpack.c.bf16 %v575_v51, %v574_v50  ;;  %v529_v18 = vld [vmem:[%s3807_s4 + $0x248] sm:$0xff]  ;;  %v2288_v20 = vpack.c.bf16 %v577_v10, %v576_v9  ;;  %v579_v26 = vld [vmem:[%s3807_s4 + $0x3d8] sm:$0xff]  ;;  %v580_v44 = vld [vmem:[%s3807_s4 + $0x3e0] sm:$0xff]  ;;  %v111_v50 = vsub.s32 6, %v2893_v28 }
  0xea   :  { %2277 = vmatprep.subr.bf16.mxu1 %v2276_v15  ;;  %653 = vmatprep.mubr.f32.mxu0 %v449_v32  ;;  %v354_v48 = vpop.f32.mrb[5].mxu0  ;;  %v3043_v49 = vpop.f32.mrb[4].mxu1  ;;  %v2286_v15 = vpack.c.bf16 %v559_v1, %v558_v61  ;;  %v561_v22 = vld [vmem:[%s3807_s4 + $0x348] sm:$0xff]  ;;  %v2258_v29 = vpack.c.bf16 %v529_v18, %v528_v17  ;;  %v2260_v32 = vpack.c.bf16 %v547_v24, %v546_v23  ;;  %v582_v61 = vld [vmem:[%s3807_s4 + $0x3f0] sm:$0xff]  ;;  %v535_v10 = vld [vmem:[%s3807_s4 + $0x278] sm:$0xff] }
  0xeb   :  { %728 = vmatprep.mubr.f32.mxu1 %v451_v40  ;;  %v355_v52 = vadd.f32 %v354_v48, %v3009_v27  ;;  %654 = vmatmul.mubr.f32.gmra.mrb[10].mxu0 %v448_v25  ;;  %v431_v54 = vpop.f32.mrb[5].mxu1  ;;  %v578_v25 = vld [vmem:[%s3807_s4 + $0x3d0] sm:$0xff]  ;;  %v548_v40 = vld [vmem:[%s3807_s4 + $0x2e0] sm:$0xff]  ;;  %v2294_v51 = vpack.c.bf16 %v563_v38, %v562_v36  ;;  %v565_v59 = vld [vmem:[%s3807_s4 + $0x368] sm:$0xff] }
  0xec   :  { %2247 = vmatpush3.bf16.msra.mxu0 %v2246_v16  ;;  %729 = vmatmul.mubr.f32.gmra.mrb[10].mxu1 %v450_v31  ;;  %v432_v56 = vadd.f32 %v431_v54, %v3017_v33  ;;  %v2256_v16 = vpack.c.bf16 %v545_v4, %v544_v3  ;;  %v2290_v31 = vpack.c.bf16 %v561_v22, %v560_v19  ;;  %v534_v9 = vld [vmem:[%s3807_s4 + $0x270] sm:$0xff]  ;;  %v3192_v22 = vld [vmem:[%s3804_s1 + $0x68] sm:$0xff] }
  0xed   :  { %2279 = vmatpush3.bf16.msra.mxu1 %v2278_v34  ;;  %2249 = vmatprep.subr.bf16.mxu0 %v2248_v35  ;;  %v445_v62 = vmul.f32 %v355_v52, %v3041_v46  ;;  %v3068_v63 = vpop.f32.mrb[6].mxu0  ;;  %v530_v34 = vld [vmem:[%s3807_s4 + $0x250] sm:$0xff]  ;;  %v531_v35 = vld [vmem:[%s3807_s4 + $0x258] sm:$0xff]  ;;  %v2292_v37 = vpack.c.bf16 %v579_v26, %v578_v25  ;;  %v103_v52 = vsub.s32 4, %v2893_v28  ;;  %v2270_v18 = vpack.c.bf16 %v535_v10, %v534_v9 }
  0xee   :  { %2281 = vmatprep.subr.bf16.mxu1 %v2280_v43  ;;  %v447_v5 = vmul.f32 %v432_v56, %v3055_v53  ;;  %v3080_v6 = vpop.f32.mrb[7].mxu0  ;;  %v3082_v8 = vpop.f32.mrb[6].mxu1  ;;  %v549_v43 = vld [vmem:[%s3807_s4 + $0x2e8] sm:$0xff]  ;;  %v2262_v48 = vpack.c.bf16 %v531_v35, %v530_v34  ;;  %v550_v28 = vld [vmem:[%s3807_s4 + $0x2f0] sm:$0xff] }
  0xef   :  { %v3090_v12 = vpop.f32.mrb[7].mxu1  ;;  %798 = vmatprep.mubr.f32.mxu0 %v445_v62  ;;  %v2264_v54 = vpack.c.bf16 %v549_v43, %v548_v40  ;;  %v533_v56 = vld [vmem:[%s3807_s4 + $0x268] sm:$0xff]  ;;  %v583_v62 = vld [vmem:[%s3807_s4 + $0x3f8] sm:$0xff]  ;;  %v104_v3 = vrot.slane %v2899_v30, %v103_v52  ;;  %v361_v17 = vadd.f32 %v3080_v6, %v3009_v27  ;;  %v3199_v27 = vld [vmem:[%s3804_s1 + $0x20] sm:$0xff] }
  0xf0   :  { %2251 = vmatpush3.bf16.msra.mxu0 %v2250_v55  ;;  %873 = vmatprep.mubr.f32.mxu1 %v447_v5  ;;  %v532_v55 = vld [vmem:[%s3807_s4 + $0x260] sm:$0xff]  ;;  %v2268_v5 = vpack.c.bf16 %v551_v60, %v550_v28  ;;  %v438_v23 = vadd.f32 %v3090_v12, %v3017_v33  ;;  %v3214_v26 = vld [vmem:[%s3804_s1 + $0x70] sm:$0xff] }
  0xf1   :  { %2283 = vmatpush3.bf16.msra.mxu1 %v2282_v57  ;;  %2253 = vmatprep.subr.bf16.mxu0 %v2252_v58  ;;  %v564_v57 = vld [vmem:[%s3807_s4 + $0x360] sm:$0xff]  ;;  %v2296_v58 = vpack.c.bf16 %v581_v45, %v580_v44  ;;  %v2266_v1 = vpack.c.bf16 %v533_v56, %v532_v55  ;;  %v353_v19 = vadd.f32 %v3030_v42, %v104_v3  ;;  %v3204_v42 = vld [vmem:[%s3804_s1 + $0x78] sm:$0xff] }
  0xf2   :  { %2285 = vmatprep.subr.bf16.mxu1 %v2284_v0  ;;  %v112_v0 = vrot.slane %v2899_v30, %v111_v50  ;;  %v2298_v4 = vpack.c.bf16 %v565_v59, %v564_v57  ;;  %v567_v30 = vld [vmem:[%s3807_s4 + $0x378] sm:$0xff]  ;;  %v453_v24 = vmul.f32 %v361_v17, %v3192_v22  ;;  %v359_v12 = vadd.f32 %v3068_v63, %v104_v3 }
  0xf3   :  { %v444_v33 = vmul.f32 %v353_v19, %v3199_v27 }
  0xf4   :  { %2255 = vmatpush3.bf16.msra.mxu0 %v2254_v14  ;;  %v2300_v14 = vpack.c.bf16 %v583_v62, %v582_v61  ;;  %v436_v25 = vadd.f32 %v3082_v8, %v112_v0 }
  0xf5   :  { %2287 = vmatpush3.bf16.msra.mxu1 %v2286_v15  ;;  %2257 = vmatprep.subr.bf16.mxu0 %v2256_v16  ;;  %v566_v15 = vld [vmem:[%s3807_s4 + $0x370] sm:$0xff]  ;;  %v430_v16 = vadd.f32 %v3043_v49, %v112_v0 }
  0xf6   :  { %2289 = vmatprep.subr.bf16.mxu1 %v2288_v20  ;;  %v3187_v20 = vld [vmem:[%s3804_s1 + $0x30] sm:$0xff]  ;;  %v2302_v49 = vpack.c.bf16 %v567_v30, %v566_v15  ;;  %v454_v8 = vmul.f32 %v436_v25, %v3214_v26  ;;  %v896_v15 = vld [vmem:[%s3808_s5] sm:$0xff]  ;;  %v897_v30 = vld [vmem:[%s3808_s5 + $0x8] sm:$0xff] }
  0xf7   :  { %v446_v6 = vmul.f32 %v430_v16, %v3187_v20  ;;  %v898_v16 = vld [vmem:[%s3808_s5 + $0x10] sm:$0xff]  ;;  %v2304_v17 = vpack.c.bf16 %v897_v30, %v896_v15  ;;  %v991_v15 = vld [vmem:[%s3809_s6 + $0x20] sm:$0xff] }
  0xf8   :  { %2259 = vmatpush3.bf16.msra.mxu0 %v2258_v29  ;;  %v455_v29 = vmul.f32 %v438_v23, %v3204_v42  ;;  %v999_v30 = vld [vmem:[%s3809_s6 + $0x60] sm:$0xff] }
  0xf9   :  { %2291 = vmatpush3.bf16.msra.mxu1 %v2290_v31  ;;  %2261 = vmatprep.subr.bf16.mxu0 %v2260_v32  ;;  %v3220_v31 = vld [vmem:[%s3804_s1 + $0x60] sm:$0xff] }
  0xfa   :  { %2293 = vmatprep.subr.bf16.mxu1 %v2292_v37  ;;  %v452_v63 = vmul.f32 %v359_v12, %v3220_v31 }
  0xfc   :  { %2263 = vmatpush3.bf16.msra.mxu0 %v2262_v48 }
  0xfd   :  { %2295 = vmatpush3.bf16.msra.mxu1 %v2294_v51  ;;  %2265 = vmatprep.subr.bf16.mxu0 %v2264_v54 }
  0xfe   :  { %2297 = vmatprep.subr.bf16.mxu1 %v2296_v58 }
 0x100   :  { %2267 = vmatpush3.bf16.msra.mxu0 %v2266_v1 }
 0x101   :  { %2299 = vmatpush3.bf16.msra.mxu1 %v2298_v4  ;;  %2269 = vmatprep.subr.bf16.mxu0 %v2268_v5 }
 0x102   :  { %2301 = vmatprep.subr.bf16.mxu1 %v2300_v14 }
 0x104   :  { %2271 = vmatpush3.bf16.msra.mxu0 %v2270_v18  ;;  %v899_v18 = vld [vmem:[%s3808_s5 + $0x18] sm:$0xff] }
 0x105   :  { %2303 = vmatpush3.bf16.msra.mxu1 %v2302_v49  ;;  %v2308_v19 = vpack.c.bf16 %v899_v18, %v898_v16  ;;  %2305 = vmatprep.subr.bf16.mxu0 %v2304_v17  ;;  %v993_v16 = vld [vmem:[%s3809_s6 + $0x30] sm:$0xff]  ;;  %v1008_v18 = vld [vmem:[%s3809_s6 + $0xa8] sm:$0xff] }
 0x107   :  { %799 = vmatmul.mubr.f32.vlgmr.msra.gmra.mrb[12].mxu0 %v444_v33 }
 0x108   :  { %874 = vmatmul.mubr.f32.vlgmr.msra.gmra.mrb[12].mxu1 %v446_v6  ;;  %803 = vmatprep.mubr.f32.mxu0 %v453_v24 }
 0x109   :  { %878 = vmatprep.mubr.f32.mxu1 %v455_v29  ;;  %2307 = vmatpush3.bf16.msra.mxu0 %v2304_v17  ;;  %v1001_v17 = vld [vmem:[%s3809_s6 + $0x70] sm:$0xff] }
 0x10a   :  { %2309 = vmatprep.subr.bf16.mxu0 %v2308_v19 }
 0x10b   :  { %804 = vmatmul.mubr.f32.gmra.mrb[14].mxu0 %v452_v63  ;;  %v996_v63 = vld [vmem:[%s3809_s6 + $0x48] sm:$0xff] }
 0x10c   :  { %879 = vmatmul.mubr.f32.gmra.mrb[14].mxu1 %v454_v8  ;;  %v988_v8 = vld [vmem:[%s3809_s6 + $0x8] sm:$0xff] }
 0x10d   :  { %1089 = vmatprep.mubr.f32.mxu1 %v2511_v7  ;;  %2311 = vmatpush3.bf16.msra.mxu0 %v2308_v19  ;;  %v1016_v19 = vld [vmem:[%s3809_s6 + $0xe8] sm:$0xff] }
 0x1ba   :  { %v1855_v32 = vpop.f32.mrb[8].mxu0 }
 0x1bb   :  { %v1893_v34 = vpop.f32.mrb[8].mxu1  ;;  %v1856_v35 = vpop.f32.mrb[9].mxu0 }
 0x1bc   :  { %v1857_v36 = vadd.f32 %v1856_v35, %v1855_v32  ;;  %v1894_v37 = vpop.f32.mrb[9].mxu1  ;;  %v990_v32 = vld [vmem:[%s3809_s6 + $0x18] sm:$0xff]  ;;  %v987_v35 = vld [vmem:[%s3809_s6] sm:$0xff] }
 0x1bd   :  { %v1895_v38 = vadd.f32 %v1894_v37, %v1893_v34  ;;  %v2312_v34 = vpack.c.bf16 %v996_v63, %v988_v8  ;;  %v998_v37 = vld [vmem:[%s3809_s6 + $0x58] sm:$0xff]  ;;  %v1015_v63 = vld [vmem:[%s3809_s6 + $0xe0] sm:$0xff] }
 0x1be   :  { %v1858_v40 = vpop.f32.mrb[10].mxu0 }
 0x1bf   :  { %v726_v43 = vadd.f32 %v1895_v38, %v1857_v36  ;;  %v1896_v44 = vpop.f32.mrb[10].mxu1  ;;  %v1859_v45 = vpop.f32.mrb[11].mxu0  ;;  %v995_v36 = vld [vmem:[%s3809_s6 + $0x40] sm:$0xff]  ;;  %2313 = vmatprep.subr.bf16.mxu1 %v2312_v34  ;;  %v1017_v34 = vld [vmem:[%s3809_s6 + $0xf0] sm:$0xff] }
 0x1c0   :  { %v1860_v48 = vadd.f32 %v1859_v45, %v1858_v40  ;;  %v1897_v50 = vpop.f32.mrb[11].mxu1  ;;  %v2314_v38 = vpack.c.bf16 %v995_v36, %v987_v35  ;;  %v2320_v40 = vpack.c.bf16 %v998_v37, %v990_v32  ;;  %v1009_v32 = vld [vmem:[%s3809_s6 + $0xb0] sm:$0xff]  ;;  %v2332_v36 = vpack.c.bf16 %v1016_v19, %v1008_v18 }
 0x1c1   :  { %v1898_v51 = vadd.f32 %v1897_v50, %v1896_v44  ;;  %v997_v44 = vld [vmem:[%s3809_s6 + $0x50] sm:$0xff]  ;;  %v1012_v50 = vld [vmem:[%s3809_s6 + $0xc8] sm:$0xff] }
 0x1c2   :  { %2315 = vmatpush1.bf16.msra.mxu1 %v2314_v38  ;;  %2321 = vmatprep.subr.bf16.mxu0 %v2320_v40  ;;  %v1365_v38 = vld [vmem:[%s3810_s7 + $0x80] sm:$0xff] }
 0x1c3   :  { %v731_v52 = vadd.f32 %v1898_v51, %v1860_v48  ;;  %v1004_v48 = vld [vmem:[%s3809_s6 + $0x88] sm:$0xff]  ;;  %v1006_v51 = vld [vmem:[%s3809_s6 + $0x98] sm:$0xff]  ;;  %v1397_v40 = vld [vmem:[%s3810_s7 + $0x180] sm:$0xff] }
 0x1da   :  { %v1931_v54 = vpop.f32.mrb[12].mxu0 }
 0x1db   :  { %v1969_v55 = vpop.f32.mrb[12].mxu1  ;;  %v1932_v56 = vpop.f32.mrb[13].mxu0 }
 0x1dc   :  { %v1933_v57 = vadd.f32 %v1932_v56, %v1931_v54  ;;  %v1970_v58 = vpop.f32.mrb[13].mxu1  ;;  %v1003_v54 = vld [vmem:[%s3809_s6 + $0x80] sm:$0xff]  ;;  %v1014_v56 = vld [vmem:[%s3809_s6 + $0xd8] sm:$0xff] }
 0x1dd   :  { %v1971_v59 = vadd.f32 %v1970_v58, %v1969_v55  ;;  %v1011_v55 = vld [vmem:[%s3809_s6 + $0xc0] sm:$0xff]  ;;  %v2324_v58 = vpack.c.bf16 %v1014_v56, %v1006_v51  ;;  %v1350_v51 = vld [vmem:[%s3810_s7 + $0x8] sm:$0xff]  ;;  %v1367_v56 = vld [vmem:[%s3810_s7 + $0x90] sm:$0xff] }
 0x1de   :  { %v801_v28 = vadd.f32 %v1933_v57, %v726_v43  ;;  %v1934_v60 = vpop.f32.mrb[14].mxu0  ;;  %v989_v43 = vld [vmem:[%s3809_s6 + $0x10] sm:$0xff]  ;;  %v2318_v57 = vpack.c.bf16 %v1011_v55, %v1003_v54  ;;  %v1381_v55 = vld [vmem:[%s3810_s7 + $0x100] sm:$0xff] }
 0x1df   :  { %v1972_v61 = vpop.f32.mrb[14].mxu1  ;;  %v1935_v62 = vpop.f32.mrb[15].mxu0  ;;  %v2322_v45 = vpack.c.bf16 %v997_v44, %v989_v43  ;;  %v1398_v43 = vld [vmem:[%s3810_s7 + $0x188] sm:$0xff] }
 0x1e0   :  { %v1936_v0 = vadd.f32 %v1935_v62, %v1934_v60  ;;  %v1973_v1 = vpop.f32.mrb[15].mxu1  ;;  %v876_v3 = vadd.f32 %v1971_v59, %v801_v28  ;;  %v1005_v59 = vld [vmem:[%s3809_s6 + $0x90] sm:$0xff]  ;;  %v1000_v62 = vld [vmem:[%s3809_s6 + $0x68] sm:$0xff]  ;;  %v2376_v54 = vpack.c.bf16 %v1398_v43, %v1397_v40  ;;  %v1405_v40 = vld [vmem:[%s3810_s7 + $0x1c0] sm:$0xff] }
 0x1e1   :  { %v1974_v4 = vadd.f32 %v1973_v1, %v1972_v61  ;;  %v1013_v28 = vld [vmem:[%s3809_s6 + $0xd0] sm:$0xff]  ;;  %v992_v61 = vld [vmem:[%s3809_s6 + $0x28] sm:$0xff] }
 0x1e2   :  { %v806_v5 = vadd.f32 %v1936_v0, %v731_v52  ;;  %v884_v9 = vsel %vm125_vm0, %v876_v3, -inf  ;;  %v2316_v52 = vpack.c.bf16 %v1012_v50, %v1004_v48  ;;  %v2326_v60 = vpack.c.bf16 %v1013_v28, %v1005_v59  ;;  %v994_v0 = vld [vmem:[%s3809_s6 + $0x38] sm:$0xff]  ;;  %v1349_v50 = vld [vmem:[%s3810_s7] sm:$0xff]  ;;  %v1406_v43 = vld [vmem:[%s3810_s7 + $0x1c8] sm:$0xff] }
 0x1e3   :  { %885 = vmax.xlane.f32.xlu0 %v884_v9  ;;  %v2328_v1 = vpack.c.bf16 %v1000_v62, %v992_v61  ;;  %v1400_v59 = vld [vmem:[%s3810_s7 + $0x198] sm:$0xff]  ;;  %v2346_v28 = vpack.c.bf16 %v1350_v51, %v1349_v50  ;;  %v1351_v61 = vld [vmem:[%s3810_s7 + $0x10] sm:$0xff]  ;;  %v1358_v50 = vld [vmem:[%s3810_s7 + $0x48] sm:$0xff] }
 0x1e4   :  { %v881_v10 = vadd.f32 %v1974_v4, %v806_v5  ;;  %2317 = vmatprep.subr.bf16.mxu1 %v2316_v52  ;;  %v1352_v62 = vld [vmem:[%s3810_s7 + $0x18] sm:$0xff] }
 0x1e5   :  { %2319 = vmatpush1.bf16.msra.mxu1 %v2318_v57  ;;  %v1368_v57 = vld [vmem:[%s3810_s7 + $0x98] sm:$0xff] }
 0x1e6   :  { %v887_v14 = vsel %vm125_vm0, %v881_v10, -inf  ;;  %2329 = vmatprep.subr.bf16.mxu1 %v2328_v1 }
 0x1e7   :  { %888 = vmax.xlane.f32.xlu0 %v887_v14 }
 0x270   :  { %v886_v49 = vpop.xlane.xlu0 %885 }
 0x271   :  { %v890_v23 = vsub.f32 %v876_v3, %v886_v49  ;;  %v1002_v3 = vld [vmem:[%s3809_s6 + $0x78] sm:$0xff] }
 0x272   :  { %v2336_v4 = vpack.c.bf16 %v1002_v3, %v994_v0  ;;  %v1010_v49 = vld [vmem:[%s3809_s6 + $0xb8] sm:$0xff]  ;;  %v2348_v0 = vpack.c.bf16 %v1368_v57, %v1367_v56  ;;  %v1383_v3 = vld [vmem:[%s3810_s7 + $0x110] sm:$0xff] }
 0x273   :  { %v892_v6 = vmul.f32 1.442695, %v890_v23  ;;  %v1018_v23 = vld [vmem:[%s3809_s6 + $0xf8] sm:$0xff]  ;;  %v1407_v57 = vld [vmem:[%s3810_s7 + $0x1d0] sm:$0xff] }
 0x274   :  { %v889_v24 = vpop.xlane.xlu0 %888  ;;  %v2340_v37 = vpack.c.bf16 %v1018_v23, %v1010_v49  ;;  %v1386_v49 = vld [vmem:[%s3810_s7 + $0x128] sm:$0xff]  ;;  %v1371_v23 = vld [vmem:[%s3810_s7 + $0xb0] sm:$0xff]  ;;  %v1376_v56 = vld [vmem:[%s3810_s7 + $0xd8] sm:$0xff] }
 0x275   :  { %2476 = vpow2.f32 %v892_v6  ;;  %v891_v25 = vsub.f32 %v881_v10, %v889_v24  ;;  %v2330_v24 = vpack.c.bf16 %v999_v30, %v991_v15  ;;  %v2350_v15 = vpack.c.bf16 %v1352_v62, %v1351_v61  ;;  %v1360_v61 = vld [vmem:[%s3810_s7 + $0x58] sm:$0xff] }
 0x277   :  { %v894_v33 = vmul.f32 1.442695, %v891_v25  ;;  %v2338_v25 = vpack.c.bf16 %v1001_v17, %v993_v16  ;;  %v1353_v16 = vld [vmem:[%s3810_s7 + $0x20] sm:$0xff]  ;;  %v1354_v17 = vld [vmem:[%s3810_s7 + $0x28] sm:$0xff] }
 0x279   :  { %2478 = vpow2.f32 %v894_v33  ;;  %v1007_v33 = vld [vmem:[%s3809_s6 + $0xa0] sm:$0xff] }
 0x27a   :  { %v2334_v44 = vpack.c.bf16 %v1015_v63, %v1007_v33  ;;  %v2354_v33 = vpack.c.bf16 %v1354_v17, %v1353_v16  ;;  %v1355_v63 = vld [vmem:[%s3810_s7 + $0x30] sm:$0xff] }
 0x27f   :  { %v3239_v12 = vpop.eup %2476 }
 0x280   :  { %2141 = vmatprep.mubr.msk.f32.mxu0 %vm125_vm0, %v3239_v12 }
 0x283   :  { %v3243_v29 = vpop.eup %2478 }
 0x284   :  { %2142 = vmatmul.mubr.msk.f32.vlgmr.msra.gmra.mrb[16].mxu0 %vm125_vm0, %v3243_v29 }
 0x285   :  { %1166 = vmatprep.mubr.f32.mxu0 %v2511_v7  ;;  %2323 = vmatpush1.bf16.msra.mxu0 %v2322_v45  ;;  %v2342_v45 = vpack.c.bf16 %v1017_v34, %v1009_v32  ;;  %v1356_v32 = vld [vmem:[%s3810_s7 + $0x38] sm:$0xff] }
 0x286   :  { %2325 = vmatprep.subr.bf16.mxu0 %v2324_v58  ;;  %v1399_v58 = vld [vmem:[%s3810_s7 + $0x190] sm:$0xff] }
 0x287   :  { %v2380_v1 = vpack.c.bf16 %v1400_v59, %v1399_v58  ;;  %v1408_v58 = vld [vmem:[%s3810_s7 + $0x1d8] sm:$0xff] }
 0x289   :  { %2327 = vmatpush1.bf16.msra.mxu0 %v2326_v60 }
 0x28a   :  { %2337 = vmatprep.subr.bf16.mxu0 %v2336_v4  ;;  %v1384_v4 = vld [vmem:[%s3810_s7 + $0x118] sm:$0xff] }
 0x28b   :  { %v2382_v30 = vpack.c.bf16 %v1384_v4, %v1383_v3  ;;  %v1392_v3 = vld [vmem:[%s3810_s7 + $0x158] sm:$0xff]  ;;  %v1377_v4 = vld [vmem:[%s3810_s7 + $0xe0] sm:$0xff] }
 0x357   :  { %v2143_v5 = vpop.f32.mrb[16].mxu0 }
 0x358   :  { %v972_v9 = vpop.f32.mrb[17].mxu0  ;;  %v982_v10 = vmax.f32 %v2143_v5, 1e-20  ;;  %v1369_v5 = vld [vmem:[%s3810_s7 + $0xa0] sm:$0xff] }
 0x359   :  { %v981_v14 = vmax.f32 %v972_v9, 1e-20  ;;  %v1370_v9 = vld [vmem:[%s3810_s7 + $0xa8] sm:$0xff] }
 0x35a   :  { %v2352_v18 = vpack.c.bf16 %v1370_v9, %v1369_v5  ;;  %v1378_v5 = vld [vmem:[%s3810_s7 + $0xe8] sm:$0xff]  ;;  %v1409_v9 = vld [vmem:[%s3810_s7 + $0x1e0] sm:$0xff] }
 0x35b   :  { %2480 = vrcp.f32 %v981_v14  ;;  %v1402_v14 = vld [vmem:[%s3810_s7 + $0x1a8] sm:$0xff]  ;;  %v2368_v16 = vpack.c.bf16 %v1378_v5, %v1377_v4  ;;  %v1416_v4 = vld [vmem:[%s3810_s7 + $0x218] sm:$0xff]  ;;  %v1447_v5 = vld [vmem:[%s3810_s7 + $0x310] sm:$0xff] }
 0x35c   :  { %2482 = vrcp.f32 %v982_v10  ;;  %v1401_v10 = vld [vmem:[%s3810_s7 + $0x1a0] sm:$0xff] }
 0x35d   :  { %v2384_v19 = vpack.c.bf16 %v1402_v14, %v1401_v10  ;;  %v1410_v10 = vld [vmem:[%s3810_s7 + $0x1e8] sm:$0xff] }
 0x35e   :  { %v2400_v17 = vpack.c.bf16 %v1410_v10, %v1409_v9  ;;  %v1448_v9 = vld [vmem:[%s3810_s7 + $0x318] sm:$0xff] }
 0x365   :  { %v2481_v6 = vpop.eup %2480 }
 0x366   :  { %v985_v8 = vmul.f32 %v2481_v6, %v3239_v12  ;;  %v2483_v35 = vpop.eup %2482  ;;  %v1366_v12 = vld [vmem:[%s3810_s7 + $0x88] sm:$0xff]  ;;  %v1372_v6 = vld [vmem:[%s3810_s7 + $0xb8] sm:$0xff] }
 0x367   :  { %v986_v48 = vmul.f32 %v2483_v35, %v3243_v29  ;;  %v2344_v52 = vpack.c.bf16 %v1366_v12, %v1365_v38  ;;  %v1382_v29 = vld [vmem:[%s3810_s7 + $0x108] sm:$0xff]  ;;  %v2356_v34 = vpack.c.bf16 %v1372_v6, %v1371_v23  ;;  %v1373_v38 = vld [vmem:[%s3810_s7 + $0xc0] sm:$0xff]  ;;  %v1379_v6 = vld [vmem:[%s3810_s7 + $0xf0] sm:$0xff] }
 0x368   :  { %1814 = vmatmul.mubr.msk.f32.vlgmr.msra.gmra.mrb[16].mxu1 %vm125_vm0, %v985_v8  ;;  %1816 = vmatmul.mubr.msk.f32.vlgmr.msra.gmra.mrb[18].mxu0 %vm125_vm0, %v985_v8  ;;  %v2378_v60 = vpack.c.bf16 %v1382_v29, %v1381_v55  ;;  %v1374_v12 = vld [vmem:[%s3810_s7 + $0xc8] sm:$0xff]  ;;  %v1375_v29 = vld [vmem:[%s3810_s7 + $0xd0] sm:$0xff] }
 0x369   :  { %2331 = vmatpush1.bf16.msra.mxu1 %v2330_v24  ;;  %2339 = vmatpush1.bf16.msra.mxu0 %v2338_v25  ;;  %v1403_v24 = vld [vmem:[%s3810_s7 + $0x1b0] sm:$0xff]  ;;  %v1404_v25 = vld [vmem:[%s3810_s7 + $0x1b8] sm:$0xff]  ;;  %v2360_v51 = vpack.c.bf16 %v1374_v12, %v1373_v38  ;;  %v1390_v55 = vld [vmem:[%s3810_s7 + $0x148] sm:$0xff]  ;;  %v2364_v62 = vpack.c.bf16 %v1376_v56, %v1375_v29 }
 0x36a   :  { %1095 = vmatprep.mubr.f32.mxu1 %v2511_v7  ;;  %1172 = vmatprep.mubr.f32.mxu0 %v2511_v7  ;;  %v2388_v35 = vpack.c.bf16 %v1404_v25, %v1403_v24  ;;  %v1380_v24 = vld [vmem:[%s3810_s7 + $0xf8] sm:$0xff]  ;;  %v1411_v25 = vld [vmem:[%s3810_s7 + $0x1f0] sm:$0xff]  ;;  %v1429_v12 = vld [vmem:[%s3810_s7 + $0x280] sm:$0xff] }
 0x36b   :  { %2333 = vmatprep.subr.bf16.mxu1 %v2332_v36  ;;  %2341 = vmatprep.subr.bf16.mxu0 %v2340_v37  ;;  %v1387_v36 = vld [vmem:[%s3810_s7 + $0x130] sm:$0xff]  ;;  %v1388_v37 = vld [vmem:[%s3810_s7 + $0x138] sm:$0xff] }
 0x36c   :  { %1815 = vmatmul.mubr.msk.f32.gmra.mrb[18].mxu1 %vm125_vm0, %v986_v48  ;;  %1817 = vmatmul.mubr.msk.f32.gmra.mrb[20].mxu0 %vm125_vm0, %v986_v48 }
 0x36d   :  { %2335 = vmatpush1.bf16.msra.mxu1 %v2334_v44  ;;  %2343 = vmatpush1.bf16.msra.mxu0 %v2342_v45  ;;  %v2358_v44 = vpack.c.bf16 %v1356_v32, %v1355_v63  ;;  %v2390_v45 = vpack.c.bf16 %v1388_v37, %v1387_v36  ;;  %v1363_v63 = vld [vmem:[%s3810_s7 + $0x70] sm:$0xff]  ;;  %v1364_v32 = vld [vmem:[%s3810_s7 + $0x78] sm:$0xff] }
 0x36e   :  { %1243 = vmatprep.mubr.f32.mxu1 %v2511_v7  ;;  %1320 = vmatprep.mubr.f32.mxu0 %v2511_v7  ;;  %v1395_v36 = vld [vmem:[%s3810_s7 + $0x170] sm:$0xff]  ;;  %v1396_v37 = vld [vmem:[%s3810_s7 + $0x178] sm:$0xff] }
 0x36f   :  { %2345 = vmatprep.subr.bf16.mxu1 %v2344_v52  ;;  %2377 = vmatprep.subr.bf16.mxu0 %v2376_v54  ;;  %v2392_v52 = vpack.c.bf16 %v1406_v43, %v1405_v40  ;;  %v1389_v54 = vld [vmem:[%s3810_s7 + $0x140] sm:$0xff]  ;;  %v2406_v38 = vpack.c.bf16 %v1396_v37, %v1395_v36  ;;  %v1430_v40 = vld [vmem:[%s3810_s7 + $0x288] sm:$0xff]  ;;  %v1435_v36 = vld [vmem:[%s3810_s7 + $0x2b0] sm:$0xff] }
 0x370   :  { %1818 = vmatmul.mubr.msk.f32.vlgmr.msra.gmra.mrb[20].mxu1 %vm125_vm0, %v985_v8  ;;  %1820 = vmatmul.mubr.msk.f32.vlgmr.msra.gmra.mrb[22].mxu0 %vm125_vm0, %v985_v8  ;;  %v1461_v43 = vld [vmem:[%s3810_s7 + $0x380] sm:$0xff] }
 0x371   :  { %1249 = vmatprep.mubr.f32.mxu1 %v2511_v7  ;;  %1326 = vmatprep.mubr.f32.mxu0 %v2511_v7  ;;  %v1385_v7 = vld [vmem:[%s3810_s7 + $0x120] sm:$0xff] }
 0x372   :  { %2347 = vmatpush3.bf16.msra.mxu1 %v2346_v28  ;;  %2379 = vmatpush3.bf16.msra.mxu0 %v2378_v60  ;;  %v2386_v8 = vpack.c.bf16 %v1386_v49, %v1385_v7  ;;  %v2394_v28 = vpack.c.bf16 %v1390_v55, %v1389_v54  ;;  %v1359_v60 = vld [vmem:[%s3810_s7 + $0x50] sm:$0xff]  ;;  %v1394_v7 = vld [vmem:[%s3810_s7 + $0x168] sm:$0xff] }
 0x373   :  { %2349 = vmatprep.subr.bf16.mxu1 %v2348_v0  ;;  %2381 = vmatprep.subr.bf16.mxu0 %v2380_v1  ;;  %v2396_v0 = vpack.c.bf16 %v1408_v58, %v1407_v57  ;;  %v1391_v1 = vld [vmem:[%s3810_s7 + $0x150] sm:$0xff]  ;;  %v2366_v14 = vpack.c.bf16 %v1360_v61, %v1359_v60  ;;  %v1446_v54 = vld [vmem:[%s3810_s7 + $0x308] sm:$0xff]  ;;  %v1432_v57 = vld [vmem:[%s3810_s7 + $0x298] sm:$0xff] }
 0x374   :  { %1819 = vmatmul.mubr.msk.f32.gmra.mrb[22].mxu1 %vm125_vm0, %v986_v48  ;;  %1821 = vmatmul.mubr.msk.f32.gmra.mrb[24].mxu0 %vm125_vm0, %v986_v48  ;;  %v1357_v48 = vld [vmem:[%s3810_s7 + $0x40] sm:$0xff]  ;;  %v1431_v55 = vld [vmem:[%s3810_s7 + $0x290] sm:$0xff] }
 0x375   :  { %v2362_v59 = vpack.c.bf16 %v1358_v50, %v1357_v48  ;;  %v1413_v50 = vld [vmem:[%s3810_s7 + $0x200] sm:$0xff]  ;;  %v1463_v58 = vld [vmem:[%s3810_s7 + $0x390] sm:$0xff] }
 0x376   :  { %2351 = vmatpush3.bf16.msra.mxu1 %v2350_v15  ;;  %2383 = vmatpush3.bf16.msra.mxu0 %v2382_v30  ;;  %v2398_v15 = vpack.c.bf16 %v1392_v3, %v1391_v1  ;;  %v1361_v30 = vld [vmem:[%s3810_s7 + $0x60] sm:$0xff]  ;;  %v1415_v61 = vld [vmem:[%s3810_s7 + $0x210] sm:$0xff] }
 0x377   :  { %2353 = vmatprep.subr.bf16.mxu1 %v2352_v18  ;;  %2385 = vmatprep.subr.bf16.mxu0 %v2384_v19  ;;  %v1362_v18 = vld [vmem:[%s3810_s7 + $0x68] sm:$0xff]  ;;  %v1393_v19 = vld [vmem:[%s3810_s7 + $0x160] sm:$0xff] }
 0x378   :  { %v2370_v49 = vpack.c.bf16 %v1362_v18, %v1361_v30  ;;  %v2402_v23 = vpack.c.bf16 %v1394_v7, %v1393_v19  ;;  %v1433_v30 = vld [vmem:[%s3810_s7 + $0x2a0] sm:$0xff]  ;;  %v1466_v19 = vld [vmem:[%s3810_s7 + $0x3a8] sm:$0xff] }
 0x37a   :  { %2355 = vmatpush3.bf16.msra.mxu1 %v2354_v33  ;;  %2387 = vmatpush3.bf16.msra.mxu0 %v2386_v8  ;;  %v2372_v33 = vpack.c.bf16 %v1380_v24, %v1379_v6  ;;  %v1412_v8 = vld [vmem:[%s3810_s7 + $0x1f8] sm:$0xff]  ;;  %v2446_v6 = vpack.c.bf16 %v1448_v9, %v1447_v5  ;;  %v1453_v9 = vld [vmem:[%s3810_s7 + $0x340] sm:$0xff] }
 0x37b   :  { %2357 = vmatprep.subr.bf16.mxu1 %v2356_v34  ;;  %2389 = vmatprep.subr.bf16.mxu0 %v2388_v35  ;;  %v2404_v34 = vpack.c.bf16 %v1412_v8, %v1411_v25  ;;  %v2374_v35 = vpack.c.bf16 %v1364_v32, %v1363_v63  ;;  %v1417_v8 = vld [vmem:[%s3810_s7 + $0x220] sm:$0xff]  ;;  %v1418_v63 = vld [vmem:[%s3810_s7 + $0x228] sm:$0xff] }
 0x37e   :  { %2359 = vmatpush3.bf16.msra.mxu1 %v2358_v44  ;;  %2391 = vmatpush3.bf16.msra.mxu0 %v2390_v45  ;;  %v2408_v44 = vpack.c.bf16 %v1430_v40, %v1429_v12  ;;  %v1462_v45 = vld [vmem:[%s3810_s7 + $0x388] sm:$0xff]  ;;  %v1468_v12 = vld [vmem:[%s3810_s7 + $0x3b8] sm:$0xff] }
 0x37f   :  { %2361 = vmatprep.subr.bf16.mxu1 %v2360_v51  ;;  %2393 = vmatprep.subr.bf16.mxu0 %v2392_v52  ;;  %v2440_v48 = vpack.c.bf16 %v1462_v45, %v1461_v43  ;;  %v1414_v51 = vld [vmem:[%s3810_s7 + $0x208] sm:$0xff]  ;;  %v1445_v52 = vld [vmem:[%s3810_s7 + $0x300] sm:$0xff] }
 0x380   :  { %v2410_v1 = vpack.c.bf16 %v1414_v51, %v1413_v50  ;;  %v2442_v3 = vpack.c.bf16 %v1446_v54, %v1445_v52  ;;  %v1419_v51 = vld [vmem:[%s3810_s7 + $0x230] sm:$0xff]  ;;  %v1420_v52 = vld [vmem:[%s3810_s7 + $0x238] sm:$0xff] }
 0x382   :  { %2363 = vmatpush3.bf16.msra.mxu1 %v2362_v59  ;;  %2395 = vmatpush3.bf16.msra.mxu0 %v2394_v28  ;;  %v1464_v59 = vld [vmem:[%s3810_s7 + $0x398] sm:$0xff] }
 0x383   :  { %2365 = vmatprep.subr.bf16.mxu1 %v2364_v62  ;;  %2397 = vmatprep.subr.bf16.mxu0 %v2396_v0 }
 0x386   :  { %2367 = vmatpush3.bf16.msra.mxu1 %v2366_v14  ;;  %2399 = vmatpush3.bf16.msra.mxu0 %v2398_v15  ;;  %v2412_v14 = vpack.c.bf16 %v1432_v57, %v1431_v55  ;;  %v2444_v15 = vpack.c.bf16 %v1464_v59, %v1463_v58  ;;  %v1438_v58 = vld [vmem:[%s3810_s7 + $0x2c8] sm:$0xff]  ;;  %v1469_v59 = vld [vmem:[%s3810_s7 + $0x3c0] sm:$0xff] }
 0x387   :  { %2369 = vmatprep.subr.bf16.mxu1 %v2368_v16  ;;  %2401 = vmatprep.subr.bf16.mxu0 %v2400_v17  ;;  %v1434_v16 = vld [vmem:[%s3810_s7 + $0x2a8] sm:$0xff] }
 0x38a   :  { %2371 = vmatpush3.bf16.msra.mxu1 %v2370_v49  ;;  %2403 = vmatpush3.bf16.msra.mxu0 %v2402_v23  ;;  %v2414_v23 = vpack.c.bf16 %v1416_v4, %v1415_v61 }
 0x38b   :  { %2373 = vmatprep.subr.bf16.mxu1 %v2372_v33  ;;  %2405 = vmatprep.subr.bf16.mxu0 %v2404_v34  ;;  %v2416_v33 = vpack.c.bf16 %v1434_v16, %v1433_v30 }
 0x38e   :  { %2375 = vmatpush3.bf16.msra.mxu1 %v2374_v35  ;;  %2407 = vmatpush3.bf16.msra.mxu0 %v2406_v38  ;;  %v1450_v35 = vld [vmem:[%s3810_s7 + $0x328] sm:$0xff]  ;;  %v1467_v38 = vld [vmem:[%s3810_s7 + $0x3b0] sm:$0xff] }
 0x38f   :  { %2409 = vmatprep.subr.bf16.mxu1 %v2408_v44  ;;  %2441 = vmatprep.subr.bf16.mxu0 %v2440_v48  ;;  %v2418_v44 = vpack.c.bf16 %v1418_v63, %v1417_v8  ;;  %v2452_v55 = vpack.c.bf16 %v1468_v12, %v1467_v38  ;;  %v1425_v63 = vld [vmem:[%s3810_s7 + $0x260] sm:$0xff]  ;;  %v1475_v38 = vld [vmem:[%s3810_s7 + $0x3f0] sm:$0xff]  ;;  %v1476_v12 = vld [vmem:[%s3810_s7 + $0x3f8] sm:$0xff] }
 0x43b   :  { %v1091_v29 = vpop.f32.mrb[16].mxu1  ;;  %v1168_v56 = vpop.f32.mrb[18].mxu0 }
 0x43c   :  { %v1093_v28 = vpop.f32.mrb[17].mxu1  ;;  %v1170_v60 = vpop.f32.mrb[19].mxu0  ;;  %v1333_v10 = vmul.f32 %v1091_v29, %v2914_v39  ;;  %v1465_v39 = vld [vmem:[%s3810_s7 + $0x3a0] sm:$0xff] }
 0x43d   :  { %v1334_v62 = vmul.f32 %v1093_v28, %v2919_v41  ;;  %v1336_v0 = vmul.f32 %v1170_v60, %v2930_v47  ;;  %v2484_v41 = vld [vmem:[%s3804_s1 + $0x10] sm:$0xff]  ;;  %v1437_v29 = vld [vmem:[%s3810_s7 + $0x2c0] sm:$0xff]  ;;  %v1470_v28 = vld [vmem:[%s3810_s7 + $0x3c8] sm:$0xff] }
 0x43e   :  { %v1335_v47 = vmul.f32 %v2484_v41, %v1168_v56  ;;  %v2424_v4 = vpack.c.bf16 %v1438_v58, %v1437_v29  ;;  %v2456_v5 = vpack.c.bf16 %v1470_v28, %v1469_v59  ;;  %v1439_v41 = vld [vmem:[%s3810_s7 + $0x2d0] sm:$0xff] }
 0x43f   :  { %v1097_v17 = vpop.f32.mrb[18].mxu1  ;;  %v1174_v18 = vpop.f32.mrb[20].mxu0  ;;  %1548 = vmatprep.mubr.f32.mxu1 %v1334_v62  ;;  %1623 = vmatprep.mubr.f32.mxu0 %v1336_v0  ;;  %v2422_v62 = vpack.c.bf16 %v1420_v52, %v1419_v51  ;;  %v1459_v51 = vld [vmem:[%s3810_s7 + $0x370] sm:$0xff]  ;;  %v1460_v52 = vld [vmem:[%s3810_s7 + $0x378] sm:$0xff] }
 0x440   :  { %v1099_v7 = vpop.f32.mrb[19].mxu1  ;;  %v1176_v49 = vpop.f32.mrb[21].mxu0  ;;  %1549 = vmatmul.mubr.f32.vlgmr.msra.gmra.mrb[24].mxu1 %v1333_v10  ;;  %1624 = vmatmul.mubr.f32.vlgmr.msra.gmra.mrb[26].mxu0 %v1335_v47  ;;  %v1341_v32 = vmul.f32 %v1097_v17, %v2970_v2  ;;  %v1343_v34 = vmul.f32 %v1174_v18, %v2981_v11  ;;  %v1436_v11 = vld [vmem:[%s3810_s7 + $0x2b8] sm:$0xff]  ;;  %v1454_v10 = vld [vmem:[%s3810_s7 + $0x348] sm:$0xff]  ;;  %v1423_v17 = vld [vmem:[%s3810_s7 + $0x250] sm:$0xff] }
 0x441   :  { %v1342_v24 = vmul.f32 %v1099_v7, %v2986_v13  ;;  %v1344_v25 = vmul.f32 %v1176_v49, %v2999_v21  ;;  %2411 = vmatpush3.bf16.msra.mxu1 %v2410_v1  ;;  %2443 = vmatpush3.bf16.msra.mxu0 %v2442_v3  ;;  %v2448_v13 = vpack.c.bf16 %v1466_v19, %v1465_v39  ;;  %v1449_v21 = vld [vmem:[%s3810_s7 + $0x320] sm:$0xff]  ;;  %v1422_v3 = vld [vmem:[%s3810_s7 + $0x248] sm:$0xff]  ;;  %v1440_v47 = vld [vmem:[%s3810_s7 + $0x2d8] sm:$0xff] }
 0x442   :  { %2413 = vmatprep.subr.bf16.mxu1 %v2412_v14  ;;  %2445 = vmatprep.subr.bf16.mxu0 %v2444_v15  ;;  %v2450_v50 = vpack.c.bf16 %v1450_v35, %v1449_v21  ;;  %v2420_v54 = vpack.c.bf16 %v1436_v11, %v1435_v36  ;;  %v1421_v1 = vld [vmem:[%s3810_s7 + $0x240] sm:$0xff]  ;;  %v1471_v14 = vld [vmem:[%s3810_s7 + $0x3d0] sm:$0xff]  ;;  %v1472_v15 = vld [vmem:[%s3810_s7 + $0x3d8] sm:$0xff]  ;;  %v2458_v16 = vpack.c.bf16 %v1454_v10, %v1453_v9 }
 0x443   :  { %v3637_v37 = vpop.f32.mrb[20].mxu1  ;;  %v3639_v2 = vpop.f32.mrb[22].mxu0  ;;  %1553 = vmatprep.mubr.f32.mxu1 %v1342_v24  ;;  %1628 = vmatprep.mubr.f32.mxu0 %v1344_v25  ;;  %v2426_v30 = vpack.c.bf16 %v1422_v3, %v1421_v1  ;;  %v1424_v18 = vld [vmem:[%s3810_s7 + $0x258] sm:$0xff]  ;;  %v2428_v39 = vpack.c.bf16 %v1440_v47, %v1439_v41  ;;  %v2460_v19 = vpack.c.bf16 %v1472_v15, %v1471_v14  ;;  %v1455_v7 = vld [vmem:[%s3810_s7 + $0x350] sm:$0xff]  ;;  %v1473_v24 = vld [vmem:[%s3810_s7 + $0x3e0] sm:$0xff] }
 0x444   :  { %v1247_v40 = vpop.f32.mrb[21].mxu1  ;;  %v1324_v43 = vpop.f32.mrb[23].mxu0  ;;  %1554 = vmatmul.mubr.f32.gmra.mrb[26].mxu1 %v1341_v32  ;;  %1629 = vmatmul.mubr.f32.gmra.mrb[28].mxu0 %v1343_v34  ;;  %v1456_v49 = vld [vmem:[%s3810_s7 + $0x358] sm:$0xff]  ;;  %v1474_v25 = vld [vmem:[%s3810_s7 + $0x3e8] sm:$0xff]  ;;  %v1457_v21 = vld [vmem:[%s3810_s7 + $0x360] sm:$0xff] }
 0x445   :  { %v1338_v45 = vmul.f32 %v1247_v40, %v3041_v46  ;;  %v1340_v48 = vmul.f32 %v1324_v43, %v3055_v53  ;;  %2415 = vmatpush3.bf16.msra.mxu1 %v2414_v23  ;;  %2447 = vmatpush3.bf16.msra.mxu0 %v2446_v6  ;;  %v1451_v46 = vld [vmem:[%s3810_s7 + $0x330] sm:$0xff]  ;;  %v1452_v53 = vld [vmem:[%s3810_s7 + $0x338] sm:$0xff]  ;;  %v1441_v23 = vld [vmem:[%s3810_s7 + $0x2e0] sm:$0xff]  ;;  %v2462_v8 = vpack.c.bf16 %v1456_v49, %v1455_v7 }
 0x446   :  { %2417 = vmatprep.subr.bf16.mxu1 %v2416_v33  ;;  %2449 = vmatprep.subr.bf16.mxu0 %v2448_v13  ;;  %v2454_v0 = vpack.c.bf16 %v1452_v53, %v1451_v46  ;;  %v1442_v6 = vld [vmem:[%s3810_s7 + $0x2e8] sm:$0xff]  ;;  %v2430_v33 = vpack.c.bf16 %v1424_v18, %v1423_v17  ;;  %v2464_v13 = vpack.c.bf16 %v1474_v25, %v1473_v24  ;;  %v1443_v36 = vld [vmem:[%s3810_s7 + $0x2f0] sm:$0xff]  ;;  %v1444_v11 = vld [vmem:[%s3810_s7 + $0x2f8] sm:$0xff] }
 0x447   :  { %v3667_v56 = vpop.f32.mrb[22].mxu1  ;;  %v3669_v57 = vpop.f32.mrb[24].mxu0  ;;  %1698 = vmatprep.mubr.f32.mxu1 %v1338_v45  ;;  %1773 = vmatprep.mubr.f32.mxu0 %v1340_v48  ;;  %v1426_v32 = vld [vmem:[%s3810_s7 + $0x268] sm:$0xff]  ;;  %v2432_v34 = vpack.c.bf16 %v1442_v6, %v1441_v23  ;;  %v2436_v45 = vpack.c.bf16 %v1444_v11, %v1443_v36  ;;  %v2468_v48 = vpack.c.bf16 %v1476_v12, %v1475_v38  ;;  %v2485_v49 = vld [vmem:[%s3803_s0] sm:$0xff] }
 0x448   :  { %v3680_v60 = vpop.f32.mrb[23].mxu1  ;;  %v3682_v61 = vpop.f32.mrb[25].mxu0  ;;  %v1458_v35 = vld [vmem:[%s3810_s7 + $0x368] sm:$0xff]  ;;  %v2434_v40 = vpack.c.bf16 %v1426_v32, %v1425_v63  ;;  %v1337_v46 = vmul.f32 %v3637_v37, %v3199_v27  ;;  %v1339_v53 = vmul.f32 %v3639_v2, %v3187_v20  ;;  %v1345_v59 = vmul.f32 %v3667_v56, %v3220_v31 }
 0x449   :  { %2419 = vmatpush3.bf16.msra.mxu1 %v2418_v44  ;;  %2451 = vmatpush3.bf16.msra.mxu0 %v2450_v50  ;;  %v2466_v43 = vpack.c.bf16 %v1458_v35, %v1457_v21  ;;  %v1427_v44 = vld [vmem:[%s3810_s7 + $0x270] sm:$0xff]  ;;  %v1428_v50 = vld [vmem:[%s3810_s7 + $0x278] sm:$0xff]  ;;  %v1346_v29 = vmul.f32 %v3680_v60, %v3192_v22  ;;  %v1348_v58 = vmul.f32 %v3682_v61, %v3204_v42  ;;  %v1822_v22 = vld [vmem:[%s3811_s8] ss:$0 sm:$0xff] }
 0x44a   :  { %2421 = vmatprep.subr.bf16.mxu1 %v2420_v54  ;;  %2453 = vmatprep.subr.bf16.mxu0 %v2452_v55  ;;  %v2438_v54 = vpack.c.bf16 %v1428_v50, %v1427_v44  ;;  %v2470_v55 = vpack.c.bf16 %v1460_v52, %v1459_v51  ;;  %v1347_v28 = vmul.f32 %v3669_v57, %v3214_v26  ;;  %v2486_v25 = vld [vmem:[%s3803_s0 + $0x8] sm:$0xff] }
 0x44d   :  { %2423 = vmatpush3.bf16.msra.mxu1 %v2422_v62  ;;  %2455 = vmatpush3.bf16.msra.mxu0 %v2454_v0 }
 0x44e   :  { %2425 = vmatprep.subr.bf16.mxu1 %v2424_v4  ;;  %2457 = vmatprep.subr.bf16.mxu0 %v2456_v5 }
 0x451   :  { %2427 = vmatpush3.bf16.msra.mxu1 %v2426_v30  ;;  %2459 = vmatpush3.bf16.msra.mxu0 %v2458_v16 }
 0x452   :  { %2429 = vmatprep.subr.bf16.mxu1 %v2428_v39  ;;  %2461 = vmatprep.subr.bf16.mxu0 %v2460_v19 }
 0x455   :  { %2431 = vmatpush3.bf16.msra.mxu1 %v2430_v33  ;;  %2463 = vmatpush3.bf16.msra.mxu0 %v2462_v8 }
 0x456   :  { %2433 = vmatprep.subr.bf16.mxu1 %v2432_v34  ;;  %2465 = vmatprep.subr.bf16.mxu0 %v2464_v13 }
 0x459   :  { %2435 = vmatpush3.bf16.msra.mxu1 %v2434_v40  ;;  %2467 = vmatpush3.bf16.msra.mxu0 %v2466_v43 }
 0x45a   :  { %2437 = vmatprep.subr.bf16.mxu1 %v2436_v45  ;;  %2469 = vmatprep.subr.bf16.mxu0 %v2468_v48 }
 0x45d   :  { %2439 = vmatpush3.bf16.msra.mxu1 %v2438_v54  ;;  %2471 = vmatpush3.bf16.msra.mxu0 %v2470_v55 }
 0x460   :  { %1699 = vmatmul.mubr.f32.vlgmr.msra.gmra.mrb[28].mxu1 %v1337_v46  ;;  %1774 = vmatmul.mubr.f32.vlgmr.msra.gmra.mrb[30].mxu0 %v1339_v53 }
 0x461   :  { %1703 = vmatprep.mubr.f32.mxu1 %v1346_v29  ;;  %1778 = vmatprep.mubr.f32.mxu0 %v1348_v58 }
 0x464   :  { %1704 = vmatmul.mubr.f32.gmra.mrb[30].mxu1 %v1345_v59  ;;  %1779 = vmatmul.mubr.f32.gmra.mrb[32].mxu0 %v1347_v28 }
 0x513   :  { %v2013_v27 = vpop.f32.mrb[24].mxu1  ;;  %v2051_v20 = vpop.f32.mrb[26].mxu0 }
 0x514   :  { %v2014_v37 = vpop.f32.mrb[25].mxu1  ;;  %v2052_v42 = vpop.f32.mrb[27].mxu0 }
 0x515   :  { %v2015_v2 = vadd.f32 %v2014_v37, %v2013_v27  ;;  %v2053_v60 = vadd.f32 %v2052_v42, %v2051_v20 }
 0x517   :  { %v1551_v61 = vadd.f32 %v2015_v2, %v1822_v22  ;;  %v2016_v62 = vpop.f32.mrb[26].mxu1  ;;  %v2054_v0 = vpop.f32.mrb[28].mxu0 }
 0x518   :  { %v2017_v1 = vpop.f32.mrb[27].mxu1  ;;  %v2055_v31 = vpop.f32.mrb[29].mxu0 }
 0x519   :  { %v1626_v56 = vadd.f32 %v2053_v60, %v1551_v61  ;;  %v2018_v3 = vadd.f32 %v2017_v1, %v2016_v62  ;;  %v2056_v26 = vadd.f32 %v2055_v31, %v2054_v0 }
 0x51b   :  { %v1556_v57 = vadd.f32 %v2018_v3, %v1822_v22 }
 0x51d   :  { %v1631_v4 = vadd.f32 %v2056_v26, %v1556_v57 }
 0x533   :  { %v2089_v5 = vpop.f32.mrb[28].mxu1  ;;  %v2127_v9 = vpop.f32.mrb[30].mxu0 }
 0x534   :  { %v2090_v10 = vpop.f32.mrb[29].mxu1  ;;  %v2128_v41 = vpop.f32.mrb[31].mxu0 }
 0x535   :  { %v2091_v47 = vadd.f32 %v2090_v10, %v2089_v5  ;;  %v2129_v14 = vadd.f32 %v2128_v41, %v2127_v9 }
 0x537   :  { %v1701_v15 = vadd.f32 %v2091_v47, %v1626_v56  ;;  %v2092_v30 = vpop.f32.mrb[30].mxu1  ;;  %v2130_v16 = vpop.f32.mrb[32].mxu0 }
 0x538   :  { %v2093_v17 = vpop.f32.mrb[31].mxu1  ;;  %v2131_v18 = vpop.f32.mrb[33].mxu0 }
 0x539   :  { %v1776_v39 = vadd.f32 %v2129_v14, %v1701_v15  ;;  %v2094_v19 = vadd.f32 %v2093_v17, %v2092_v30  ;;  %v2132_v7 = vadd.f32 %v2131_v18, %v2130_v16 }
 0x53b   :  { %v1784_v23 = vadd.f32 %v2485_v49, %v1776_v39  ;;  %v1706_v6 = vadd.f32 %v2094_v19, %v1631_v4 }
 0x53d   :  { %1786 = vst.msk [vmem:[#allocation2] sm:$0xff] %vm125_vm0, %v1784_v23  ;;  %v1781_v24 = vadd.f32 %v2132_v7, %v1706_v6 }
 0x53f   :  { %v1785_v33 = vadd.f32 %v2486_v25, %v1781_v24 }
 0x541   :  { %1787 = vst.msk [vmem:[#allocation2 + $0x8] sm:$0xff] %vm125_vm0, %v1785_v33 }
 0x542   :  { %2498 = shalt.err (!%p2495_p4)
}
 0x543   :  { %s2499_s10 = scalar_lea.hbm %s3812_s9, 256 }
 0x544   :  { %p2500_p5 = scmp.ne.s32.totalorder %s3812_s9, %s2499_s10  ;;  %p2503_p6 = scmp.lt.u32.totalorder %s2499_s10, %s3812_s9 }
 0x546   :  { %p2505_p7 = pnand %p2503_p6, %p2500_p5 }
 0x548   :  { %2508 = shalt.err (!%p2505_p7)
}
 0x549   :  { %s2513_s13 = smov 128   ;;  %s2514_s14 = smov 8  }
 0x54a   :  { %1799 = dma.vmem_to_hbm [thread:$0]  %s1794_s25, 256, %s3812_s9, [#allocation3], %s2513_s13, %s2513_s13, %s2514_s14  }
 0x54b   :  { %2509 = dma.done.wait [#allocation3], 256  }
 0x54c   :  { %2510 = vsyncadd [#allocation3], 4294967040 }
 0x54d   :  { %1803 = vsyncpa [#allocation3], 1 }

</bundles_post_ra>
